<compile_context>
chip_gen: v6e
topology: v6e:2x2x1
jax: 0.10.0
libtpu: 0.0.40
codegen_flags: <defaults>
</compile_context>

<pallas_src>
import functools

import jax
import jax.numpy as jnp
from jax.experimental import pallas as pl
from jax.experimental.pallas import tpu as pltpu


# ----------------------------------------------------------------------------
# Model dimensions (synthetic, AttnSleep-style)
# ----------------------------------------------------------------------------
D_MODEL = 16                  # AFR output channels == TCE d_model
SEQ_LEN = 32                  # TCE sequence length (16 per conv branch)
N_HEADS = 2
HEAD_DIM = D_MODEL // N_HEADS
FF_DIM = 32
N_CLASSES = 5
BRANCH_CH = 32                # channels of each MRCNN conv branch
BRANCH_LEN = SEQ_LEN // 2     # pooled length per branch
K1, K2 = 8, 16                # conv kernel sizes
S1, S2 = 4, 8                 # conv strides
PAD1, PAD2 = 2, 4
POOL1, POOL2 = 4, 2           # maxpool widths

# Fixed positional order of the fused kernel's inputs.
_ARG_NAMES = (
    "p1", "p2",                               # im2col pooling phases
    "w1", "b1", "w2", "b2",                   # MRCNN conv weights
    "afr_w1", "afr_b1", "afr_w2", "afr_b2",   # AFR pointwise convs
    "afr_wd", "afr_bd",
    "se_w1", "se_b1", "se_w2", "se_b2",       # SE excitation MLP
    "wq", "bq", "wk", "bk", "wv", "bv",       # per-head projections (H, D, Dh)
    "wo", "bo",                               # per-head output proj (H, Dh, D)
    "ff_w1", "ff_b1", "ff_w2", "ff_b2",
    "ln1_g", "ln1_b", "ln2_g", "ln2_b",
    "fc_wbig", "fc_b",                        # classifier (weight-side reindex)
    "msel", "mselT", "cls_mask", "gsel",      # constant selector matrices
)


# ----------------------------------------------------------------------------
# The fused forward kernel
# ----------------------------------------------------------------------------
def _fused_forward_kernel(*refs, batch):
    r = dict(zip(_ARG_NAMES, refs[:-1]))
    out_ref = refs[-1]
    B, L = batch, SEQ_LEN
    # TODO(synk): PyTorch nn.GELU defaults to exact erf; tanh-approx GELU is
    # used here (guaranteed Mosaic lowering).
    gelu = functools.partial(jax.nn.gelu, approximate=True)

    # ---------------- MRCNN: conv + GELU + maxpool fused over pool phases ----
    def branch(p_ref, w_ref, b_ref, n_phase):
        w = w_ref[...]
        b = b_ref[...]
        h = None
        for t in range(n_phase):
            a = gelu(jnp.dot(p_ref[t], w, preferred_element_type=jnp.float32) + b)
            h = a if h is None else jnp.maximum(h, a)
        return h                                              # (B*16, 32)

    h1 = branch(r["p1"], r["w1"], r["b1"], POOL1)
    h2 = branch(r["p2"], r["w2"], r["b2"], POOL2)
    # concat branches along time; rows stay ordered (batch, time)
    parts = []
    for b in range(B):
        parts.append(h1[b * BRANCH_LEN:(b + 1) * BRANCH_LEN, :])
        parts.append(h2[b * BRANCH_LEN:(b + 1) * BRANCH_LEN, :])
    feat = jnp.concatenate(parts, axis=0)                     # (B*L, 32)
    # TODO(synk): MRCNN/TCE dropout omitted (inference semantics).

    # ---------------- AFR: SE residual recalibration -------------------------
    h = jnp.maximum(
        jnp.dot(feat, r["afr_w1"][...], preferred_element_type=jnp.float32)
        + r["afr_b1"][...], 0.0)
    h = (jnp.dot(h, r["afr_w2"][...], preferred_element_type=jnp.float32)
         + r["afr_b2"][...])
    res = (jnp.dot(feat, r["afr_wd"][...], preferred_element_type=jnp.float32)
           + r["afr_bd"][...])
    msel = r["msel"][...]                                     # (B, B*L) 0/1
    pooled = jnp.dot(msel, h, preferred_element_type=jnp.float32) * (1.0 / L)
    s = jnp.maximum(
        jnp.dot(pooled, r["se_w1"][...], preferred_element_type=jnp.float32)
        + r["se_b1"][...], 0.0)
    s = jax.nn.sigmoid(
        jnp.dot(s, r["se_w2"][...], preferred_element_type=jnp.float32)
        + r["se_b2"][...])                                    # (B, D)
    srows = jnp.dot(r["mselT"][...], s, preferred_element_type=jnp.float32)
    xt = jnp.maximum(h * srows + res, 0.0)                    # (B*L, D)

    # ---------------- TCE: multi-head self-attention encoder -----------------
    scale = 1.0 / (HEAD_DIM ** 0.5)
    head_proj = []
    for hi in range(N_HEADS):
        q = jnp.dot(xt, r["wq"][hi], preferred_element_type=jnp.float32) + r["bq"][hi]
        k = jnp.dot(xt, r["wk"][hi], preferred_element_type=jnp.float32) + r["bk"][hi]
        v = jnp.dot(xt, r["wv"][hi], preferred_element_type=jnp.float32) + r["bv"][hi]
        o_parts = []
        for b in range(B):
            qb = q[b * L:(b + 1) * L, :]
            kb = k[b * L:(b + 1) * L, :]
            vb = v[b * L:(b + 1) * L, :]
            sc = jnp.dot(qb, kb.T, preferred_element_type=jnp.float32) * scale
            sc = sc - jnp.max(sc, axis=-1, keepdims=True)
            p = jnp.exp(sc)
            p = p * pl.reciprocal(jnp.sum(p, axis=-1, keepdims=True), approx=True)
            o_parts.append(jnp.dot(p, vb, preferred_element_type=jnp.float32))
        o_h = jnp.concatenate(o_parts, axis=0)                # (B*L, Dh)
        head_proj.append(
            jnp.dot(o_h, r["wo"][hi], preferred_element_type=jnp.float32))
    attn_out = head_proj[0]
    for t in head_proj[1:]:
        attn_out = attn_out + t
    attn_out = attn_out + r["bo"][...]

    def layer_norm(z, g, b):
        mu = jnp.mean(z, axis=-1, keepdims=True)
        var = jnp.mean((z - mu) ** 2, axis=-1, keepdims=True)
        return (z - mu) * jax.lax.rsqrt(var + 1e-5) * g + b

    z1 = layer_norm(xt + attn_out, r["ln1_g"][...], r["ln1_b"][...])
    ff = jnp.maximum(
        jnp.dot(z1, r["ff_w1"][...], preferred_element_type=jnp.float32)
        + r["ff_b1"][...], 0.0)
    ff = (jnp.dot(ff, r["ff_w2"][...], preferred_element_type=jnp.float32)
          + r["ff_b2"][...])
    z2 = layer_norm(z1 + ff, r["ln2_g"][...], r["ln2_b"][...])   # (B*L, D)

    # ---------------- classifier: flatten(NCL) + Linear ----------------------
    # yhat[b,n] = sum_{l,d} z2[b*L+l, d] * fc_w[d*L+l, n] + fc_b[n]
    # fc_wbig[d, l*5+n] = fc_w[d*L+l, n]; cls_mask keeps l'==l; msel sums over l
    # within each batch; gsel collapses the (l,n) lanes onto n.
    pbig = jnp.dot(z2, r["fc_wbig"][...], preferred_element_type=jnp.float32)
    pbig = pbig * r["cls_mask"][...]                          # (B*L, L*5)
    srow = jnp.dot(msel, pbig, preferred_element_type=jnp.float32)   # (B, L*5)
    yhat = (jnp.dot(srow, r["gsel"][...], preferred_element_type=jnp.float32)
            + r["fc_b"][...])                                 # (B, 5)
    out_ref[...] = yhat


# ----------------------------------------------------------------------------
# Parameter init (deterministic, synthetic) and layout preparation
# ----------------------------------------------------------------------------
def init_params(key):
    def nrm(k, shape, scale=0.1):
        return scale * jax.random.normal(k, shape, dtype=jnp.float32)

    keys = iter(jax.random.split(key, 32))
    p = {}
    # module1: MRCNN -- two-resolution conv branches
    p["c1_w"] = nrm(next(keys), (32, 1, K1));  p["c1_b"] = nrm(next(keys), (32,))
    p["c2_w"] = nrm(next(keys), (32, 1, K2));  p["c2_b"] = nrm(next(keys), (32,))
    # module2: AFR -- SE residual block (32 -> 16 channels)
    p["afr_w1"] = nrm(next(keys), (16, 32, 1)); p["afr_b1"] = nrm(next(keys), (16,))
    p["afr_w2"] = nrm(next(keys), (16, 16, 1)); p["afr_b2"] = nrm(next(keys), (16,))
    p["afr_wd"] = nrm(next(keys), (16, 32, 1)); p["afr_bd"] = nrm(next(keys), (16,))
    p["se_w1"] = nrm(next(keys), (16, 4));      p["se_b1"] = nrm(next(keys), (4,))
    p["se_w2"] = nrm(next(keys), (4, 16));      p["se_b2"] = nrm(next(keys), (16,))
    # module3: TCE -- MHSA encoder (d_model=16, heads=2)
    for name in ("wq", "wk", "wv", "wo"):
        p[name] = nrm(next(keys), (D_MODEL, D_MODEL))
        p[name + "_b"] = nrm(next(keys), (D_MODEL,))
    p["ff_w1"] = nrm(next(keys), (D_MODEL, FF_DIM)); p["ff_b1"] = nrm(next(keys), (FF_DIM,))
    p["ff_w2"] = nrm(next(keys), (FF_DIM, D_MODEL)); p["ff_b2"] = nrm(next(keys), (D_MODEL,))
    p["ln1_g"] = jnp.ones((D_MODEL,), jnp.float32)
    p["ln1_b"] = jnp.zeros((D_MODEL,), jnp.float32)
    p["ln2_g"] = jnp.ones((D_MODEL,), jnp.float32)
    p["ln2_b"] = jnp.zeros((D_MODEL,), jnp.float32)
    # classifier: Linear(D_MODEL * SEQ_LEN -> 5), NCL flatten order
    p["fc_w"] = nrm(next(keys), (D_MODEL * SEQ_LEN, N_CLASSES))
    p["fc_b"] = nrm(next(keys), (N_CLASSES,))
    return p


def _prep_weights(p):
    """One-time re-layout of weights into kernel-friendly 2-D / per-head form."""
    D, H, Dh, L = D_MODEL, N_HEADS, HEAD_DIM, SEQ_LEN
    w = {}
    w["w1"] = p["c1_w"][:, 0, :].T;           w["b1"] = p["c1_b"].reshape(1, BRANCH_CH)
    w["w2"] = p["c2_w"][:, 0, :].T;           w["b2"] = p["c2_b"].reshape(1, BRANCH_CH)
    w["afr_w1"] = p["afr_w1"][:, :, 0].T;     w["afr_b1"] = p["afr_b1"].reshape(1, D)
    w["afr_w2"] = p["afr_w2"][:, :, 0].T;     w["afr_b2"] = p["afr_b2"].reshape(1, D)
    w["afr_wd"] = p["afr_wd"][:, :, 0].T;     w["afr_bd"] = p["afr_bd"].reshape(1, D)
    w["se_w1"] = p["se_w1"];                  w["se_b1"] = p["se_b1"].reshape(1, -1)
    w["se_w2"] = p["se_w2"];                  w["se_b2"] = p["se_b2"].reshape(1, D)
    for nm in ("wq", "wk", "wv"):
        W, b = p[nm], p[nm + "_b"]
        w[nm] = jnp.stack([W[:, h * Dh:(h + 1) * Dh] for h in range(H)], axis=0)
        w["b" + nm[1]] = jnp.stack(
            [b[h * Dh:(h + 1) * Dh].reshape(1, Dh) for h in range(H)], axis=0)
    w["wo"] = jnp.stack([p["wo"][h * Dh:(h + 1) * Dh, :] for h in range(H)], axis=0)
    w["bo"] = p["wo_b"].reshape(1, D)
    w["ff_w1"] = p["ff_w1"];                  w["ff_b1"] = p["ff_b1"].reshape(1, FF_DIM)
    w["ff_w2"] = p["ff_w2"];                  w["ff_b2"] = p["ff_b2"].reshape(1, D)
    for nm in ("ln1_g", "ln1_b", "ln2_g", "ln2_b"):
        w[nm] = p[nm].reshape(1, D)
    # classifier weight reindex: fc_w[(d*L + l), n]  ->  fc_wbig[d, l*5 + n]
    w["fc_wbig"] = p["fc_w"].reshape(D, L, N_CLASSES).reshape(D, L * N_CLASSES)
    w["fc_b"] = p["fc_b"].reshape(1, N_CLASSES)
    return w


def _prep_inputs(x):
    """im2col pooling-phase slabs + constant selector matrices (tiny, one pass)."""
    B = x.shape[0]
    x2 = x[:, 0, :].astype(jnp.float32)        # single input channel
    j = jnp.arange(BRANCH_LEN)

    def phases(xpad, K, stride, pool):
        outs = []
        for t in range(pool):
            start = (j * pool + t) * stride
            idx = start[:, None] + jnp.arange(K)[None, :]
            outs.append(xpad[:, idx].reshape(B * BRANCH_LEN, K))
        return jnp.stack(outs, axis=0)          # (pool, B*16, K)

    p1 = phases(jnp.pad(x2, ((0, 0), (PAD1, PAD1))), K1, S1, POOL1)
    p2 = phases(jnp.pad(x2, ((0, 0), (PAD2, PAD2))), K2, S2, POOL2)

    rows = B * SEQ_LEN
    r_idx = jnp.arange(rows)
    msel = (jnp.arange(B)[:, None] == (r_idx[None, :] // SEQ_LEN)).astype(jnp.float32)
    c_idx = jnp.arange(SEQ_LEN * N_CLASSES)
    cls_mask = ((r_idx[:, None] % SEQ_LEN)
                == (c_idx[None, :] // N_CLASSES)).astype(jnp.float32)
    gsel = ((c_idx[:, None] % N_CLASSES)
            == jnp.arange(N_CLASSES)[None, :]).astype(jnp.float32)
    return {"p1": p1, "p2": p2, "msel": msel, "mselT": msel.T,
            "cls_mask": cls_mask, "gsel": gsel}


# ----------------------------------------------------------------------------
# ModelCyan forward: a single pallas_call
# ----------------------------------------------------------------------------
def model_cyan_forward(params, x):
    B = x.shape[0]
    prepped = dict(_prep_weights(params))
    prepped.update(_prep_inputs(x))
    inputs = [prepped[name] for name in _ARG_NAMES]

    def full_spec(shape):
        nd = len(shape)
        return pl.BlockSpec(shape, lambda i, _nd=nd: (0,) * _nd)

    return pl.pallas_call(
        functools.partial(_fused_forward_kernel, batch=B),
        out_shape=jax.ShapeDtypeStruct((B, N_CLASSES), jnp.float32),
        grid=(1,),
        in_specs=[full_spec(a.shape) for a in inputs],
        out_specs=pl.BlockSpec((B, N_CLASSES), lambda i: (0, 0)),
        compiler_params=pltpu.CompilerParams(
            dimension_semantics=("arbitrary",)),
    )(*inputs)


if __name__ == "__main__":
    key = jax.random.PRNGKey(0)
    pkey, xkey = jax.random.split(key)
    params = init_params(pkey)
    x = jax.random.normal(xkey, (2, 1, 256), dtype=jnp.float32)   # (B, C_in, L)

    fwd = jax.jit(model_cyan_forward)
    y = fwd(params, x)
    jax.block_until_ready(y)
    assert y.shape == (2, N_CLASSES) and y.dtype == jnp.float32
    assert bool(jnp.isfinite(y).all())
    print("KERNEL_OK")
</pallas_src>

<mosaic_0001>
module attributes {stable_mosaic.version = 11 : i64} {
  func.func @_fused_forward_kernel(%arg0: i32, %arg1: memref<4x32x8xf32, #tpu.memory_space<vmem>>, %arg2: memref<2x32x16xf32, #tpu.memory_space<vmem>>, %arg3: memref<8x32xf32, #tpu.memory_space<vmem>>, %arg4: memref<1x32xf32, #tpu.memory_space<vmem>>, %arg5: memref<16x32xf32, #tpu.memory_space<vmem>>, %arg6: memref<1x32xf32, #tpu.memory_space<vmem>>, %arg7: memref<32x16xf32, #tpu.memory_space<vmem>>, %arg8: memref<1x16xf32, #tpu.memory_space<vmem>>, %arg9: memref<16x16xf32, #tpu.memory_space<vmem>>, %arg10: memref<1x16xf32, #tpu.memory_space<vmem>>, %arg11: memref<32x16xf32, #tpu.memory_space<vmem>>, %arg12: memref<1x16xf32, #tpu.memory_space<vmem>>, %arg13: memref<16x4xf32, #tpu.memory_space<vmem>>, %arg14: memref<1x4xf32, #tpu.memory_space<vmem>>, %arg15: memref<4x16xf32, #tpu.memory_space<vmem>>, %arg16: memref<1x16xf32, #tpu.memory_space<vmem>>, %arg17: memref<2x16x8xf32, #tpu.memory_space<vmem>>, %arg18: memref<2x1x8xf32, #tpu.memory_space<vmem>>, %arg19: memref<2x16x8xf32, #tpu.memory_space<vmem>>, %arg20: memref<2x1x8xf32, #tpu.memory_space<vmem>>, %arg21: memref<2x16x8xf32, #tpu.memory_space<vmem>>, %arg22: memref<2x1x8xf32, #tpu.memory_space<vmem>>, %arg23: memref<2x8x16xf32, #tpu.memory_space<vmem>>, %arg24: memref<1x16xf32, #tpu.memory_space<vmem>>, %arg25: memref<16x32xf32, #tpu.memory_space<vmem>>, %arg26: memref<1x32xf32, #tpu.memory_space<vmem>>, %arg27: memref<32x16xf32, #tpu.memory_space<vmem>>, %arg28: memref<1x16xf32, #tpu.memory_space<vmem>>, %arg29: memref<1x16xf32, #tpu.memory_space<vmem>>, %arg30: memref<1x16xf32, #tpu.memory_space<vmem>>, %arg31: memref<1x16xf32, #tpu.memory_space<vmem>>, %arg32: memref<1x16xf32, #tpu.memory_space<vmem>>, %arg33: memref<16x160xf32, #tpu.memory_space<vmem>>, %arg34: memref<1x5xf32, #tpu.memory_space<vmem>>, %arg35: memref<2x64xf32, #tpu.memory_space<vmem>>, %arg36: memref<64x2xf32, #tpu.memory_space<vmem>>, %arg37: memref<64x160xf32, #tpu.memory_space<vmem>>, %arg38: memref<160x5xf32, #tpu.memory_space<vmem>>, %arg39: memref<2x5xf32, #tpu.memory_space<vmem>>) attributes {dimension_semantics = [#tpu.dimension_semantics<arbitrary>], iteration_bounds = array<i64: 1>, scalar_prefetch = 0 : i64, scratch_operands = 0 : i64, tpu.core_type = #tpu.core_type<tc>, window_params = [{pipeline_mode = #tpu.pipeline_mode<synchronous>, transform_indices = @transform_0, window_bounds = array<i64: 4, 32, 8>}, {pipeline_mode = #tpu.pipeline_mode<synchronous>, transform_indices = @transform_1, window_bounds = array<i64: 2, 32, 16>}, {pipeline_mode = #tpu.pipeline_mode<synchronous>, transform_indices = @transform_2, window_bounds = array<i64: 8, 32>}, {pipeline_mode = #tpu.pipeline_mode<synchronous>, transform_indices = @transform_3, window_bounds = array<i64: 1, 32>}, {pipeline_mode = #tpu.pipeline_mode<synchronous>, transform_indices = @transform_4, window_bounds = array<i64: 16, 32>}, {pipeline_mode = #tpu.pipeline_mode<synchronous>, transform_indices = @transform_5, window_bounds = array<i64: 1, 32>}, {pipeline_mode = #tpu.pipeline_mode<synchronous>, transform_indices = @transform_6, window_bounds = array<i64: 32, 16>}, {pipeline_mode = #tpu.pipeline_mode<synchronous>, transform_indices = @transform_7, window_bounds = array<i64: 1, 16>}, {pipeline_mode = #tpu.pipeline_mode<synchronous>, transform_indices = @transform_8, window_bounds = array<i64: 16, 16>}, {pipeline_mode = #tpu.pipeline_mode<synchronous>, transform_indices = @transform_9, window_bounds = array<i64: 1, 16>}, {pipeline_mode = #tpu.pipeline_mode<synchronous>, transform_indices = @transform_10, window_bounds = array<i64: 32, 16>}, {pipeline_mode = #tpu.pipeline_mode<synchronous>, transform_indices = @transform_11, window_bounds = array<i64: 1, 16>}, {pipeline_mode = #tpu.pipeline_mode<synchronous>, transform_indices = @transform_12, window_bounds = array<i64: 16, 4>}, {pipeline_mode = #tpu.pipeline_mode<synchronous>, transform_indices = @transform_13, window_bounds = array<i64: 1, 4>}, {pipeline_mode = #tpu.pipeline_mode<synchronous>, transform_indices = @transform_14, window_bounds = array<i64: 4, 16>}, {pipeline_mode = #tpu.pipeline_mode<synchronous>, transform_indices = @transform_15, window_bounds = array<i64: 1, 16>}, {pipeline_mode = #tpu.pipeline_mode<synchronous>, transform_indices = @transform_16, window_bounds = array<i64: 2, 16, 8>}, {pipeline_mode = #tpu.pipeline_mode<synchronous>, transform_indices = @transform_17, window_bounds = array<i64: 2, 1, 8>}, {pipeline_mode = #tpu.pipeline_mode<synchronous>, transform_indices = @transform_18, window_bounds = array<i64: 2, 16, 8>}, {pipeline_mode = #tpu.pipeline_mode<synchronous>, transform_indices = @transform_19, window_bounds = array<i64: 2, 1, 8>}, {pipeline_mode = #tpu.pipeline_mode<synchronous>, transform_indices = @transform_20, window_bounds = array<i64: 2, 16, 8>}, {pipeline_mode = #tpu.pipeline_mode<synchronous>, transform_indices = @transform_21, window_bounds = array<i64: 2, 1, 8>}, {pipeline_mode = #tpu.pipeline_mode<synchronous>, transform_indices = @transform_22, window_bounds = array<i64: 2, 8, 16>}, {pipeline_mode = #tpu.pipeline_mode<synchronous>, transform_indices = @transform_23, window_bounds = array<i64: 1, 16>}, {pipeline_mode = #tpu.pipeline_mode<synchronous>, transform_indices = @transform_24, window_bounds = array<i64: 16, 32>}, {pipeline_mode = #tpu.pipeline_mode<synchronous>, transform_indices = @transform_25, window_bounds = array<i64: 1, 32>}, {pipeline_mode = #tpu.pipeline_mode<synchronous>, transform_indices = @transform_26, window_bounds = array<i64: 32, 16>}, {pipeline_mode = #tpu.pipeline_mode<synchronous>, transform_indices = @transform_27, window_bounds = array<i64: 1, 16>}, {pipeline_mode = #tpu.pipeline_mode<synchronous>, transform_indices = @transform_28, window_bounds = array<i64: 1, 16>}, {pipeline_mode = #tpu.pipeline_mode<synchronous>, transform_indices = @transform_29, window_bounds = array<i64: 1, 16>}, {pipeline_mode = #tpu.pipeline_mode<synchronous>, transform_indices = @transform_30, window_bounds = array<i64: 1, 16>}, {pipeline_mode = #tpu.pipeline_mode<synchronous>, transform_indices = @transform_31, window_bounds = array<i64: 1, 16>}, {pipeline_mode = #tpu.pipeline_mode<synchronous>, transform_indices = @transform_32, window_bounds = array<i64: 16, 160>}, {pipeline_mode = #tpu.pipeline_mode<synchronous>, transform_indices = @transform_33, window_bounds = array<i64: 1, 5>}, {pipeline_mode = #tpu.pipeline_mode<synchronous>, transform_indices = @transform_34, window_bounds = array<i64: 2, 64>}, {pipeline_mode = #tpu.pipeline_mode<synchronous>, transform_indices = @transform_35, window_bounds = array<i64: 64, 2>}, {pipeline_mode = #tpu.pipeline_mode<synchronous>, transform_indices = @transform_36, window_bounds = array<i64: 64, 160>}, {pipeline_mode = #tpu.pipeline_mode<synchronous>, transform_indices = @transform_37, window_bounds = array<i64: 160, 5>}, {pipeline_mode = #tpu.pipeline_mode<synchronous>, transform_indices = @transform_38, window_bounds = array<i64: 2, 5>}]} {
    %c0 = arith.constant 0 : index
    %c0_0 = arith.constant 0 : index
    %0 = vector.load %arg3[%c0, %c0_0] : memref<8x32xf32, #tpu.memory_space<vmem>>, vector<8x32xf32>
    %c0_1 = arith.constant 0 : index
    %c0_2 = arith.constant 0 : index
    %1 = vector.load %arg4[%c0_1, %c0_2] : memref<1x32xf32, #tpu.memory_space<vmem>>, vector<1x32xf32>
    %c0_3 = arith.constant 0 : index
    %c0_4 = arith.constant 0 : index
    %c0_5 = arith.constant 0 : index
    %2 = vector.load %arg1[%c0_3, %c0_4, %c0_5] : memref<4x32x8xf32, #tpu.memory_space<vmem>>, vector<1x32x8xf32>
    %3 = vector.shape_cast %2 : vector<1x32x8xf32> to vector<32x8xf32>
    %cst = arith.constant dense<0.000000e+00> : vector<32x32xf32>
    %4 = tpu.matmul %3, %0, %cst {dimension_numbers = #tpu.dot_dimension_numbers<[1], [0], [0], [1], [0, 0, 1, 1], [], []>} : vector<32x8xf32>, vector<8x32xf32>, vector<32x32xf32> -> vector<32x32xf32>
    %5 = vector.broadcast %1 : vector<1x32xf32> to vector<32x32xf32>
    %6 = arith.addf %4, %5 : vector<32x32xf32>
    %7 = arith.mulf %6, %6 : vector<32x32xf32>
    %8 = arith.mulf %6, %7 : vector<32x32xf32>
    %cst_6 = arith.constant 4.471500e-02 : f32
    %9 = vector.broadcast %cst_6 : f32 to vector<32x32xf32>
    %10 = arith.mulf %9, %8 : vector<32x32xf32>
    %11 = arith.addf %6, %10 : vector<32x32xf32>
    %cst_7 = arith.constant 0.797884583 : f32
    %12 = vector.broadcast %cst_7 : f32 to vector<32x32xf32>
    %13 = arith.mulf %12, %11 : vector<32x32xf32>
    %14 = math.tanh %13 : vector<32x32xf32>
    %cst_8 = arith.constant 1.000000e+00 : f32
    %15 = vector.broadcast %cst_8 : f32 to vector<32x32xf32>
    %16 = arith.addf %15, %14 : vector<32x32xf32>
    %cst_9 = arith.constant 5.000000e-01 : f32
    %17 = vector.broadcast %cst_9 : f32 to vector<32x32xf32>
    %18 = arith.mulf %17, %16 : vector<32x32xf32>
    %19 = arith.mulf %6, %18 : vector<32x32xf32>
    %c1 = arith.constant 1 : index
    %c0_10 = arith.constant 0 : index
    %c0_11 = arith.constant 0 : index
    %20 = vector.load %arg1[%c1, %c0_10, %c0_11] : memref<4x32x8xf32, #tpu.memory_space<vmem>>, vector<1x32x8xf32>
    %21 = vector.shape_cast %20 : vector<1x32x8xf32> to vector<32x8xf32>
    %cst_12 = arith.constant dense<0.000000e+00> : vector<32x32xf32>
    %22 = tpu.matmul %21, %0, %cst_12 {dimension_numbers = #tpu.dot_dimension_numbers<[1], [0], [0], [1], [0, 0, 1, 1], [], []>} : vector<32x8xf32>, vector<8x32xf32>, vector<32x32xf32> -> vector<32x32xf32>
    %23 = vector.broadcast %1 : vector<1x32xf32> to vector<32x32xf32>
    %24 = arith.addf %22, %23 : vector<32x32xf32>
    %25 = arith.mulf %24, %24 : vector<32x32xf32>
    %26 = arith.mulf %24, %25 : vector<32x32xf32>
    %cst_13 = arith.constant 4.471500e-02 : f32
    %27 = vector.broadcast %cst_13 : f32 to vector<32x32xf32>
    %28 = arith.mulf %27, %26 : vector<32x32xf32>
    %29 = arith.addf %24, %28 : vector<32x32xf32>
    %cst_14 = arith.constant 0.797884583 : f32
    %30 = vector.broadcast %cst_14 : f32 to vector<32x32xf32>
    %31 = arith.mulf %30, %29 : vector<32x32xf32>
    %32 = math.tanh %31 : vector<32x32xf32>
    %cst_15 = arith.constant 1.000000e+00 : f32
    %33 = vector.broadcast %cst_15 : f32 to vector<32x32xf32>
    %34 = arith.addf %33, %32 : vector<32x32xf32>
    %cst_16 = arith.constant 5.000000e-01 : f32
    %35 = vector.broadcast %cst_16 : f32 to vector<32x32xf32>
    %36 = arith.mulf %35, %34 : vector<32x32xf32>
    %37 = arith.mulf %24, %36 : vector<32x32xf32>
    %38 = arith.maximumf %19, %37 : vector<32x32xf32>
    %c2 = arith.constant 2 : index
    %c0_17 = arith.constant 0 : index
    %c0_18 = arith.constant 0 : index
    %39 = vector.load %arg1[%c2, %c0_17, %c0_18] : memref<4x32x8xf32, #tpu.memory_space<vmem>>, vector<1x32x8xf32>
    %40 = vector.shape_cast %39 : vector<1x32x8xf32> to vector<32x8xf32>
    %cst_19 = arith.constant dense<0.000000e+00> : vector<32x32xf32>
    %41 = tpu.matmul %40, %0, %cst_19 {dimension_numbers = #tpu.dot_dimension_numbers<[1], [0], [0], [1], [0, 0, 1, 1], [], []>} : vector<32x8xf32>, vector<8x32xf32>, vector<32x32xf32> -> vector<32x32xf32>
    %42 = vector.broadcast %1 : vector<1x32xf32> to vector<32x32xf32>
    %43 = arith.addf %41, %42 : vector<32x32xf32>
    %44 = arith.mulf %43, %43 : vector<32x32xf32>
    %45 = arith.mulf %43, %44 : vector<32x32xf32>
    %cst_20 = arith.constant 4.471500e-02 : f32
    %46 = vector.broadcast %cst_20 : f32 to vector<32x32xf32>
    %47 = arith.mulf %46, %45 : vector<32x32xf32>
    %48 = arith.addf %43, %47 : vector<32x32xf32>
    %cst_21 = arith.constant 0.797884583 : f32
    %49 = vector.broadcast %cst_21 : f32 to vector<32x32xf32>
    %50 = arith.mulf %49, %48 : vector<32x32xf32>
    %51 = math.tanh %50 : vector<32x32xf32>
    %cst_22 = arith.constant 1.000000e+00 : f32
    %52 = vector.broadcast %cst_22 : f32 to vector<32x32xf32>
    %53 = arith.addf %52, %51 : vector<32x32xf32>
    %cst_23 = arith.constant 5.000000e-01 : f32
    %54 = vector.broadcast %cst_23 : f32 to vector<32x32xf32>
    %55 = arith.mulf %54, %53 : vector<32x32xf32>
    %56 = arith.mulf %43, %55 : vector<32x32xf32>
    %57 = arith.maximumf %38, %56 : vector<32x32xf32>
    %c3 = arith.constant 3 : index
    %c0_24 = arith.constant 0 : index
    %c0_25 = arith.constant 0 : index
    %58 = vector.load %arg1[%c3, %c0_24, %c0_25] : memref<4x32x8xf32, #tpu.memory_space<vmem>>, vector<1x32x8xf32>
    %59 = vector.shape_cast %58 : vector<1x32x8xf32> to vector<32x8xf32>
    %cst_26 = arith.constant dense<0.000000e+00> : vector<32x32xf32>
    %60 = tpu.matmul %59, %0, %cst_26 {dimension_numbers = #tpu.dot_dimension_numbers<[1], [0], [0], [1], [0, 0, 1, 1], [], []>} : vector<32x8xf32>, vector<8x32xf32>, vector<32x32xf32> -> vector<32x32xf32>
    %61 = vector.broadcast %1 : vector<1x32xf32> to vector<32x32xf32>
    %62 = arith.addf %60, %61 : vector<32x32xf32>
    %63 = arith.mulf %62, %62 : vector<32x32xf32>
    %64 = arith.mulf %62, %63 : vector<32x32xf32>
    %cst_27 = arith.constant 4.471500e-02 : f32
    %65 = vector.broadcast %cst_27 : f32 to vector<32x32xf32>
    %66 = arith.mulf %65, %64 : vector<32x32xf32>
    %67 = arith.addf %62, %66 : vector<32x32xf32>
    %cst_28 = arith.constant 0.797884583 : f32
    %68 = vector.broadcast %cst_28 : f32 to vector<32x32xf32>
    %69 = arith.mulf %68, %67 : vector<32x32xf32>
    %70 = math.tanh %69 : vector<32x32xf32>
    %cst_29 = arith.constant 1.000000e+00 : f32
    %71 = vector.broadcast %cst_29 : f32 to vector<32x32xf32>
    %72 = arith.addf %71, %70 : vector<32x32xf32>
    %cst_30 = arith.constant 5.000000e-01 : f32
    %73 = vector.broadcast %cst_30 : f32 to vector<32x32xf32>
    %74 = arith.mulf %73, %72 : vector<32x32xf32>
    %75 = arith.mulf %62, %74 : vector<32x32xf32>
    %76 = arith.maximumf %57, %75 : vector<32x32xf32>
    %c0_31 = arith.constant 0 : index
    %c0_32 = arith.constant 0 : index
    %77 = vector.load %arg5[%c0_31, %c0_32] : memref<16x32xf32, #tpu.memory_space<vmem>>, vector<16x32xf32>
    %c0_33 = arith.constant 0 : index
    %c0_34 = arith.constant 0 : index
    %78 = vector.load %arg6[%c0_33, %c0_34] : memref<1x32xf32, #tpu.memory_space<vmem>>, vector<1x32xf32>
    %c0_35 = arith.constant 0 : index
    %c0_36 = arith.constant 0 : index
    %c0_37 = arith.constant 0 : index
    %79 = vector.load %arg2[%c0_35, %c0_36, %c0_37] : memref<2x32x16xf32, #tpu.memory_space<vmem>>, vector<1x32x16xf32>
    %80 = vector.shape_cast %79 : vector<1x32x16xf32> to vector<32x16xf32>
    %cst_38 = arith.constant dense<0.000000e+00> : vector<32x32xf32>
    %81 = tpu.matmul %80, %77, %cst_38 {dimension_numbers = #tpu.dot_dimension_numbers<[1], [0], [0], [1], [0, 0, 1, 1], [], []>} : vector<32x16xf32>, vector<16x32xf32>, vector<32x32xf32> -> vector<32x32xf32>
    %82 = vector.broadcast %78 : vector<1x32xf32> to vector<32x32xf32>
    %83 = arith.addf %81, %82 : vector<32x32xf32>
    %84 = arith.mulf %83, %83 : vector<32x32xf32>
    %85 = arith.mulf %83, %84 : vector<32x32xf32>
    %cst_39 = arith.constant 4.471500e-02 : f32
    %86 = vector.broadcast %cst_39 : f32 to vector<32x32xf32>
    %87 = arith.mulf %86, %85 : vector<32x32xf32>
    %88 = arith.addf %83, %87 : vector<32x32xf32>
    %cst_40 = arith.constant 0.797884583 : f32
    %89 = vector.broadcast %cst_40 : f32 to vector<32x32xf32>
    %90 = arith.mulf %89, %88 : vector<32x32xf32>
    %91 = math.tanh %90 : vector<32x32xf32>
    %cst_41 = arith.constant 1.000000e+00 : f32
    %92 = vector.broadcast %cst_41 : f32 to vector<32x32xf32>
    %93 = arith.addf %92, %91 : vector<32x32xf32>
    %cst_42 = arith.constant 5.000000e-01 : f32
    %94 = vector.broadcast %cst_42 : f32 to vector<32x32xf32>
    %95 = arith.mulf %94, %93 : vector<32x32xf32>
    %96 = arith.mulf %83, %95 : vector<32x32xf32>
    %c1_43 = arith.constant 1 : index
    %c0_44 = arith.constant 0 : index
    %c0_45 = arith.constant 0 : index
    %97 = vector.load %arg2[%c1_43, %c0_44, %c0_45] : memref<2x32x16xf32, #tpu.memory_space<vmem>>, vector<1x32x16xf32>
    %98 = vector.shape_cast %97 : vector<1x32x16xf32> to vector<32x16xf32>
    %cst_46 = arith.constant dense<0.000000e+00> : vector<32x32xf32>
    %99 = tpu.matmul %98, %77, %cst_46 {dimension_numbers = #tpu.dot_dimension_numbers<[1], [0], [0], [1], [0, 0, 1, 1], [], []>} : vector<32x16xf32>, vector<16x32xf32>, vector<32x32xf32> -> vector<32x32xf32>
    %100 = vector.broadcast %78 : vector<1x32xf32> to vector<32x32xf32>
    %101 = arith.addf %99, %100 : vector<32x32xf32>
    %102 = arith.mulf %101, %101 : vector<32x32xf32>
    %103 = arith.mulf %101, %102 : vector<32x32xf32>
    %cst_47 = arith.constant 4.471500e-02 : f32
    %104 = vector.broadcast %cst_47 : f32 to vector<32x32xf32>
    %105 = arith.mulf %104, %103 : vector<32x32xf32>
    %106 = arith.addf %101, %105 : vector<32x32xf32>
    %cst_48 = arith.constant 0.797884583 : f32
    %107 = vector.broadcast %cst_48 : f32 to vector<32x32xf32>
    %108 = arith.mulf %107, %106 : vector<32x32xf32>
    %109 = math.tanh %108 : vector<32x32xf32>
    %cst_49 = arith.constant 1.000000e+00 : f32
    %110 = vector.broadcast %cst_49 : f32 to vector<32x32xf32>
    %111 = arith.addf %110, %109 : vector<32x32xf32>
    %cst_50 = arith.constant 5.000000e-01 : f32
    %112 = vector.broadcast %cst_50 : f32 to vector<32x32xf32>
    %113 = arith.mulf %112, %111 : vector<32x32xf32>
    %114 = arith.mulf %101, %113 : vector<32x32xf32>
    %115 = arith.maximumf %96, %114 : vector<32x32xf32>
    %116 = vector.extract_strided_slice %76 {offsets = [0, 0], sizes = [16, 32], strides = [1, 1]} : vector<32x32xf32> to vector<16x32xf32>
    %117 = vector.extract_strided_slice %115 {offsets = [0, 0], sizes = [16, 32], strides = [1, 1]} : vector<32x32xf32> to vector<16x32xf32>
    %118 = vector.extract_strided_slice %76 {offsets = [16, 0], sizes = [16, 32], strides = [1, 1]} : vector<32x32xf32> to vector<16x32xf32>
    %119 = vector.extract_strided_slice %115 {offsets = [16, 0], sizes = [16, 32], strides = [1, 1]} : vector<32x32xf32> to vector<16x32xf32>
    %120 = tpu.concatenate %116, %117, %118, %119 in 0 : vector<16x32xf32>, vector<16x32xf32>, vector<16x32xf32>, vector<16x32xf32> -> vector<64x32xf32>
    %c0_51 = arith.constant 0 : index
    %c0_52 = arith.constant 0 : index
    %121 = vector.load %arg7[%c0_51, %c0_52] : memref<32x16xf32, #tpu.memory_space<vmem>>, vector<32x16xf32>
    %cst_53 = arith.constant dense<0.000000e+00> : vector<64x16xf32>
    %122 = tpu.matmul %120, %121, %cst_53 {dimension_numbers = #tpu.dot_dimension_numbers<[1], [0], [0], [1], [0, 0, 1, 1], [], []>} : vector<64x32xf32>, vector<32x16xf32>, vector<64x16xf32> -> vector<64x16xf32>
    %c0_54 = arith.constant 0 : index
    %c0_55 = arith.constant 0 : index
    %123 = vector.load %arg8[%c0_54, %c0_55] : memref<1x16xf32, #tpu.memory_space<vmem>>, vector<1x16xf32>
    %124 = vector.broadcast %123 : vector<1x16xf32> to vector<64x16xf32>
    %125 = arith.addf %122, %124 : vector<64x16xf32>
    %cst_56 = arith.constant 0.000000e+00 : f32
    %126 = vector.broadcast %cst_56 : f32 to vector<64x16xf32>
    %127 = arith.maximumf %125, %126 : vector<64x16xf32>
    %c0_57 = arith.constant 0 : index
    %c0_58 = arith.constant 0 : index
    %128 = vector.load %arg9[%c0_57, %c0_58] : memref<16x16xf32, #tpu.memory_space<vmem>>, vector<16x16xf32>
    %cst_59 = arith.constant dense<0.000000e+00> : vector<64x16xf32>
    %129 = tpu.matmul %127, %128, %cst_59 {dimension_numbers = #tpu.dot_dimension_numbers<[1], [0], [0], [1], [0, 0, 1, 1], [], []>} : vector<64x16xf32>, vector<16x16xf32>, vector<64x16xf32> -> vector<64x16xf32>
    %c0_60 = arith.constant 0 : index
    %c0_61 = arith.constant 0 : index
    %130 = vector.load %arg10[%c0_60, %c0_61] : memref<1x16xf32, #tpu.memory_space<vmem>>, vector<1x16xf32>
    %131 = vector.broadcast %130 : vector<1x16xf32> to vector<64x16xf32>
    %132 = arith.addf %129, %131 : vector<64x16xf32>
    %c0_62 = arith.constant 0 : index
    %c0_63 = arith.constant 0 : index
    %133 = vector.load %arg11[%c0_62, %c0_63] : memref<32x16xf32, #tpu.memory_space<vmem>>, vector<32x16xf32>
    %cst_64 = arith.constant dense<0.000000e+00> : vector<64x16xf32>
    %134 = tpu.matmul %120, %133, %cst_64 {dimension_numbers = #tpu.dot_dimension_numbers<[1], [0], [0], [1], [0, 0, 1, 1], [], []>} : vector<64x32xf32>, vector<32x16xf32>, vector<64x16xf32> -> vector<64x16xf32>
    %c0_65 = arith.constant 0 : index
    %c0_66 = arith.constant 0 : index
    %135 = vector.load %arg12[%c0_65, %c0_66] : memref<1x16xf32, #tpu.memory_space<vmem>>, vector<1x16xf32>
    %136 = vector.broadcast %135 : vector<1x16xf32> to vector<64x16xf32>
    %137 = arith.addf %134, %136 : vector<64x16xf32>
    %c0_67 = arith.constant 0 : index
    %c0_68 = arith.constant 0 : index
    %138 = vector.load %arg35[%c0_67, %c0_68] : memref<2x64xf32, #tpu.memory_space<vmem>>, vector<2x64xf32>
    %cst_69 = arith.constant dense<0.000000e+00> : vector<2x16xf32>
    %139 = tpu.matmul %138, %132, %cst_69 {dimension_numbers = #tpu.dot_dimension_numbers<[1], [0], [0], [1], [0, 0, 1, 1], [], []>} : vector<2x64xf32>, vector<64x16xf32>, vector<2x16xf32> -> vector<2x16xf32>
    %cst_70 = arith.constant 3.125000e-02 : f32
    %140 = vector.broadcast %cst_70 : f32 to vector<2x16xf32>
    %141 = arith.mulf %139, %140 : vector<2x16xf32>
    %c0_71 = arith.constant 0 : index
    %c0_72 = arith.constant 0 : index
    %142 = vector.load %arg13[%c0_71, %c0_72] : memref<16x4xf32, #tpu.memory_space<vmem>>, vector<16x4xf32>
    %cst_73 = arith.constant dense<0.000000e+00> : vector<2x4xf32>
    %143 = tpu.matmul %141, %142, %cst_73 {dimension_numbers = #tpu.dot_dimension_numbers<[1], [0], [0], [1], [0, 0, 1, 1], [], []>} : vector<2x16xf32>, vector<16x4xf32>, vector<2x4xf32> -> vector<2x4xf32>
    %c0_74 = arith.constant 0 : index
    %c0_75 = arith.constant 0 : index
    %144 = vector.load %arg14[%c0_74, %c0_75] : memref<1x4xf32, #tpu.memory_space<vmem>>, vector<1x4xf32>
    %145 = vector.broadcast %144 : vector<1x4xf32> to vector<2x4xf32>
    %146 = arith.addf %143, %145 : vector<2x4xf32>
    %cst_76 = arith.constant 0.000000e+00 : f32
    %147 = vector.broadcast %cst_76 : f32 to vector<2x4xf32>
    %148 = arith.maximumf %146, %147 : vector<2x4xf32>
    %c0_77 = arith.constant 0 : index
    %c0_78 = arith.constant 0 : index
    %149 = vector.load %arg15[%c0_77, %c0_78] : memref<4x16xf32, #tpu.memory_space<vmem>>, vector<4x16xf32>
    %cst_79 = arith.constant dense<0.000000e+00> : vector<2x16xf32>
    %150 = tpu.matmul %148, %149, %cst_79 {dimension_numbers = #tpu.dot_dimension_numbers<[1], [0], [0], [1], [0, 0, 1, 1], [], []>} : vector<2x4xf32>, vector<4x16xf32>, vector<2x16xf32> -> vector<2x16xf32>
    %c0_80 = arith.constant 0 : index
    %c0_81 = arith.constant 0 : index
    %151 = vector.load %arg16[%c0_80, %c0_81] : memref<1x16xf32, #tpu.memory_space<vmem>>, vector<1x16xf32>
    %152 = vector.broadcast %151 : vector<1x16xf32> to vector<2x16xf32>
    %153 = arith.addf %150, %152 : vector<2x16xf32>
    %154 = arith.negf %153 : vector<2x16xf32>
    %155 = math.exp %154 : vector<2x16xf32>
    %cst_82 = arith.constant 1.000000e+00 : f32
    %156 = vector.broadcast %cst_82 : f32 to vector<2x16xf32>
    %157 = arith.addf %156, %155 : vector<2x16xf32>
    %158 = arith.divf %156, %157 : vector<2x16xf32>
    %c0_83 = arith.constant 0 : index
    %c0_84 = arith.constant 0 : index
    %159 = vector.load %arg36[%c0_83, %c0_84] : memref<64x2xf32, #tpu.memory_space<vmem>>, vector<64x2xf32>
    %cst_85 = arith.constant dense<0.000000e+00> : vector<64x16xf32>
    %160 = tpu.matmul %159, %158, %cst_85 {dimension_numbers = #tpu.dot_dimension_numbers<[1], [0], [0], [1], [0, 0, 1, 1], [], []>} : vector<64x2xf32>, vector<2x16xf32>, vector<64x16xf32> -> vector<64x16xf32>
    %161 = arith.mulf %132, %160 : vector<64x16xf32>
    %162 = arith.addf %161, %137 : vector<64x16xf32>
    %cst_86 = arith.constant 0.000000e+00 : f32
    %163 = vector.broadcast %cst_86 : f32 to vector<64x16xf32>
    %164 = arith.maximumf %162, %163 : vector<64x16xf32>
    %c0_87 = arith.constant 0 : index
    %c0_88 = arith.constant 0 : index
    %c0_89 = arith.constant 0 : index
    %165 = vector.load %arg17[%c0_87, %c0_88, %c0_89] : memref<2x16x8xf32, #tpu.memory_space<vmem>>, vector<1x16x8xf32>
    %166 = vector.shape_cast %165 : vector<1x16x8xf32> to vector<16x8xf32>
    %cst_90 = arith.constant dense<0.000000e+00> : vector<64x8xf32>
    %167 = tpu.matmul %164, %166, %cst_90 {dimension_numbers = #tpu.dot_dimension_numbers<[1], [0], [0], [1], [0, 0, 1, 1], [], []>} : vector<64x16xf32>, vector<16x8xf32>, vector<64x8xf32> -> vector<64x8xf32>
    %c0_91 = arith.constant 0 : index
    %c0_92 = arith.constant 0 : index
    %c0_93 = arith.constant 0 : index
    %168 = vector.load %arg18[%c0_91, %c0_92, %c0_93] : memref<2x1x8xf32, #tpu.memory_space<vmem>>, vector<1x1x8xf32>
    %169 = vector.shape_cast %168 : vector<1x1x8xf32> to vector<1x8xf32>
    %170 = vector.broadcast %169 : vector<1x8xf32> to vector<64x8xf32>
    %171 = arith.addf %167, %170 : vector<64x8xf32>
    %c0_94 = arith.constant 0 : index
    %c0_95 = arith.constant 0 : index
    %c0_96 = arith.constant 0 : index
    %172 = vector.load %arg19[%c0_94, %c0_95, %c0_96] : memref<2x16x8xf32, #tpu.memory_space<vmem>>, vector<1x16x8xf32>
    %173 = vector.shape_cast %172 : vector<1x16x8xf32> to vector<16x8xf32>
    %cst_97 = arith.constant dense<0.000000e+00> : vector<64x8xf32>
    %174 = tpu.matmul %164, %173, %cst_97 {dimension_numbers = #tpu.dot_dimension_numbers<[1], [0], [0], [1], [0, 0, 1, 1], [], []>} : vector<64x16xf32>, vector<16x8xf32>, vector<64x8xf32> -> vector<64x8xf32>
    %c0_98 = arith.constant 0 : index
    %c0_99 = arith.constant 0 : index
    %c0_100 = arith.constant 0 : index
    %175 = vector.load %arg20[%c0_98, %c0_99, %c0_100] : memref<2x1x8xf32, #tpu.memory_space<vmem>>, vector<1x1x8xf32>
    %176 = vector.shape_cast %175 : vector<1x1x8xf32> to vector<1x8xf32>
    %177 = vector.broadcast %176 : vector<1x8xf32> to vector<64x8xf32>
    %178 = arith.addf %174, %177 : vector<64x8xf32>
    %c0_101 = arith.constant 0 : index
    %c0_102 = arith.constant 0 : index
    %c0_103 = arith.constant 0 : index
    %179 = vector.load %arg21[%c0_101, %c0_102, %c0_103] : memref<2x16x8xf32, #tpu.memory_space<vmem>>, vector<1x16x8xf32>
    %180 = vector.shape_cast %179 : vector<1x16x8xf32> to vector<16x8xf32>
    %cst_104 = arith.constant dense<0.000000e+00> : vector<64x8xf32>
    %181 = tpu.matmul %164, %180, %cst_104 {dimension_numbers = #tpu.dot_dimension_numbers<[1], [0], [0], [1], [0, 0, 1, 1], [], []>} : vector<64x16xf32>, vector<16x8xf32>, vector<64x8xf32> -> vector<64x8xf32>
    %c0_105 = arith.constant 0 : index
    %c0_106 = arith.constant 0 : index
    %c0_107 = arith.constant 0 : index
    %182 = vector.load %arg22[%c0_105, %c0_106, %c0_107] : memref<2x1x8xf32, #tpu.memory_space<vmem>>, vector<1x1x8xf32>
    %183 = vector.shape_cast %182 : vector<1x1x8xf32> to vector<1x8xf32>
    %184 = vector.broadcast %183 : vector<1x8xf32> to vector<64x8xf32>
    %185 = arith.addf %181, %184 : vector<64x8xf32>
    %186 = vector.extract_strided_slice %171 {offsets = [0, 0], sizes = [32, 8], strides = [1, 1]} : vector<64x8xf32> to vector<32x8xf32>
    %187 = vector.extract_strided_slice %178 {offsets = [0, 0], sizes = [32, 8], strides = [1, 1]} : vector<64x8xf32> to vector<32x8xf32>
    %188 = vector.extract_strided_slice %185 {offsets = [0, 0], sizes = [32, 8], strides = [1, 1]} : vector<64x8xf32> to vector<32x8xf32>
    %189 = tpu.transpose %187, [1, 0] : vector<32x8xf32> -> vector<8x32xf32>
    %cst_108 = arith.constant dense<0.000000e+00> : vector<32x32xf32>
    %190 = tpu.matmul %186, %189, %cst_108 {dimension_numbers = #tpu.dot_dimension_numbers<[1], [0], [0], [1], [0, 0, 1, 1], [], []>} : vector<32x8xf32>, vector<8x32xf32>, vector<32x32xf32> -> vector<32x32xf32>
    %cst_109 = arith.constant 0.353553385 : f32
    %191 = vector.broadcast %cst_109 : f32 to vector<32x32xf32>
    %192 = arith.mulf %190, %191 : vector<32x32xf32>
    %cst_110 = arith.constant dense<0xFF800000> : vector<32xf32>
    %193 = vector.multi_reduction <maximumf>, %192, %cst_110 [1] : vector<32x32xf32> to vector<32xf32>
    %194 = vector.shape_cast %193 : vector<32xf32> to vector<32x1xf32>
    %195 = vector.broadcast %194 : vector<32x1xf32> to vector<32x32xf32>
    %196 = arith.subf %192, %195 : vector<32x32xf32>
    %197 = math.exp %196 : vector<32x32xf32>
    %cst_111 = arith.constant dense<0.000000e+00> : vector<32xf32>
    %198 = vector.multi_reduction <add>, %197, %cst_111 [1] : vector<32x32xf32> to vector<32xf32>
    %199 = vector.shape_cast %198 : vector<32xf32> to vector<32x1xf32>
    %200 = tpu.reciprocal %199 {approx = true} : vector<32x1xf32> -> vector<32x1xf32>
    %201 = vector.broadcast %200 : vector<32x1xf32> to vector<32x32xf32>
    %202 = arith.mulf %197, %201 : vector<32x32xf32>
    %cst_112 = arith.constant dense<0.000000e+00> : vector<32x8xf32>
    %203 = tpu.matmul %202, %188, %cst_112 {dimension_numbers = #tpu.dot_dimension_numbers<[1], [0], [0], [1], [0, 0, 1, 1], [], []>} : vector<32x32xf32>, vector<32x8xf32>, vector<32x8xf32> -> vector<32x8xf32>
    %204 = vector.extract_strided_slice %171 {offsets = [32, 0], sizes = [32, 8], strides = [1, 1]} : vector<64x8xf32> to vector<32x8xf32>
    %205 = vector.extract_strided_slice %178 {offsets = [32, 0], sizes = [32, 8], strides = [1, 1]} : vector<64x8xf32> to vector<32x8xf32>
    %206 = vector.extract_strided_slice %185 {offsets = [32, 0], sizes = [32, 8], strides = [1, 1]} : vector<64x8xf32> to vector<32x8xf32>
    %207 = tpu.transpose %205, [1, 0] : vector<32x8xf32> -> vector<8x32xf32>
    %cst_113 = arith.constant dense<0.000000e+00> : vector<32x32xf32>
    %208 = tpu.matmul %204, %207, %cst_113 {dimension_numbers = #tpu.dot_dimension_numbers<[1], [0], [0], [1], [0, 0, 1, 1], [], []>} : vector<32x8xf32>, vector<8x32xf32>, vector<32x32xf32> -> vector<32x32xf32>
    %cst_114 = arith.constant 0.353553385 : f32
    %209 = vector.broadcast %cst_114 : f32 to vector<32x32xf32>
    %210 = arith.mulf %208, %209 : vector<32x32xf32>
    %cst_115 = arith.constant dense<0xFF800000> : vector<32xf32>
    %211 = vector.multi_reduction <maximumf>, %210, %cst_115 [1] : vector<32x32xf32> to vector<32xf32>
    %212 = vector.shape_cast %211 : vector<32xf32> to vector<32x1xf32>
    %213 = vector.broadcast %212 : vector<32x1xf32> to vector<32x32xf32>
    %214 = arith.subf %210, %213 : vector<32x32xf32>
    %215 = math.exp %214 : vector<32x32xf32>
    %cst_116 = arith.constant dense<0.000000e+00> : vector<32xf32>
    %216 = vector.multi_reduction <add>, %215, %cst_116 [1] : vector<32x32xf32> to vector<32xf32>
    %217 = vector.shape_cast %216 : vector<32xf32> to vector<32x1xf32>
    %218 = tpu.reciprocal %217 {approx = true} : vector<32x1xf32> -> vector<32x1xf32>
    %219 = vector.broadcast %218 : vector<32x1xf32> to vector<32x32xf32>
    %220 = arith.mulf %215, %219 : vector<32x32xf32>
    %cst_117 = arith.constant dense<0.000000e+00> : vector<32x8xf32>
    %221 = tpu.matmul %220, %206, %cst_117 {dimension_numbers = #tpu.dot_dimension_numbers<[1], [0], [0], [1], [0, 0, 1, 1], [], []>} : vector<32x32xf32>, vector<32x8xf32>, vector<32x8xf32> -> vector<32x8xf32>
    %222 = tpu.concatenate %203, %221 in 0 : vector<32x8xf32>, vector<32x8xf32> -> vector<64x8xf32>
    %c0_118 = arith.constant 0 : index
    %c0_119 = arith.constant 0 : index
    %c0_120 = arith.constant 0 : index
    %223 = vector.load %arg23[%c0_118, %c0_119, %c0_120] : memref<2x8x16xf32, #tpu.memory_space<vmem>>, vector<1x8x16xf32>
    %224 = vector.shape_cast %223 : vector<1x8x16xf32> to vector<8x16xf32>
    %cst_121 = arith.constant dense<0.000000e+00> : vector<64x16xf32>
    %225 = tpu.matmul %222, %224, %cst_121 {dimension_numbers = #tpu.dot_dimension_numbers<[1], [0], [0], [1], [0, 0, 1, 1], [], []>} : vector<64x8xf32>, vector<8x16xf32>, vector<64x16xf32> -> vector<64x16xf32>
    %c1_122 = arith.constant 1 : index
    %c0_123 = arith.constant 0 : index
    %c0_124 = arith.constant 0 : index
    %226 = vector.load %arg17[%c1_122, %c0_123, %c0_124] : memref<2x16x8xf32, #tpu.memory_space<vmem>>, vector<1x16x8xf32>
    %227 = vector.shape_cast %226 : vector<1x16x8xf32> to vector<16x8xf32>
    %cst_125 = arith.constant dense<0.000000e+00> : vector<64x8xf32>
    %228 = tpu.matmul %164, %227, %cst_125 {dimension_numbers = #tpu.dot_dimension_numbers<[1], [0], [0], [1], [0, 0, 1, 1], [], []>} : vector<64x16xf32>, vector<16x8xf32>, vector<64x8xf32> -> vector<64x8xf32>
    %c1_126 = arith.constant 1 : index
    %c0_127 = arith.constant 0 : index
    %c0_128 = arith.constant 0 : index
    %229 = vector.load %arg18[%c1_126, %c0_127, %c0_128] : memref<2x1x8xf32, #tpu.memory_space<vmem>>, vector<1x1x8xf32>
    %230 = vector.shape_cast %229 : vector<1x1x8xf32> to vector<1x8xf32>
    %231 = vector.broadcast %230 : vector<1x8xf32> to vector<64x8xf32>
    %232 = arith.addf %228, %231 : vector<64x8xf32>
    %c1_129 = arith.constant 1 : index
    %c0_130 = arith.constant 0 : index
    %c0_131 = arith.constant 0 : index
    %233 = vector.load %arg19[%c1_129, %c0_130, %c0_131] : memref<2x16x8xf32, #tpu.memory_space<vmem>>, vector<1x16x8xf32>
    %234 = vector.shape_cast %233 : vector<1x16x8xf32> to vector<16x8xf32>
    %cst_132 = arith.constant dense<0.000000e+00> : vector<64x8xf32>
    %235 = tpu.matmul %164, %234, %cst_132 {dimension_numbers = #tpu.dot_dimension_numbers<[1], [0], [0], [1], [0, 0, 1, 1], [], []>} : vector<64x16xf32>, vector<16x8xf32>, vector<64x8xf32> -> vector<64x8xf32>
    %c1_133 = arith.constant 1 : index
    %c0_134 = arith.constant 0 : index
    %c0_135 = arith.constant 0 : index
    %236 = vector.load %arg20[%c1_133, %c0_134, %c0_135] : memref<2x1x8xf32, #tpu.memory_space<vmem>>, vector<1x1x8xf32>
    %237 = vector.shape_cast %236 : vector<1x1x8xf32> to vector<1x8xf32>
    %238 = vector.broadcast %237 : vector<1x8xf32> to vector<64x8xf32>
    %239 = arith.addf %235, %238 : vector<64x8xf32>
    %c1_136 = arith.constant 1 : index
    %c0_137 = arith.constant 0 : index
    %c0_138 = arith.constant 0 : index
    %240 = vector.load %arg21[%c1_136, %c0_137, %c0_138] : memref<2x16x8xf32, #tpu.memory_space<vmem>>, vector<1x16x8xf32>
    %241 = vector.shape_cast %240 : vector<1x16x8xf32> to vector<16x8xf32>
    %cst_139 = arith.constant dense<0.000000e+00> : vector<64x8xf32>
    %242 = tpu.matmul %164, %241, %cst_139 {dimension_numbers = #tpu.dot_dimension_numbers<[1], [0], [0], [1], [0, 0, 1, 1], [], []>} : vector<64x16xf32>, vector<16x8xf32>, vector<64x8xf32> -> vector<64x8xf32>
    %c1_140 = arith.constant 1 : index
    %c0_141 = arith.constant 0 : index
    %c0_142 = arith.constant 0 : index
    %243 = vector.load %arg22[%c1_140, %c0_141, %c0_142] : memref<2x1x8xf32, #tpu.memory_space<vmem>>, vector<1x1x8xf32>
    %244 = vector.shape_cast %243 : vector<1x1x8xf32> to vector<1x8xf32>
    %245 = vector.broadcast %244 : vector<1x8xf32> to vector<64x8xf32>
    %246 = arith.addf %242, %245 : vector<64x8xf32>
    %247 = vector.extract_strided_slice %232 {offsets = [0, 0], sizes = [32, 8], strides = [1, 1]} : vector<64x8xf32> to vector<32x8xf32>
    %248 = vector.extract_strided_slice %239 {offsets = [0, 0], sizes = [32, 8], strides = [1, 1]} : vector<64x8xf32> to vector<32x8xf32>
    %249 = vector.extract_strided_slice %246 {offsets = [0, 0], sizes = [32, 8], strides = [1, 1]} : vector<64x8xf32> to vector<32x8xf32>
    %250 = tpu.transpose %248, [1, 0] : vector<32x8xf32> -> vector<8x32xf32>
    %cst_143 = arith.constant dense<0.000000e+00> : vector<32x32xf32>
    %251 = tpu.matmul %247, %250, %cst_143 {dimension_numbers = #tpu.dot_dimension_numbers<[1], [0], [0], [1], [0, 0, 1, 1], [], []>} : vector<32x8xf32>, vector<8x32xf32>, vector<32x32xf32> -> vector<32x32xf32>
    %cst_144 = arith.constant 0.353553385 : f32
    %252 = vector.broadcast %cst_144 : f32 to vector<32x32xf32>
    %253 = arith.mulf %251, %252 : vector<32x32xf32>
    %cst_145 = arith.constant dense<0xFF800000> : vector<32xf32>
    %254 = vector.multi_reduction <maximumf>, %253, %cst_145 [1] : vector<32x32xf32> to vector<32xf32>
    %255 = vector.shape_cast %254 : vector<32xf32> to vector<32x1xf32>
    %256 = vector.broadcast %255 : vector<32x1xf32> to vector<32x32xf32>
    %257 = arith.subf %253, %256 : vector<32x32xf32>
    %258 = math.exp %257 : vector<32x32xf32>
    %cst_146 = arith.constant dense<0.000000e+00> : vector<32xf32>
    %259 = vector.multi_reduction <add>, %258, %cst_146 [1] : vector<32x32xf32> to vector<32xf32>
    %260 = vector.shape_cast %259 : vector<32xf32> to vector<32x1xf32>
    %261 = tpu.reciprocal %260 {approx = true} : vector<32x1xf32> -> vector<32x1xf32>
    %262 = vector.broadcast %261 : vector<32x1xf32> to vector<32x32xf32>
    %263 = arith.mulf %258, %262 : vector<32x32xf32>
    %cst_147 = arith.constant dense<0.000000e+00> : vector<32x8xf32>
    %264 = tpu.matmul %263, %249, %cst_147 {dimension_numbers = #tpu.dot_dimension_numbers<[1], [0], [0], [1], [0, 0, 1, 1], [], []>} : vector<32x32xf32>, vector<32x8xf32>, vector<32x8xf32> -> vector<32x8xf32>
    %265 = vector.extract_strided_slice %232 {offsets = [32, 0], sizes = [32, 8], strides = [1, 1]} : vector<64x8xf32> to vector<32x8xf32>
    %266 = vector.extract_strided_slice %239 {offsets = [32, 0], sizes = [32, 8], strides = [1, 1]} : vector<64x8xf32> to vector<32x8xf32>
    %267 = vector.extract_strided_slice %246 {offsets = [32, 0], sizes = [32, 8], strides = [1, 1]} : vector<64x8xf32> to vector<32x8xf32>
    %268 = tpu.transpose %266, [1, 0] : vector<32x8xf32> -> vector<8x32xf32>
    %cst_148 = arith.constant dense<0.000000e+00> : vector<32x32xf32>
    %269 = tpu.matmul %265, %268, %cst_148 {dimension_numbers = #tpu.dot_dimension_numbers<[1], [0], [0], [1], [0, 0, 1, 1], [], []>} : vector<32x8xf32>, vector<8x32xf32>, vector<32x32xf32> -> vector<32x32xf32>
    %cst_149 = arith.constant 0.353553385 : f32
    %270 = vector.broadcast %cst_149 : f32 to vector<32x32xf32>
    %271 = arith.mulf %269, %270 : vector<32x32xf32>
    %cst_150 = arith.constant dense<0xFF800000> : vector<32xf32>
    %272 = vector.multi_reduction <maximumf>, %271, %cst_150 [1] : vector<32x32xf32> to vector<32xf32>
    %273 = vector.shape_cast %272 : vector<32xf32> to vector<32x1xf32>
    %274 = vector.broadcast %273 : vector<32x1xf32> to vector<32x32xf32>
    %275 = arith.subf %271, %274 : vector<32x32xf32>
    %276 = math.exp %275 : vector<32x32xf32>
    %cst_151 = arith.constant dense<0.000000e+00> : vector<32xf32>
    %277 = vector.multi_reduction <add>, %276, %cst_151 [1] : vector<32x32xf32> to vector<32xf32>
    %278 = vector.shape_cast %277 : vector<32xf32> to vector<32x1xf32>
    %279 = tpu.reciprocal %278 {approx = true} : vector<32x1xf32> -> vector<32x1xf32>
    %280 = vector.broadcast %279 : vector<32x1xf32> to vector<32x32xf32>
    %281 = arith.mulf %276, %280 : vector<32x32xf32>
    %cst_152 = arith.constant dense<0.000000e+00> : vector<32x8xf32>
    %282 = tpu.matmul %281, %267, %cst_152 {dimension_numbers = #tpu.dot_dimension_numbers<[1], [0], [0], [1], [0, 0, 1, 1], [], []>} : vector<32x32xf32>, vector<32x8xf32>, vector<32x8xf32> -> vector<32x8xf32>
    %283 = tpu.concatenate %264, %282 in 0 : vector<32x8xf32>, vector<32x8xf32> -> vector<64x8xf32>
    %c1_153 = arith.constant 1 : index
    %c0_154 = arith.constant 0 : index
    %c0_155 = arith.constant 0 : index
    %284 = vector.load %arg23[%c1_153, %c0_154, %c0_155] : memref<2x8x16xf32, #tpu.memory_space<vmem>>, vector<1x8x16xf32>
    %285 = vector.shape_cast %284 : vector<1x8x16xf32> to vector<8x16xf32>
    %cst_156 = arith.constant dense<0.000000e+00> : vector<64x16xf32>
    %286 = tpu.matmul %283, %285, %cst_156 {dimension_numbers = #tpu.dot_dimension_numbers<[1], [0], [0], [1], [0, 0, 1, 1], [], []>} : vector<64x8xf32>, vector<8x16xf32>, vector<64x16xf32> -> vector<64x16xf32>
    %287 = arith.addf %225, %286 : vector<64x16xf32>
    %c0_157 = arith.constant 0 : index
    %c0_158 = arith.constant 0 : index
    %288 = vector.load %arg24[%c0_157, %c0_158] : memref<1x16xf32, #tpu.memory_space<vmem>>, vector<1x16xf32>
    %289 = vector.broadcast %288 : vector<1x16xf32> to vector<64x16xf32>
    %290 = arith.addf %287, %289 : vector<64x16xf32>
    %291 = arith.addf %164, %290 : vector<64x16xf32>
    %c0_159 = arith.constant 0 : index
    %c0_160 = arith.constant 0 : index
    %292 = vector.load %arg29[%c0_159, %c0_160] : memref<1x16xf32, #tpu.memory_space<vmem>>, vector<1x16xf32>
    %c0_161 = arith.constant 0 : index
    %c0_162 = arith.constant 0 : index
    %293 = vector.load %arg30[%c0_161, %c0_162] : memref<1x16xf32, #tpu.memory_space<vmem>>, vector<1x16xf32>
    %cst_163 = arith.constant dense<0.000000e+00> : vector<64xf32>
    %294 = vector.multi_reduction <add>, %291, %cst_163 [1] : vector<64x16xf32> to vector<64xf32>
    %295 = vector.shape_cast %294 : vector<64xf32> to vector<64x1xf32>
    %cst_164 = arith.constant 1.600000e+01 : f32
    %296 = vector.broadcast %cst_164 : f32 to vector<64x1xf32>
    %297 = arith.divf %295, %296 : vector<64x1xf32>
    %298 = vector.broadcast %297 : vector<64x1xf32> to vector<64x16xf32>
    %299 = arith.subf %291, %298 : vector<64x16xf32>
    %300 = arith.mulf %299, %299 : vector<64x16xf32>
    %cst_165 = arith.constant dense<0.000000e+00> : vector<64xf32>
    %301 = vector.multi_reduction <add>, %300, %cst_165 [1] : vector<64x16xf32> to vector<64xf32>
    %302 = vector.shape_cast %301 : vector<64xf32> to vector<64x1xf32>
    %cst_166 = arith.constant 1.600000e+01 : f32
    %303 = vector.broadcast %cst_166 : f32 to vector<64x1xf32>
    %304 = arith.divf %302, %303 : vector<64x1xf32>
    %305 = vector.broadcast %297 : vector<64x1xf32> to vector<64x16xf32>
    %306 = arith.subf %291, %305 : vector<64x16xf32>
    %cst_167 = arith.constant 9.99999974E-6 : f32
    %307 = vector.broadcast %cst_167 : f32 to vector<64x1xf32>
    %308 = arith.addf %304, %307 : vector<64x1xf32>
    %309 = math.rsqrt %308 : vector<64x1xf32>
    %310 = vector.broadcast %309 : vector<64x1xf32> to vector<64x16xf32>
    %311 = arith.mulf %306, %310 : vector<64x16xf32>
    %312 = vector.broadcast %292 : vector<1x16xf32> to vector<64x16xf32>
    %313 = arith.mulf %311, %312 : vector<64x16xf32>
    %314 = vector.broadcast %293 : vector<1x16xf32> to vector<64x16xf32>
    %315 = arith.addf %313, %314 : vector<64x16xf32>
    %c0_168 = arith.constant 0 : index
    %c0_169 = arith.constant 0 : index
    %316 = vector.load %arg25[%c0_168, %c0_169] : memref<16x32xf32, #tpu.memory_space<vmem>>, vector<16x32xf32>
    %cst_170 = arith.constant dense<0.000000e+00> : vector<64x32xf32>
    %317 = tpu.matmul %315, %316, %cst_170 {dimension_numbers = #tpu.dot_dimension_numbers<[1], [0], [0], [1], [0, 0, 1, 1], [], []>} : vector<64x16xf32>, vector<16x32xf32>, vector<64x32xf32> -> vector<64x32xf32>
    %c0_171 = arith.constant 0 : index
    %c0_172 = arith.constant 0 : index
    %318 = vector.load %arg26[%c0_171, %c0_172] : memref<1x32xf32, #tpu.memory_space<vmem>>, vector<1x32xf32>
    %319 = vector.broadcast %318 : vector<1x32xf32> to vector<64x32xf32>
    %320 = arith.addf %317, %319 : vector<64x32xf32>
    %cst_173 = arith.constant 0.000000e+00 : f32
    %321 = vector.broadcast %cst_173 : f32 to vector<64x32xf32>
    %322 = arith.maximumf %320, %321 : vector<64x32xf32>
    %c0_174 = arith.constant 0 : index
    %c0_175 = arith.constant 0 : index
    %323 = vector.load %arg27[%c0_174, %c0_175] : memref<32x16xf32, #tpu.memory_space<vmem>>, vector<32x16xf32>
    %cst_176 = arith.constant dense<0.000000e+00> : vector<64x16xf32>
    %324 = tpu.matmul %322, %323, %cst_176 {dimension_numbers = #tpu.dot_dimension_numbers<[1], [0], [0], [1], [0, 0, 1, 1], [], []>} : vector<64x32xf32>, vector<32x16xf32>, vector<64x16xf32> -> vector<64x16xf32>
    %c0_177 = arith.constant 0 : index
    %c0_178 = arith.constant 0 : index
    %325 = vector.load %arg28[%c0_177, %c0_178] : memref<1x16xf32, #tpu.memory_space<vmem>>, vector<1x16xf32>
    %326 = vector.broadcast %325 : vector<1x16xf32> to vector<64x16xf32>
    %327 = arith.addf %324, %326 : vector<64x16xf32>
    %328 = arith.addf %315, %327 : vector<64x16xf32>
    %c0_179 = arith.constant 0 : index
    %c0_180 = arith.constant 0 : index
    %329 = vector.load %arg31[%c0_179, %c0_180] : memref<1x16xf32, #tpu.memory_space<vmem>>, vector<1x16xf32>
    %c0_181 = arith.constant 0 : index
    %c0_182 = arith.constant 0 : index
    %330 = vector.load %arg32[%c0_181, %c0_182] : memref<1x16xf32, #tpu.memory_space<vmem>>, vector<1x16xf32>
    %cst_183 = arith.constant dense<0.000000e+00> : vector<64xf32>
    %331 = vector.multi_reduction <add>, %328, %cst_183 [1] : vector<64x16xf32> to vector<64xf32>
    %332 = vector.shape_cast %331 : vector<64xf32> to vector<64x1xf32>
    %cst_184 = arith.constant 1.600000e+01 : f32
    %333 = vector.broadcast %cst_184 : f32 to vector<64x1xf32>
    %334 = arith.divf %332, %333 : vector<64x1xf32>
    %335 = vector.broadcast %334 : vector<64x1xf32> to vector<64x16xf32>
    %336 = arith.subf %328, %335 : vector<64x16xf32>
    %337 = arith.mulf %336, %336 : vector<64x16xf32>
    %cst_185 = arith.constant dense<0.000000e+00> : vector<64xf32>
    %338 = vector.multi_reduction <add>, %337, %cst_185 [1] : vector<64x16xf32> to vector<64xf32>
    %339 = vector.shape_cast %338 : vector<64xf32> to vector<64x1xf32>
    %cst_186 = arith.constant 1.600000e+01 : f32
    %340 = vector.broadcast %cst_186 : f32 to vector<64x1xf32>
    %341 = arith.divf %339, %340 : vector<64x1xf32>
    %342 = vector.broadcast %334 : vector<64x1xf32> to vector<64x16xf32>
    %343 = arith.subf %328, %342 : vector<64x16xf32>
    %cst_187 = arith.constant 9.99999974E-6 : f32
    %344 = vector.broadcast %cst_187 : f32 to vector<64x1xf32>
    %345 = arith.addf %341, %344 : vector<64x1xf32>
    %346 = math.rsqrt %345 : vector<64x1xf32>
    %347 = vector.broadcast %346 : vector<64x1xf32> to vector<64x16xf32>
    %348 = arith.mulf %343, %347 : vector<64x16xf32>
    %349 = vector.broadcast %329 : vector<1x16xf32> to vector<64x16xf32>
    %350 = arith.mulf %348, %349 : vector<64x16xf32>
    %351 = vector.broadcast %330 : vector<1x16xf32> to vector<64x16xf32>
    %352 = arith.addf %350, %351 : vector<64x16xf32>
    %c0_188 = arith.constant 0 : index
    %c0_189 = arith.constant 0 : index
    %353 = vector.load %arg33[%c0_188, %c0_189] : memref<16x160xf32, #tpu.memory_space<vmem>>, vector<16x160xf32>
    %cst_190 = arith.constant dense<0.000000e+00> : vector<64x160xf32>
    %354 = tpu.matmul %352, %353, %cst_190 {dimension_numbers = #tpu.dot_dimension_numbers<[1], [0], [0], [1], [0, 0, 1, 1], [], []>} : vector<64x16xf32>, vector<16x160xf32>, vector<64x160xf32> -> vector<64x160xf32>
    %c0_191 = arith.constant 0 : index
    %c0_192 = arith.constant 0 : index
    %355 = vector.load %arg37[%c0_191, %c0_192] : memref<64x160xf32, #tpu.memory_space<vmem>>, vector<64x160xf32>
    %356 = arith.mulf %354, %355 : vector<64x160xf32>
    %cst_193 = arith.constant dense<0.000000e+00> : vector<2x160xf32>
    %357 = tpu.matmul %138, %356, %cst_193 {dimension_numbers = #tpu.dot_dimension_numbers<[1], [0], [0], [1], [0, 0, 1, 1], [], []>} : vector<2x64xf32>, vector<64x160xf32>, vector<2x160xf32> -> vector<2x160xf32>
    %c0_194 = arith.constant 0 : index
    %c0_195 = arith.constant 0 : index
    %358 = vector.load %arg38[%c0_194, %c0_195] : memref<160x5xf32, #tpu.memory_space<vmem>>, vector<160x5xf32>
    %cst_196 = arith.constant dense<0.000000e+00> : vector<2x5xf32>
    %359 = tpu.matmul %357, %358, %cst_196 {dimension_numbers = #tpu.dot_dimension_numbers<[1], [0], [0], [1], [0, 0, 1, 1], [], []>} : vector<2x160xf32>, vector<160x5xf32>, vector<2x5xf32> -> vector<2x5xf32>
    %c0_197 = arith.constant 0 : index
    %c0_198 = arith.constant 0 : index
    %360 = vector.load %arg34[%c0_197, %c0_198] : memref<1x5xf32, #tpu.memory_space<vmem>>, vector<1x5xf32>
    %361 = vector.broadcast %360 : vector<1x5xf32> to vector<2x5xf32>
    %362 = arith.addf %359, %361 : vector<2x5xf32>
    %c0_199 = arith.constant 0 : index
    %c0_200 = arith.constant 0 : index
    %363 = vector.load %arg39[%c0_199, %c0_200] : memref<2x5xf32, #tpu.memory_space<vmem>>, vector<2x5xf32>
    tpu.vector_store %arg39[%c0_199, %c0_200], %362 {strides = array<i32>} : memref<2x5xf32, #tpu.memory_space<vmem>>, vector<2x5xf32>,
    return
  }
  func.func @transform_0(%arg0: i32) -> (i32, i32, i32) {
    %c0_i32 = arith.constant 0 : i32
    %c0_i32_0 = arith.constant 0 : i32
    %c0_i32_1 = arith.constant 0 : i32
    %c0_i32_2 = arith.constant 0 : i32
    return %c0_i32, %c0_i32_0, %c0_i32_1 : i32, i32, i32
  }
  func.func @transform_1(%arg0: i32) -> (i32, i32, i32) {
    %c0_i32 = arith.constant 0 : i32
    %c0_i32_0 = arith.constant 0 : i32
    %c0_i32_1 = arith.constant 0 : i32
    %c0_i32_2 = arith.constant 0 : i32
    return %c0_i32, %c0_i32_0, %c0_i32_1 : i32, i32, i32
  }
  func.func @transform_2(%arg0: i32) -> (i32, i32) {
    %c0_i32 = arith.constant 0 : i32
    %c0_i32_0 = arith.constant 0 : i32
    %c0_i32_1 = arith.constant 0 : i32
    return %c0_i32, %c0_i32_0 : i32, i32
  }
  func.func @transform_3(%arg0: i32) -> (i32, i32) {
    %c0_i32 = arith.constant 0 : i32
    %c0_i32_0 = arith.constant 0 : i32
    %c0_i32_1 = arith.constant 0 : i32
    return %c0_i32, %c0_i32_0 : i32, i32
  }
  func.func @transform_4(%arg0: i32) -> (i32, i32) {
    %c0_i32 = arith.constant 0 : i32
    %c0_i32_0 = arith.constant 0 : i32
    %c0_i32_1 = arith.constant 0 : i32
    return %c0_i32, %c0_i32_0 : i32, i32
  }
  func.func @transform_5(%arg0: i32) -> (i32, i32) {
    %c0_i32 = arith.constant 0 : i32
    %c0_i32_0 = arith.constant 0 : i32
    %c0_i32_1 = arith.constant 0 : i32
    return %c0_i32, %c0_i32_0 : i32, i32
  }
  func.func @transform_6(%arg0: i32) -> (i32, i32) {
    %c0_i32 = arith.constant 0 : i32
    %c0_i32_0 = arith.constant 0 : i32
    %c0_i32_1 = arith.constant 0 : i32
    return %c0_i32, %c0_i32_0 : i32, i32
  }
  func.func @transform_7(%arg0: i32) -> (i32, i32) {
    %c0_i32 = arith.constant 0 : i32
    %c0_i32_0 = arith.constant 0 : i32
    %c0_i32_1 = arith.constant 0 : i32
    return %c0_i32, %c0_i32_0 : i32, i32
  }
  func.func @transform_8(%arg0: i32) -> (i32, i32) {
    %c0_i32 = arith.constant 0 : i32
    %c0_i32_0 = arith.constant 0 : i32
    %c0_i32_1 = arith.constant 0 : i32
    return %c0_i32, %c0_i32_0 : i32, i32
  }
  func.func @transform_9(%arg0: i32) -> (i32, i32) {
    %c0_i32 = arith.constant 0 : i32
    %c0_i32_0 = arith.constant 0 : i32
    %c0_i32_1 = arith.constant 0 : i32
    return %c0_i32, %c0_i32_0 : i32, i32
  }
  func.func @transform_10(%arg0: i32) -> (i32, i32) {
    %c0_i32 = arith.constant 0 : i32
    %c0_i32_0 = arith.constant 0 : i32
    %c0_i32_1 = arith.constant 0 : i32
    return %c0_i32, %c0_i32_0 : i32, i32
  }
  func.func @transform_11(%arg0: i32) -> (i32, i32) {
    %c0_i32 = arith.constant 0 : i32
    %c0_i32_0 = arith.constant 0 : i32
    %c0_i32_1 = arith.constant 0 : i32
    return %c0_i32, %c0_i32_0 : i32, i32
  }
  func.func @transform_12(%arg0: i32) -> (i32, i32) {
    %c0_i32 = arith.constant 0 : i32
    %c0_i32_0 = arith.constant 0 : i32
    %c0_i32_1 = arith.constant 0 : i32
    return %c0_i32, %c0_i32_0 : i32, i32
  }
  func.func @transform_13(%arg0: i32) -> (i32, i32) {
    %c0_i32 = arith.constant 0 : i32
    %c0_i32_0 = arith.constant 0 : i32
    %c0_i32_1 = arith.constant 0 : i32
    return %c0_i32, %c0_i32_0 : i32, i32
  }
  func.func @transform_14(%arg0: i32) -> (i32, i32) {
    %c0_i32 = arith.constant 0 : i32
    %c0_i32_0 = arith.constant 0 : i32
    %c0_i32_1 = arith.constant 0 : i32
    return %c0_i32, %c0_i32_0 : i32, i32
  }
  func.func @transform_15(%arg0: i32) -> (i32, i32) {
    %c0_i32 = arith.constant 0 : i32
    %c0_i32_0 = arith.constant 0 : i32
    %c0_i32_1 = arith.constant 0 : i32
    return %c0_i32, %c0_i32_0 : i32, i32
  }
  func.func @transform_16(%arg0: i32) -> (i32, i32, i32) {
    %c0_i32 = arith.constant 0 : i32
    %c0_i32_0 = arith.constant 0 : i32
    %c0_i32_1 = arith.constant 0 : i32
    %c0_i32_2 = arith.constant 0 : i32
    return %c0_i32, %c0_i32_0, %c0_i32_1 : i32, i32, i32
  }
  func.func @transform_17(%arg0: i32) -> (i32, i32, i32) {
    %c0_i32 = arith.constant 0 : i32
    %c0_i32_0 = arith.constant 0 : i32
    %c0_i32_1 = arith.constant 0 : i32
    %c0_i32_2 = arith.constant 0 : i32
    return %c0_i32, %c0_i32_0, %c0_i32_1 : i32, i32, i32
  }
  func.func @transform_18(%arg0: i32) -> (i32, i32, i32) {
    %c0_i32 = arith.constant 0 : i32
    %c0_i32_0 = arith.constant 0 : i32
    %c0_i32_1 = arith.constant 0 : i32
    %c0_i32_2 = arith.constant 0 : i32
    return %c0_i32, %c0_i32_0, %c0_i32_1 : i32, i32, i32
  }
  func.func @transform_19(%arg0: i32) -> (i32, i32, i32) {
    %c0_i32 = arith.constant 0 : i32
    %c0_i32_0 = arith.constant 0 : i32
    %c0_i32_1 = arith.constant 0 : i32
    %c0_i32_2 = arith.constant 0 : i32
    return %c0_i32, %c0_i32_0, %c0_i32_1 : i32, i32, i32
  }
  func.func @transform_20(%arg0: i32) -> (i32, i32, i32) {
    %c0_i32 = arith.constant 0 : i32
    %c0_i32_0 = arith.constant 0 : i32
    %c0_i32_1 = arith.constant 0 : i32
    %c0_i32_2 = arith.constant 0 : i32
    return %c0_i32, %c0_i32_0, %c0_i32_1 : i32, i32, i32
  }
  func.func @transform_21(%arg0: i32) -> (i32, i32, i32) {
    %c0_i32 = arith.constant 0 : i32
    %c0_i32_0 = arith.constant 0 : i32
    %c0_i32_1 = arith.constant 0 : i32
    %c0_i32_2 = arith.constant 0 : i32
    return %c0_i32, %c0_i32_0, %c0_i32_1 : i32, i32, i32
  }
  func.func @transform_22(%arg0: i32) -> (i32, i32, i32) {
    %c0_i32 = arith.constant 0 : i32
    %c0_i32_0 = arith.constant 0 : i32
    %c0_i32_1 = arith.constant 0 : i32
    %c0_i32_2 = arith.constant 0 : i32
    return %c0_i32, %c0_i32_0, %c0_i32_1 : i32, i32, i32
  }
  func.func @transform_23(%arg0: i32) -> (i32, i32) {
    %c0_i32 = arith.constant 0 : i32
    %c0_i32_0 = arith.constant 0 : i32
    %c0_i32_1 = arith.constant 0 : i32
    return %c0_i32, %c0_i32_0 : i32, i32
  }
  func.func @transform_24(%arg0: i32) -> (i32, i32) {
    %c0_i32 = arith.constant 0 : i32
    %c0_i32_0 = arith.constant 0 : i32
    %c0_i32_1 = arith.constant 0 : i32
    return %c0_i32, %c0_i32_0 : i32, i32
  }
  func.func @transform_25(%arg0: i32) -> (i32, i32) {
    %c0_i32 = arith.constant 0 : i32
    %c0_i32_0 = arith.constant 0 : i32
    %c0_i32_1 = arith.constant 0 : i32
    return %c0_i32, %c0_i32_0 : i32, i32
  }
  func.func @transform_26(%arg0: i32) -> (i32, i32) {
    %c0_i32 = arith.constant 0 : i32
    %c0_i32_0 = arith.constant 0 : i32
    %c0_i32_1 = arith.constant 0 : i32
    return %c0_i32, %c0_i32_0 : i32, i32
  }
  func.func @transform_27(%arg0: i32) -> (i32, i32) {
    %c0_i32 = arith.constant 0 : i32
    %c0_i32_0 = arith.constant 0 : i32
    %c0_i32_1 = arith.constant 0 : i32
    return %c0_i32, %c0_i32_0 : i32, i32
  }
  func.func @transform_28(%arg0: i32) -> (i32, i32) {
    %c0_i32 = arith.constant 0 : i32
    %c0_i32_0 = arith.constant 0 : i32
    %c0_i32_1 = arith.constant 0 : i32
    return %c0_i32, %c0_i32_0 : i32, i32
  }
  func.func @transform_29(%arg0: i32) -> (i32, i32) {
    %c0_i32 = arith.constant 0 : i32
    %c0_i32_0 = arith.constant 0 : i32
    %c0_i32_1 = arith.constant 0 : i32
    return %c0_i32, %c0_i32_0 : i32, i32
  }
  func.func @transform_30(%arg0: i32) -> (i32, i32) {
    %c0_i32 = arith.constant 0 : i32
    %c0_i32_0 = arith.constant 0 : i32
    %c0_i32_1 = arith.constant 0 : i32
    return %c0_i32, %c0_i32_0 : i32, i32
  }
  func.func @transform_31(%arg0: i32) -> (i32, i32) {
    %c0_i32 = arith.constant 0 : i32
    %c0_i32_0 = arith.constant 0 : i32
    %c0_i32_1 = arith.constant 0 : i32
    return %c0_i32, %c0_i32_0 : i32, i32
  }
  func.func @transform_32(%arg0: i32) -> (i32, i32) {
    %c0_i32 = arith.constant 0 : i32
    %c0_i32_0 = arith.constant 0 : i32
    %c0_i32_1 = arith.constant 0 : i32
    return %c0_i32, %c0_i32_0 : i32, i32
  }
  func.func @transform_33(%arg0: i32) -> (i32, i32) {
    %c0_i32 = arith.constant 0 : i32
    %c0_i32_0 = arith.constant 0 : i32
    %c0_i32_1 = arith.constant 0 : i32
    return %c0_i32, %c0_i32_0 : i32, i32
  }
  func.func @transform_34(%arg0: i32) -> (i32, i32) {
    %c0_i32 = arith.constant 0 : i32
    %c0_i32_0 = arith.constant 0 : i32
    %c0_i32_1 = arith.constant 0 : i32
    return %c0_i32, %c0_i32_0 : i32, i32
  }
  func.func @transform_35(%arg0: i32) -> (i32, i32) {
    %c0_i32 = arith.constant 0 : i32
    %c0_i32_0 = arith.constant 0 : i32
    %c0_i32_1 = arith.constant 0 : i32
    return %c0_i32, %c0_i32_0 : i32, i32
  }
  func.func @transform_36(%arg0: i32) -> (i32, i32) {
    %c0_i32 = arith.constant 0 : i32
    %c0_i32_0 = arith.constant 0 : i32
    %c0_i32_1 = arith.constant 0 : i32
    return %c0_i32, %c0_i32_0 : i32, i32
  }
  func.func @transform_37(%arg0: i32) -> (i32, i32) {
    %c0_i32 = arith.constant 0 : i32
    %c0_i32_0 = arith.constant 0 : i32
    %c0_i32_1 = arith.constant 0 : i32
    return %c0_i32, %c0_i32_0 : i32, i32
  }
  func.func @transform_38(%arg0: i32) -> (i32, i32) {
    %c0_i32 = arith.constant 0 : i32
    %c0_i32_0 = arith.constant 0 : i32
    %c0_i32_1 = arith.constant 0 : i32
    return %c0_i32, %c0_i32_0 : i32, i32
  }
}

</mosaic_0001>

<bundles_post_ra>
// kernel: model_cyan_forward.1
= control target key start
LH: loop header
LB: loop body
LE: loop exit
PB: predicated region body
PF: predicated region fallthrough
CT: control target
= control target key end

     0   :  { %s5952_s6 = smov 1   ;;  %s5953_s10 = smov 2   ;;  %s7173_s0 = inlined_call_operand.smem [shape: u32[39], index: -1, kind: input, shape index: {}] }
   0x1   :  { %s6001_s5 = sld [smem:[%s7173_s0]]   ;;  %s5954_s14 = smov 3  }
   0x2   :  { %s6006_s9 = sld [smem:[%s7173_s0 + %s5952_s6]]   ;;  %s5955_s18 = smov 4  }
   0x3   :  { %s6011_s13 = sld [smem:[%s7173_s0 + %s5953_s10]]   ;;  %s5956_s22 = smov 5  }
   0x4   :  { %s6016_s17 = sld [smem:[%s7173_s0 + %s5954_s14]]   ;;  %s5957_s26 = smov 6  }
   0x5   :  { %s6021_s21 = sld [smem:[%s7173_s0 + %s5955_s18]]   ;;  %s5958_s30 = smov 7  }
   0x6   :  { %s6026_s25 = sld [smem:[%s7173_s0 + %s5956_s22]]   ;;  %s5959_s4 = smov 8  }
   0x7   :  { %s6031_s29 = sld [smem:[%s7173_s0 + %s5957_s26]]   ;;  %s5960_s10 = smov 9  }
   0x8   :  { %s6036_s3 = sld [smem:[%s7173_s0 + %s5958_s30]]   ;;  %s5961_s15 = smov 10  }
   0x9   :  { %s6041_s8 = sld [smem:[%s7173_s0 + %s5959_s4]]   ;;  %s5962_s20 = smov 11  }
   0xa   :  { %s6046_s14 = sld [smem:[%s7173_s0 + %s5960_s10]]   ;;  %s5963_s26 = smov 12  }
   0xb   :  { %s6051_s19 = sld [smem:[%s7173_s0 + %s5961_s15]]   ;;  %s5964_s1 = smov 13  }
   0xc   :  { %s6056_s24 = sld [smem:[%s7173_s0 + %s5962_s20]]   ;;  %s5965_s7 = smov 14  }
   0xd   :  { %s6061_s30 = sld [smem:[%s7173_s0 + %s5963_s26]]   ;;  %s5966_s15 = smov 15  }
   0xe   :  { %s6066_s6 = sld [smem:[%s7173_s0 + %s5964_s1]]   ;;  %s5967_s22 = smov 16  }
   0xf   :  { %s6071_s12 = sld [smem:[%s7173_s0 + %s5965_s7]]   ;;  %s5968_s28 = smov 17  }
  0x10   :  { %s6076_s20 = sld [smem:[%s7173_s0 + %s5966_s15]]   ;;  %s5969_s7 = smov 18  }
  0x11   :  { %s6081_s27 = sld [smem:[%s7173_s0 + %s5967_s22]]   ;;  %s5970_s15 = smov 19  }
  0x12   :  { %7184 = sst [smem:[#allocation5_spill]] %s6056_s24  ;;  %s5971_s22 = smov 20  }
  0x13   :  { %s6086_s4 = sld [smem:[%s7173_s0 + %s5968_s28]]   ;;  %s5972_s28 = smov 21  }
  0x14   :  { %7185 = sst [smem:[#allocation6_spill]] %s6066_s6 }
  0x15   :  { %s6091_s24 = sld [smem:[%s7173_s0 + %s5969_s7]]   ;;  %s5973_s7 = smov 22  }
  0x16   :  { %7186 = sst [smem:[#allocation7_spill]] %s6076_s20 }
  0x17   :  { %7187 = sst [smem:[#allocation8_spill]] %s6081_s27 }
  0x18   :  { %s6096_s20 = sld [smem:[%s7173_s0 + %s5970_s15]]   ;;  %s5974_s15 = smov 23  }
  0x19   :  { %7188 = sst [smem:[#allocation9_spill]] %s6086_s4 }
  0x1a   :  { %s6101_s27 = sld [smem:[%s7173_s0 + %s5971_s22]]   ;;  %s5975_s22 = smov 24  }
  0x1b   :  { %7189 = sst [smem:[#allocation10_spill]] %s6091_s24 }
  0x1c   :  { %s6106_s4 = sld [smem:[%s7173_s0 + %s5972_s28]]   ;;  %s5976_s28 = smov 25  }
  0x1d   :  { %s6111_s24 = sld [smem:[%s7173_s0 + %s5973_s7]]   ;;  %s5977_s7 = smov 26  }
  0x1e   :  { %7190 = sst [smem:[#allocation11_spill]] %s6096_s20 }
  0x1f   :  { %s6116_s20 = sld [smem:[%s7173_s0 + %s5974_s15]]   ;;  %s5978_s15 = smov 27  }
  0x20   :  { %7191 = sst [smem:[#allocation12_spill]] %s6101_s27 }
  0x21   :  { %s6121_s27 = sld [smem:[%s7173_s0 + %s5975_s22]]   ;;  %s5979_s22 = smov 28  }
  0x22   :  { %7192 = sst [smem:[#allocation13_spill]] %s6106_s4 }
  0x23   :  { %7193 = sst [smem:[#allocation14_spill]] %s6111_s24 }
  0x24   :  { %s6126_s4 = sld [smem:[%s7173_s0 + %s5976_s28]]   ;;  %s5980_s28 = smov 29  }
  0x25   :  { %7194 = sst [smem:[#allocation15_spill]] %s6116_s20 }
  0x26   :  { %s6131_s24 = sld [smem:[%s7173_s0 + %s5977_s7]]   ;;  %s5981_s7 = smov 30  }
  0x27   :  { %7195 = sst [smem:[#allocation16_spill]] %s6121_s27 }
  0x28   :  { %s6136_s20 = sld [smem:[%s7173_s0 + %s5978_s15]]   ;;  %s5982_s15 = smov 31  }
  0x29   :  { %s6141_s27 = sld [smem:[%s7173_s0 + %s5979_s22]]   ;;  %s5983_s22 = smov 32  }
  0x2a   :  { %7196 = sst [smem:[#allocation17_spill]] %s6126_s4 }
  0x2b   :  { %s6146_s4 = sld [smem:[%s7173_s0 + %s5980_s28]]   ;;  %s5984_s28 = smov 33  }
  0x2c   :  { %7197 = sst [smem:[#allocation18_spill]] %s6131_s24 }
  0x2d   :  { %s6151_s24 = sld [smem:[%s7173_s0 + %s5981_s7]]   ;;  %s5985_s7 = smov 34  }
  0x2e   :  { %7198 = sst [smem:[#allocation19_spill]] %s6136_s20 }
  0x2f   :  { %7199 = sst [smem:[#allocation20_spill]] %s6141_s27 }
  0x30   :  { %s6156_s20 = sld [smem:[%s7173_s0 + %s5982_s15]]   ;;  %s5986_s15 = smov 35  }
  0x31   :  { %7200 = sst [smem:[#allocation21_spill]] %s6146_s4 }
  0x32   :  { %s6161_s27 = sld [smem:[%s7173_s0 + %s5983_s22]]   ;;  %s5987_s22 = smov 36  }
  0x33   :  { %7201 = sst [smem:[#allocation22_spill]] %s6151_s24 }
  0x34   :  { %s6166_s4 = sld [smem:[%s7173_s0 + %s5984_s28]]   ;;  %s5988_s28 = smov 37  }
  0x35   :  { %s6171_s24 = sld [smem:[%s7173_s0 + %s5985_s7]]   ;;  %s5989_s7 = smov 38  }
  0x36   :  { %7202 = sst [smem:[#allocation23_spill]] %s6156_s20 }
  0x37   :  { %s6176_s20 = sld [smem:[%s7173_s0 + %s5986_s15]]  }
  0x38   :  { %7203 = sst [smem:[#allocation24_spill]] %s6161_s27 }
  0x39   :  { %s6181_s27 = sld [smem:[%s7173_s0 + %s5987_s22]]  }
  0x3a   :  { %7204 = sst [smem:[#allocation25_spill]] %s6166_s4 }
  0x3b   :  { %s6186_s4 = sld [smem:[%s7173_s0 + %s5988_s28]]  }
  0x3c   :  { %s6191_s6 = sld [smem:[%s7173_s0 + %s5989_s7]]  }
  0x3d   :  { %v159_v0 = vld [vmem:[%s6011_s13] sm:$0xff]  ;;  %vm171_vm0 = vcmask 64512   ;;  %v162_v3 = vld [vmem:[%s6001_s5 + $0x8] sm:$0xff]  ;;  %v163_v5 = vld [vmem:[%s6001_s5 + $0x10] sm:$0xff] }
  0x3e   :  { %v161_v1 = vld [vmem:[%s6001_s5] sm:$0xff]  ;;  %5315 = vmatprep.subr.mxu0 %v159_v0  ;;  %5323 = vmatprep.subr.mxu1 %v159_v0  ;;  %v4821_v4 = vld [vmem:[%s6001_s5 + $0x28] sm:$0xff]  ;;  %v4822_v6 = vld [vmem:[%s6001_s5 + $0x30] sm:$0xff] }
  0x3f   :  { %v4820_v2 = vld [vmem:[%s6001_s5 + $0x20] sm:$0xff]  ;;  %5316 = vmatpush3.msra.mxu0 %v159_v0  ;;  %5317 = vmatprep.mubr.msk.f32.mxu0 %vm171_vm0, %v161_v1  ;;  %v164_v7 = vld [vmem:[%s6001_s5 + $0x18] sm:$0xff]  ;;  %v732_v11 = vld [vmem:[%s6021_s21 + $0x8] sm:$0xff] }
  0x40   :  { %5324 = vmatpush3.msra.mxu1 %v159_v0  ;;  %5325 = vmatprep.mubr.msk.f32.mxu1 %vm171_vm0, %v4820_v2  ;;  %v4823_v8 = vld [vmem:[%s6001_s5 + $0x38] sm:$0xff]  ;;  %v4828_v9 = vld [vmem:[%s6001_s5 + $0x40] sm:$0xff]  ;;  %v4829_v12 = vld [vmem:[%s6001_s5 + $0x48] sm:$0xff] }
  0x41   :  { %5318 = vmatmul.mubr.msk.f32.vlgmr.msra.gmra.mxu0 %vm171_vm0, %v162_v3  ;;  %5326 = vmatmul.mubr.msk.f32.vlgmr.msra.gmra.mxu1 %vm171_vm0, %v4821_v4  ;;  %v4836_v10 = vld [vmem:[%s6001_s5 + $0x60] sm:$0xff]  ;;  %v4837_v13 = vld [vmem:[%s6001_s5 + $0x68] sm:$0xff] }
  0x42   :  { %5331 = vmatprep.subr.mxu0 %v159_v0  ;;  %5339 = vmatprep.subr.mxu1 %v159_v0 }
  0x43   :  { %5320 = vmatprep.mubr.msk.f32.mxu0 %vm171_vm0, %v163_v5  ;;  %5328 = vmatprep.mubr.msk.f32.mxu1 %vm171_vm0, %v4822_v6 }
  0x44   :  { %5332 = vmatpush3.msra.mxu0 %v159_v0  ;;  %5340 = vmatpush3.msra.mxu1 %v159_v0 }
  0x45   :  { %5321 = vmatmul.mubr.msk.f32.gmra.mxu0 %vm171_vm0, %v164_v7  ;;  %5329 = vmatmul.mubr.msk.f32.gmra.mxu1 %vm171_vm0, %v4823_v8 }
  0x46   :  { %5333 = vmatprep.mubr.msk.f32.mxu0 %vm171_vm0, %v4828_v9  ;;  %5341 = vmatprep.mubr.msk.f32.mxu1 %vm171_vm0, %v4836_v10 }
  0x47   :  { %82 = vsyncpa [#allocation3], 0  ;;  %5347 = vmatprep.subr.mxu0 %v732_v11  ;;  %5357 = vmatprep.subr.mxu1 %v732_v11  ;;  %v4830_v14 = vld [vmem:[%s6001_s5 + $0x50] sm:$0xff]  ;;  %v731_v16 = vld [vmem:[%s6021_s21] sm:$0xff]  ;;  %vm744_vm1 = vcmask 130048   ;;  %vm1031_vm2 = vcmask 261120  }
  0x48   :  { %v4838_v15 = vld [vmem:[%s6001_s5 + $0x70] sm:$0xff]  ;;  %v4831_v17 = vld [vmem:[%s6001_s5 + $0x58] sm:$0xff]  ;;  %v734_v19 = vld [vmem:[%s6006_s9] sm:$0xff]  ;;  %vm5991_vm3 = vmmov 0   ;;  %vm1424_vm4 = vcmask 523264   ;;  %s7205_s0 = sld [smem:[#allocation6_spill]] }
  0x49   :  { %5334 = vmatmul.mubr.msk.f32.vlgmr.msra.gmra.mxu0 %vm171_vm0, %v4829_v12  ;;  %5342 = vmatmul.mubr.msk.f32.vlgmr.msra.gmra.mxu1 %vm171_vm0, %v4837_v13  ;;  %v4839_v18 = vld [vmem:[%s6001_s5 + $0x78] sm:$0xff]  ;;  %v4849_v20 = vld [vmem:[%s6006_s9 + $0x20] sm:$0xff]  ;;  %v735_v21 = vld [vmem:[%s6006_s9 + $0x8] sm:$0xff]  ;;  %s7206_s5 = sld [smem:[#allocation7_spill]]  ;;  %vm1594_vm5 = vcmask 1043456   ;;  %vm1590_vm6 = vcmask 31744  }
  0x4a   :  { %5336 = vmatprep.mubr.msk.f32.mxu0 %vm171_vm0, %v4830_v14  ;;  %5344 = vmatprep.mubr.msk.f32.mxu1 %vm171_vm0, %v4838_v15  ;;  %v4850_v22 = vld [vmem:[%s6006_s9 + $0x28] sm:$0xff]  ;;  %v736_v23 = vld [vmem:[%s6006_s9 + $0x10] sm:$0xff]  ;;  %v737_v25 = vld [vmem:[%s6006_s9 + $0x18] sm:$0xff]  ;;  %vm1682_vm7 = vcmask 15360   ;;  %vm1707_vm8 = vcmask 1041408   ;;  %s7208_s13 = sld [smem:[#allocation8_spill]] }
  0x4b   :  { %5348 = vmatpush3.msra.mxu0 %v732_v11  ;;  %5358 = vmatpush3.msra.mxu1 %v732_v11  ;;  %v4851_v24 = vld [vmem:[%s6006_s9 + $0x30] sm:$0xff]  ;;  %v4852_v26 = vld [vmem:[%s6006_s9 + $0x38] sm:$0xff]  ;;  %v1021_v31 = vld [vmem:[%s6031_s29 + $0x8] sm:$0xff]  ;;  %s7207_s9 = sld [smem:[#allocation10_spill]]  ;;  %vm4761_vm9 = vcmask 33792  }
  0x4c   :  { %5349 = vmatprep.subr.mxu0 %v731_v16  ;;  %5359 = vmatprep.subr.mxu1 %v731_v16  ;;  %v1023_v27 = vld [vmem:[%s6031_s29 + $0x18] sm:$0xff]  ;;  %v1022_v29 = vld [vmem:[%s6031_s29 + $0x10] sm:$0xff]  ;;  %v1308_v32 = vld [vmem:[%s6051_s19 + $0x8] sm:$0xff]  ;;  %s7210_s21 = sld [smem:[#allocation5_spill]] }
  0x4d   :  { %5337 = vmatmul.mubr.msk.f32.gmra.mxu0 %vm171_vm0, %v4831_v17  ;;  %5345 = vmatmul.mubr.msk.f32.gmra.mxu1 %vm171_vm0, %v4839_v18  ;;  %v1310_v28 = vld [vmem:[%s6051_s19 + $0x18] sm:$0xff]  ;;  %v1309_v30 = vld [vmem:[%s6051_s19 + $0x10] sm:$0xff]  ;;  %v1020_v33 = vld [vmem:[%s6031_s29] sm:$0xff]  ;;  %s7212_s29 = sld [smem:[#allocation11_spill]] }
  0x4e   :  { %5350 = vmatpush3.msra.mxu0 %v731_v16  ;;  %5351 = vmatprep.mubr.msk.f32.mxu0 %vm744_vm1, %v734_v19  ;;  %v1307_v34 = vld [vmem:[%s6051_s19] sm:$0xff]  ;;  %v6253_v35 = vld [vmem:[%s6041_s8 + $0x8] sm:$0xff]  ;;  %s7216_s19 = sld [smem:[#allocation16_spill]] }
  0x4f   :  { %5360 = vmatpush3.msra.mxu1 %v731_v16  ;;  %5361 = vmatprep.mubr.msk.f32.mxu1 %vm744_vm1, %v4849_v20  ;;  %v6257_v36 = vld [vmem:[%s6016_s17] ss:$0 sm:$0xff]  ;;  %s7209_s17 = sld [smem:[#allocation12_spill]] }
  0x50   :  { %5367 = vmatprep.subr.mxu1 %v1023_v27  ;;  %5403 = vmatprep.subr.mxu0 %v1310_v28  ;;  %s7220_s15 = sld [smem:[#allocation17_spill]] }
  0x51   :  { %5352 = vmatmul.mubr.msk.f32.vlgmr.msra.gmra.mxu0 %vm744_vm1, %v735_v21  ;;  %5362 = vmatmul.mubr.msk.f32.vlgmr.msra.gmra.mxu1 %vm744_vm1, %v4850_v22  ;;  %s7221_s16 = sld [smem:[#allocation19_spill]] }
  0x52   :  { %5354 = vmatprep.mubr.msk.f32.mxu0 %vm744_vm1, %v736_v23  ;;  %5364 = vmatprep.mubr.msk.f32.mxu1 %vm744_vm1, %v4851_v24  ;;  %s7222_s18 = sld [smem:[#allocation24_spill]] }
  0x53   :  { %5368 = vmatpush3.msra.mxu1 %v1023_v27  ;;  %5404 = vmatpush3.msra.mxu0 %v1310_v28  ;;  %s7223_s22 = sld [smem:[#allocation22_spill]] }
  0x54   :  { %5369 = vmatprep.subr.mxu1 %v1022_v29  ;;  %5405 = vmatprep.subr.mxu0 %v1309_v30  ;;  %s7224_s23 = sld [smem:[#allocation23_spill]] }
  0x55   :  { %5355 = vmatmul.mubr.msk.f32.gmra.mxu0 %vm744_vm1, %v737_v25  ;;  %5365 = vmatmul.mubr.msk.f32.gmra.mxu1 %vm744_vm1, %v4852_v26  ;;  %s7225_s26 = sld [smem:[#allocation25_spill]] }
  0x56   :  { %5370 = vmatpush3.msra.mxu1 %v1022_v29  ;;  %5406 = vmatpush3.msra.mxu0 %v1309_v30 }
  0x57   :  { %5371 = vmatprep.subr.mxu1 %v1021_v31  ;;  %5407 = vmatprep.subr.mxu0 %v1308_v32 }
  0x58   :  { %5372 = vmatpush3.msra.mxu1 %v1021_v31  ;;  %5408 = vmatpush3.msra.mxu0 %v1308_v32 }
  0x59   :  { %5373 = vmatprep.subr.mxu1 %v1020_v33  ;;  %5409 = vmatprep.subr.mxu0 %v1307_v34 }
  0x5a   :  { %5374 = vmatpush3.msra.mxu1 %v1020_v33  ;;  %5410 = vmatpush3.msra.mxu0 %v1307_v34 }
  0x5b   :  { %5387 = vmatprep.subr.mxu1 %v6253_v35 }
 0x101   :  { %v5319_v37 = vpop.f32.mrf.mxu0  ;;  %v5327_v38 = vpop.f32.mrf.mxu1 }
 0x102   :  { %v6260_v39 = vadd.f32 %v5319_v37, %v6257_v36  ;;  %v6263_v40 = vadd.f32 %v5327_v38, %v6257_v36 }
 0x103   :  { %v250_v41 = vpop.f32.mrf.mxu0  ;;  %v388_v42 = vpop.f32.mrf.mxu1 }
 0x104   :  { %v270_v43 = vmul.f32 %v6260_v39, %v6260_v39  ;;  %v408_v44 = vmul.f32 %v6263_v40, %v6263_v40  ;;  %v6270_v45 = vadd.f32 %v6257_v36, %v250_v41  ;;  %v6273_v46 = vadd.f32 %v6257_v36, %v388_v42 }
 0x105   :  { %v5322_v47 = vpop.f32.mrf.mxu0  ;;  %v5330_v48 = vpop.f32.mrf.mxu1 }
 0x106   :  { %v274_v49 = vmul.f32 %v270_v43, %v6260_v39  ;;  %v412_v50 = vmul.f32 %v408_v44, %v6263_v40  ;;  %v269_v51 = vmul.f32 %v6270_v45, %v6270_v45  ;;  %v407_v52 = vmul.f32 %v6273_v46, %v6273_v46 }
 0x107   :  { %v6282_v53 = vadd.f32 %v5322_v47, %v6257_v36  ;;  %v6285_v54 = vadd.f32 %v5330_v48, %v6257_v36  ;;  %v260_v55 = vpop.f32.mrf.mxu0  ;;  %v398_v56 = vpop.f32.mrf.mxu1 }
 0x108   :  { %v278_v57 = vmul.f32 0.044715, %v274_v49  ;;  %v416_v58 = vmul.f32 0.044715, %v412_v50  ;;  %v273_v59 = vmul.f32 %v269_v51, %v6270_v45  ;;  %v411_v60 = vmul.f32 %v407_v52, %v6273_v46 }
 0x109   :  { %v5335_v61 = vpop.f32.mrf.mxu0  ;;  %v5343_v62 = vpop.f32.mrf.mxu1  ;;  %v6292_v3 = vadd.f32 %v6257_v36, %v260_v55  ;;  %v272_v6 = vmul.f32 %v6282_v53, %v6282_v53  ;;  %v410_v7 = vmul.f32 %v6285_v54, %v6285_v54  ;;  %v6301_v11 = vadd.f32 %v6257_v36, %v398_v56 }
 0x10a   :  { %v282_v63 = vadd.f32 %v278_v57, %v6260_v39  ;;  %v420_v0 = vadd.f32 %v416_v58, %v6263_v40  ;;  %v277_v1 = vmul.f32 0.044715, %v273_v59  ;;  %v415_v2 = vmul.f32 0.044715, %v411_v60 }
 0x10b   :  { %v530_v8 = vpop.f32.mrf.mxu0  ;;  %v672_v12 = vpop.f32.mrf.mxu1  ;;  %v6304_v14 = vadd.f32 %v5335_v61, %v6257_v36  ;;  %v271_v15 = vmul.f32 %v6292_v3, %v6292_v3  ;;  %v276_v16 = vmul.f32 %v272_v6, %v6282_v53  ;;  %v414_v17 = vmul.f32 %v410_v7, %v6285_v54 }
 0x10c   :  { %v286_v4 = vmul.f32 0.7978846, %v282_v63  ;;  %v281_v5 = vadd.f32 %v277_v1, %v6270_v45  ;;  %v424_v9 = vmul.f32 0.7978846, %v420_v0  ;;  %v419_v10 = vadd.f32 %v415_v2, %v6273_v46 }
 0x10d   :  { %v550_v18 = vmul.f32 %v6304_v14, %v6304_v14  ;;  %v6313_v19 = vadd.f32 %v5343_v62, %v6257_v36  ;;  %v5338_v20 = vpop.f32.mrf.mxu0  ;;  %v409_v22 = vmul.f32 %v6301_v11, %v6301_v11  ;;  %v5346_v23 = vpop.f32.mrf.mxu1  ;;  %v6321_v26 = vadd.f32 %v6257_v36, %v530_v8 }
 0x10e   :  { %v285_v13 = vmul.f32 0.7978846, %v281_v5  ;;  %5781 = vtanh.f32 %v286_v4  ;;  %v423_v21 = vmul.f32 0.7978846, %v419_v10  ;;  %v275_v27 = vmul.f32 %v271_v15, %v6292_v3 }
 0x10f   :  { %5783 = vtanh.f32 %v424_v9  ;;  %v554_v24 = vmul.f32 %v550_v18, %v6304_v14  ;;  %v692_v25 = vmul.f32 %v6313_v19, %v6313_v19  ;;  %v6325_v28 = vadd.f32 %v6257_v36, %v672_v12  ;;  %v540_v34 = vpop.f32.mrf.mxu0  ;;  %v682_v42 = vpop.f32.mrf.mxu1 }
 0x110   :  { %5785 = vtanh.f32 %v285_v13  ;;  %v6328_v29 = vadd.f32 %v5338_v20, %v6257_v36  ;;  %v280_v30 = vmul.f32 0.044715, %v276_v16  ;;  %v418_v31 = vmul.f32 0.044715, %v414_v17  ;;  %v6367_v20 = vld [vmem:[%s6026_s25] ss:$0 sm:$0xff] }
 0x111   :  { %v558_v32 = vmul.f32 0.044715, %v554_v24  ;;  %v696_v33 = vmul.f32 %v692_v25, %v6313_v19  ;;  %5787 = vtanh.f32 %v423_v21  ;;  %v413_v37 = vmul.f32 %v409_v22, %v6301_v11  ;;  %v5353_v18 = vpop.f32.mrf.mxu0  ;;  %s7211_s25 = sld [smem:[#allocation9_spill]] }
 0x112   :  { %v549_v38 = vmul.f32 %v6321_v26, %v6321_v26  ;;  %v691_v41 = vmul.f32 %v6325_v28, %v6325_v28  ;;  %v552_v47 = vmul.f32 %v6328_v29, %v6328_v29  ;;  %v6340_v48 = vadd.f32 %v5346_v23, %v6257_v36 }
 0x113   :  { %v562_v43 = vadd.f32 %v558_v32, %v6304_v14  ;;  %v700_v44 = vmul.f32 0.044715, %v696_v33  ;;  %v279_v49 = vmul.f32 0.044715, %v275_v27  ;;  %v6345_v52 = vadd.f32 %v6257_v36, %v540_v34 }
 0x114   :  { %v553_v50 = vmul.f32 %v549_v38, %v6321_v26  ;;  %v695_v51 = vmul.f32 %v691_v41, %v6325_v28  ;;  %v694_v57 = vmul.f32 %v6340_v48, %v6340_v48  ;;  %v6351_v58 = vadd.f32 %v6257_v36, %v682_v42  ;;  %v5363_v41 = vpop.f32.mrf.mxu1 }
 0x115   :  { %v566_v55 = vmul.f32 0.7978846, %v562_v43  ;;  %v704_v56 = vadd.f32 %v700_v44, %v6313_v19  ;;  %v417_v59 = vmul.f32 0.044715, %v413_v37  ;;  %v551_v62 = vmul.f32 %v6345_v52, %v6345_v52 }
 0x116   :  { %v557_v60 = vmul.f32 0.044715, %v553_v50  ;;  %v699_v61 = vmul.f32 0.044715, %v695_v51  ;;  %v284_v63 = vadd.f32 %v280_v30, %v6282_v53  ;;  %v556_v1 = vmul.f32 %v552_v47, %v6328_v29 }
 0x117   :  { %5789 = vtanh.f32 %v566_v55  ;;  %v708_v0 = vmul.f32 0.7978846, %v704_v56  ;;  %v422_v2 = vadd.f32 %v418_v31, %v6285_v54  ;;  %v283_v4 = vadd.f32 %v279_v49, %v6292_v3  ;;  %v823_v49 = vpop.f32.mrf.mxu0 }
 0x118   :  { %v561_v36 = vadd.f32 %v557_v60, %v6321_v26  ;;  %v703_v5 = vadd.f32 %v699_v61, %v6325_v28  ;;  %v698_v7 = vmul.f32 %v694_v57, %v6340_v48  ;;  %v555_v8 = vmul.f32 %v551_v62, %v6345_v52 }
 0x119   :  { %5791 = vtanh.f32 %v708_v0  ;;  %v693_v9 = vmul.f32 %v6351_v58, %v6351_v58  ;;  %v421_v10 = vadd.f32 %v417_v59, %v6301_v11  ;;  %v288_v16 = vmul.f32 0.7978846, %v284_v63  ;;  %v961_v59 = vpop.f32.mrf.mxu1 }
 0x11a   :  { %v565_v12 = vmul.f32 0.7978846, %v561_v36  ;;  %v707_v13 = vmul.f32 0.7978846, %v703_v5  ;;  %v560_v17 = vmul.f32 0.044715, %v556_v1  ;;  %v6371_v32 = vadd.f32 %v5353_v18, %v6367_v20  ;;  %v5356_v18 = vpop.f32.mrf.mxu0 }
 0x11b   :  { %v5782_v6 = vpop.eup %5781  ;;  %v426_v23 = vmul.f32 0.7978846, %v422_v2  ;;  %v287_v24 = vmul.f32 0.7978846, %v283_v4  ;;  %v702_v25 = vmul.f32 0.044715, %v698_v7  ;;  %v697_v30 = vmul.f32 %v693_v9, %v6351_v58 }
 0x11c   :  { %v5784_v15 = vpop.eup %5783  ;;  %v294_v22 = vadd.f32 1.0, %v5782_v6  ;;  %5793 = vtanh.f32 %v565_v12  ;;  %v559_v27 = vmul.f32 0.044715, %v555_v8  ;;  %v425_v31 = vmul.f32 0.7978846, %v421_v10 }
 0x11d   :  { %v5786_v21 = vpop.eup %5785  ;;  %5795 = vtanh.f32 %v707_v13  ;;  %v432_v34 = vadd.f32 1.0, %v5784_v15  ;;  %v564_v38 = vadd.f32 %v560_v17, %v6328_v29  ;;  %v706_v43 = vadd.f32 %v702_v25, %v6340_v48 }
 0x11e   :  { %v5788_v33 = vpop.eup %5787  ;;  %v293_v37 = vadd.f32 1.0, %v5786_v21  ;;  %5797 = vtanh.f32 %v288_v16  ;;  %v298_v42 = vmul.f32 0.5, %v294_v22  ;;  %v563_v44 = vadd.f32 %v559_v27, %v6345_v52 }
 0x11f   :  { %5799 = vtanh.f32 %v426_v23  ;;  %v701_v47 = vmul.f32 0.044715, %v697_v30  ;;  %v843_v50 = vmul.f32 %v6371_v32, %v6371_v32  ;;  %v436_v51 = vmul.f32 0.5, %v432_v34 }
 0x120   :  { %5801 = vtanh.f32 %v287_v24  ;;  %v297_v55 = vmul.f32 0.5, %v293_v37  ;;  %v431_v56 = vadd.f32 1.0, %v5788_v33  ;;  %v568_v57 = vmul.f32 0.7978846, %v564_v38 }
 0x121   :  { %5803 = vtanh.f32 %v425_v31  ;;  %v6379_v61 = vmul.f32 %v298_v42, %v6260_v39  ;;  %v847_v62 = vmul.f32 %v843_v50, %v6371_v32  ;;  %v6383_v63 = vadd.f32 %v5363_v41, %v6367_v20 }
 0x122   :  { %v6386_v0 = vadd.f32 %v6367_v20, %v823_v49  ;;  %v710_v2 = vmul.f32 0.7978846, %v706_v43  ;;  %v567_v4 = vmul.f32 0.7978846, %v563_v44  ;;  %v705_v36 = vadd.f32 %v701_v47, %v6351_v58 }
 0x123   :  { %v851_v6 = vmul.f32 0.044715, %v847_v62  ;;  %v981_v7 = vmul.f32 %v6383_v63, %v6383_v63  ;;  %v6394_v8 = vadd.f32 %v6367_v20, %v961_v59  ;;  %v440_v9 = vmul.f32 %v436_v51, %v6263_v40  ;;  %v5366_v40 = vpop.f32.mrf.mxu1 }
 0x124   :  { %v5790_v60 = vpop.eup %5789  ;;  %v842_v39 = vmul.f32 %v6386_v0, %v6386_v0  ;;  %v301_v10 = vmul.f32 %v297_v55, %v6270_v45  ;;  %v435_v12 = vmul.f32 0.5, %v431_v56  ;;  %5805 = vtanh.f32 %v568_v57 }
 0x125   :  { %v574_v1 = vadd.f32 1.0, %v5790_v60  ;;  %v855_v13 = vadd.f32 %v851_v6, %v6371_v32  ;;  %v985_v15 = vmul.f32 %v981_v7, %v6383_v63  ;;  %v980_v17 = vmul.f32 %v6394_v8, %v6394_v8 }
 0x126   :  { %v5792_v5 = vpop.eup %5791  ;;  %v846_v16 = vmul.f32 %v842_v39, %v6386_v0  ;;  %5807 = vtanh.f32 %v567_v4  ;;  %v709_v24 = vmul.f32 0.7978846, %v705_v36  ;;  %v6405_v37 = vadd.f32 %v5356_v18, %v6367_v20  ;;  %v833_v4 = vpop.f32.mrf.mxu0 }
 0x127   :  { %v578_v22 = vmul.f32 0.5, %v574_v1  ;;  %v716_v23 = vadd.f32 1.0, %v5792_v5  ;;  %v859_v27 = vmul.f32 0.7978846, %v855_v13  ;;  %v989_v30 = vmul.f32 0.044715, %v985_v15 }
 0x128   :  { %v984_v31 = vmul.f32 %v980_v17, %v6394_v8  ;;  %5809 = vtanh.f32 %v710_v2  ;;  %v850_v34 = vmul.f32 0.044715, %v846_v16  ;;  %v444_v41 = vmax.f32 %v6379_v61, %v440_v9 }
 0x129   :  { %v5794_v21 = vpop.eup %5793  ;;  %v993_v43 = vadd.f32 %v989_v30, %v6383_v63  ;;  %v6412_v44 = vadd.f32 %v5366_v40, %v6367_v20  ;;  %v439_v49 = vmul.f32 %v435_v12, %v6273_v46  ;;  %v582_v50 = vmul.f32 %v578_v22, %v6304_v14  ;;  %v971_v46 = vpop.f32.mrf.mxu1 }
 0x12a   :  { %v5796_v25 = vpop.eup %5795  ;;  %v573_v45 = vadd.f32 1.0, %v5794_v21  ;;  %5811 = vtanh.f32 %v859_v27  ;;  %v854_v51 = vadd.f32 %v850_v34, %v6386_v0  ;;  %v720_v56 = vmul.f32 0.5, %v716_v23 }
 0x12b   :  { %v715_v33 = vadd.f32 1.0, %v5796_v25  ;;  %v6407_v38 = vpop.eup %5797  ;;  %5813 = vtanh.f32 %v709_v24  ;;  %v997_v57 = vmul.f32 0.7978846, %v993_v43  ;;  %v988_v59 = vmul.f32 0.044715, %v984_v31 }
 0x12c   :  { %v577_v42 = vmul.f32 0.5, %v573_v45  ;;  %v6414_v47 = vpop.eup %5799  ;;  %v858_v1 = vmul.f32 0.7978846, %v854_v51  ;;  %v845_v2 = vmul.f32 %v6405_v37, %v6405_v37  ;;  %v983_v36 = vmul.f32 %v6412_v44, %v6412_v44 }
 0x12d   :  { %v5802_v55 = vpop.eup %5801  ;;  %v719_v62 = vmul.f32 0.5, %v715_v33  ;;  %5815 = vtanh.f32 %v997_v57  ;;  %v992_v14 = vadd.f32 %v988_v59, %v6394_v8  ;;  %v443_v5 = vmax.f32 %v301_v10, %v439_v49 }
 0x12e   :  { %v5804_v60 = vpop.eup %5803  ;;  %v581_v61 = vmul.f32 %v577_v42, %v6321_v26  ;;  %v586_v6 = vmax.f32 %v444_v41, %v582_v50  ;;  %5817 = vtanh.f32 %v858_v1  ;;  %v849_v7 = vmul.f32 %v845_v2, %v6405_v37 }
 0x12f   :  { %v996_v26 = vmul.f32 0.7978846, %v992_v14  ;;  %v987_v39 = vmul.f32 %v983_v36, %v6412_v44  ;;  %v6428_v9 = vadd.f32 %v6367_v20, %v833_v4  ;;  %v6431_v12 = vadd.f32 %v6367_v20, %v971_v46 }
 0x130   :  { %v724_v13 = vmul.f32 %v720_v56, %v6313_v19  ;;  %v723_v15 = vmul.f32 %v719_v62, %v6325_v28  ;;  %v853_v16 = vmul.f32 0.044715, %v849_v7  ;;  %v585_v17 = vmax.f32 %v443_v5, %v581_v61 }
 0x131   :  { %v5806_v10 = vpop.eup %5805  ;;  %5819 = vtanh.f32 %v996_v26  ;;  %v991_v18 = vmul.f32 0.044715, %v987_v39  ;;  %v844_v21 = vmul.f32 %v6428_v9, %v6428_v9  ;;  %v982_v22 = vmul.f32 %v6431_v12, %v6431_v12 }
 0x132   :  { %v857_v23 = vadd.f32 %v853_v16, %v6405_v37  ;;  %v727_v24 = vmax.f32 %v585_v17, %v723_v15  ;;  %v728_v40 = vmax.f32 %v586_v6, %v724_v13  ;;  %v295_v45 = vadd.f32 1.0, %v5802_v55 }
 0x133   :  { %v5808_v20 = vpop.eup %5807  ;;  %v995_v19 = vadd.f32 %v991_v18, %v6412_v44  ;;  %v848_v28 = vmul.f32 %v844_v21, %v6428_v9  ;;  %v986_v25 = vmul.f32 %v982_v22, %v6431_v12  ;;  %v433_v27 = vadd.f32 1.0, %v5804_v60 }
 0x134   :  { %v861_v30 = vmul.f32 0.7978846, %v857_v23  ;;  %5375 = vmatprep.mubr.msk.f32.mxu1 %vm1031_vm2, %v727_v24  ;;  %5411 = vmatprep.mubr.msk.f32.mxu0 %vm1031_vm2, %v727_v24  ;;  %v575_v43 = vadd.f32 1.0, %v5808_v20  ;;  %v296_v55 = vadd.f32 1.0, %v6407_v38  ;;  %v434_v56 = vadd.f32 1.0, %v6414_v47 }
 0x135   :  { %v5810_v31 = vpop.eup %5809  ;;  %v999_v33 = vmul.f32 0.7978846, %v995_v19  ;;  %v852_v34 = vmul.f32 0.044715, %v848_v28  ;;  %v990_v41 = vmul.f32 0.044715, %v986_v25  ;;  %5376 = vmatmul.mubr.msk.f32.vlgmr.msra.gmra.mxu1 %vm1031_vm2, %v728_v40  ;;  %5412 = vmatmul.mubr.msk.f32.vlgmr.msra.gmra.mxu0 %vm1031_vm2, %v728_v40 }
 0x136   :  { %5821 = vtanh.f32 %v861_v30  ;;  %5388 = vmatpush3.msra.mxu1 %v6253_v35  ;;  %v299_v57 = vmul.f32 0.5, %v295_v45  ;;  %v437_v59 = vmul.f32 0.5, %v433_v27  ;;  %v576_v1 = vadd.f32 1.0, %v5806_v10 }
 0x137   :  { %v5812_v42 = vpop.eup %5811  ;;  %5823 = vtanh.f32 %v999_v33  ;;  %v856_v49 = vadd.f32 %v852_v34, %v6428_v9  ;;  %v994_v50 = vadd.f32 %v990_v41, %v6431_v12  ;;  %v579_v4 = vmul.f32 0.5, %v575_v43 }
 0x138   :  { %v5814_v51 = vpop.eup %5813  ;;  %v867_v2 = vadd.f32 1.0, %v5812_v42  ;;  %v300_v14 = vmul.f32 0.5, %v296_v55  ;;  %v438_v36 = vmul.f32 0.5, %v434_v56  ;;  %v303_v6 = vmul.f32 %v299_v57, %v6292_v3 }
 0x139   :  { %v860_v60 = vmul.f32 0.7978846, %v856_v49  ;;  %v998_v61 = vmul.f32 0.7978846, %v994_v50  ;;  %v441_v38 = vmul.f32 %v437_v59, %v6301_v11  ;;  %v717_v47 = vadd.f32 1.0, %v5814_v51 }
 0x13a   :  { %v5816_v62 = vpop.eup %5815  ;;  %v580_v26 = vmul.f32 0.5, %v576_v1  ;;  %v871_v39 = vmul.f32 0.5, %v867_v2  ;;  %v583_v16 = vmul.f32 %v579_v4, %v6345_v52  ;;  %v304_v10 = vmul.f32 %v300_v14, %v6282_v53 }
 0x13b   :  { %v5818_v35 = vpop.eup %5817  ;;  %v1005_v46 = vadd.f32 1.0, %v5816_v62  ;;  %5825 = vtanh.f32 %v860_v60  ;;  %v442_v18 = vmul.f32 %v438_v36, %v6285_v54  ;;  %v718_v21 = vadd.f32 1.0, %v5810_v31  ;;  %v1169_v60 = vld [vmem:[%s6041_s8] sm:$0xff]  ;;  %s7214_s8 = sld [smem:[#allocation14_spill]] }
 0x13c   :  { %v866_v5 = vadd.f32 1.0, %v5818_v35  ;;  %5827 = vtanh.f32 %v998_v61  ;;  %v445_v22 = vmax.f32 %v303_v6, %v441_v38  ;;  %v721_v23 = vmul.f32 0.5, %v717_v47  ;;  %5389 = vmatprep.subr.mxu1 %v1169_v60 }
 0x13d   :  { %v1009_v13 = vmul.f32 0.5, %v1005_v46  ;;  %v584_v11 = vmul.f32 %v580_v26, %v6328_v29  ;;  %v875_v20 = vmul.f32 %v871_v39, %v6371_v32  ;;  %v446_v53 = vmax.f32 %v304_v10, %v442_v18  ;;  %5390 = vmatpush3.msra.mxu1 %v1169_v60 }
 0x13e   :  { %v5820_v7 = vpop.eup %5819  ;;  %v870_v15 = vmul.f32 0.5, %v866_v5  ;;  %v587_v28 = vmax.f32 %v445_v22, %v583_v16  ;;  %v722_v45 = vmul.f32 0.5, %v718_v21  ;;  %v725_v54 = vmul.f32 %v721_v23, %v6351_v58 }
 0x13f   :  { %v1004_v17 = vadd.f32 1.0, %v5820_v7  ;;  %v1013_v40 = vmul.f32 %v1009_v13, %v6383_v63  ;;  %v588_v33 = vmax.f32 %v446_v53, %v584_v11  ;;  %v5990_v18 = vmov 0.0  }
 0x140   :  { %v874_v3 = vmul.f32 %v870_v15, %v6386_v0  ;;  %v729_v29 = vmax.f32 %v587_v28, %v725_v54  ;;  %v726_v63 = vmul.f32 %v722_v45, %v6340_v48  ;;  %5423 = vmatprep.subr.mxu1 %v5990_v18 }
 0x141   :  { %v1008_v24 = vmul.f32 0.5, %v1004_v17  ;;  %v1017_v0 = vmax.f32 %v875_v20, %v1013_v40  ;;  %v4866_v20 = vld [vmem:[%s6046_s14] ss:$0 sm:$0xff]  ;;  %s7215_s14 = sld [smem:[#allocation15_spill]] }
 0x142   :  { %v730_v43 = vmax.f32 %v588_v33, %v726_v63  ;;  %v1499_v33 = vld [vmem:[%s6061_s30] sm:$0xff] }
 0x143   :  { %v5822_v19 = vpop.eup %5821  ;;  %v1012_v52 = vmul.f32 %v1008_v24, %v6394_v8 }
 0x144   :  { %v5824_v25 = vpop.eup %5823  ;;  %v869_v27 = vadd.f32 1.0, %v5822_v19 }
 0x145   :  { %v1007_v30 = vadd.f32 1.0, %v5824_v25  ;;  %v1016_v31 = vmax.f32 %v874_v3, %v1012_v52 }
 0x146   :  { %v873_v34 = vmul.f32 0.5, %v869_v27 }
 0x147   :  { %5378 = vmatprep.mubr.msk.f32.mxu1 %vm1031_vm2, %v1016_v31  ;;  %5414 = vmatprep.mubr.msk.f32.mxu0 %vm1031_vm2, %v1016_v31  ;;  %v1011_v58 = vmul.f32 0.5, %v1007_v30  ;;  %v1423_v31 = vld [vmem:[%s6171_s24] sm:$0x3] }
 0x148   :  { %v5826_v32 = vpop.eup %5825  ;;  %5379 = vmatmul.mubr.msk.f32.gmra.mxu1 %vm1031_vm2, %v1017_v0  ;;  %5415 = vmatmul.mubr.msk.f32.gmra.mxu0 %vm1031_vm2, %v1017_v0  ;;  %v877_v48 = vmul.f32 %v873_v34, %v6405_v37  ;;  %v4857_v37 = vld [vmem:[%s6036_s3] ss:$0 sm:$0xff]  ;;  %v1500_v0 = vld [vmem:[%s6061_s30 + $0x8] sm:$0xff]  ;;  %s7213_s3 = sld [smem:[#allocation13_spill]] }
 0x149   :  { %v5828_v8 = vpop.eup %5827  ;;  %v868_v41 = vadd.f32 1.0, %v5826_v32  ;;  %5381 = vmatprep.mubr.msk.f32.mxu1 %vm1031_vm2, %v729_v29  ;;  %5417 = vmatprep.mubr.msk.f32.mxu0 %vm1031_vm2, %v729_v29  ;;  %v1015_v51 = vmul.f32 %v1011_v58, %v6412_v44  ;;  %v4885_v34 = vld [vmem:[%s7205_s0] ss:$0 sm:$0xff]  ;;  %s7217_s30 = sld [smem:[#allocation18_spill]] }
 0x14a   :  { %v1006_v42 = vadd.f32 1.0, %v5828_v8  ;;  %v1582_v8 = vld [vmem:[%s6071_s12] sm:$0xf]  ;;  %s7218_s12 = sld [smem:[#allocation20_spill]] }
 0x14b   :  { %v872_v49 = vmul.f32 0.5, %v868_v41  ;;  %v1019_v59 = vmax.f32 %v877_v48, %v1015_v51 }
 0x14c   :  { %v1010_v50 = vmul.f32 0.5, %v1006_v42  ;;  %5382 = vmatmul.mubr.msk.f32.gmra.mxu1 %vm1031_vm2, %v730_v43  ;;  %5418 = vmatmul.mubr.msk.f32.gmra.mxu0 %vm1031_vm2, %v730_v43 }
 0x14d   :  { %v876_v55 = vmul.f32 %v872_v49, %v6428_v9  ;;  %v1674_v49 = vld [vmem:[%s6176_s20] sm:$0xff] }
 0x14e   :  { %v1014_v56 = vmul.f32 %v1010_v50, %v6431_v12  ;;  %v4887_v50 = vld [vmem:[%s7206_s5] ss:$0 sm:$0xff] }
 0x150   :  { %v1018_v57 = vmax.f32 %v876_v55, %v1014_v56 }
 0x152   :  { %5384 = vmatprep.mubr.msk.f32.mxu1 %vm1031_vm2, %v1018_v57  ;;  %5420 = vmatprep.mubr.msk.f32.mxu0 %vm1031_vm2, %v1018_v57 }
 0x153   :  { %5385 = vmatmul.mubr.msk.f32.gmra.mxu1 %vm1031_vm2, %v1019_v59  ;;  %5421 = vmatmul.mubr.msk.f32.gmra.mxu0 %vm1031_vm2, %v1019_v59 }
 0x1f5   :  { %v5377_v61 = vpop.f32.mrf.mxu1 }
 0x1f6   :  { %v1128_v44 = vadd.f32 %v5377_v61, %v4857_v37  ;;  %v1979_v61 = vld [vmem:[%s7207_s9 + $0x8] sm:$0xff] }
 0x1f7   :  { %v1122_v62 = vpop.f32.mrf.mxu1 }
 0x1f8   :  { %v1123_v9 = vadd.f32 %v4857_v37, %v1122_v62  ;;  %v1162_v12 = vmax.f32 %v1128_v44, 0.0  ;;  %v1676_v44 = vld [vmem:[%s6176_s20 + $0x10] sm:$0xff]  ;;  %v1677_v62 = vld [vmem:[%s6176_s20 + $0x18] sm:$0xff] }
 0x1fa   :  { %v1161_v1 = vmax.f32 %v1123_v9, 0.0  ;;  %v1678_v9 = vld [vmem:[%s6176_s20 + $0x20] sm:$0xff] }
 0x1fc   :  { %5391 = vmatprep.mubr.msk.f32.mxu1 %vm744_vm1, %v1161_v1  ;;  %v1679_v1 = vld [vmem:[%s6176_s20 + $0x28] sm:$0xff] }
 0x1fd   :  { %5392 = vmatmul.mubr.msk.f32.vlgmr.msra.gmra.mxu1 %vm744_vm1, %v1162_v12  ;;  %v1680_v12 = vld [vmem:[%s6176_s20 + $0x30] sm:$0xff] }
 0x208   :  { %v5380_v2 = vpop.f32.mrf.mxu1 }
 0x209   :  { %v1138_v35 = vadd.f32 %v5380_v2, %v4857_v37  ;;  %v1681_v2 = vld [vmem:[%s6176_s20 + $0x38] sm:$0xff] }
 0x20a   :  { %v1132_v4 = vpop.f32.mrf.mxu1 }
 0x20b   :  { %v1133_v46 = vadd.f32 %v4857_v37, %v1132_v4  ;;  %v1164_v5 = vmax.f32 %v1138_v35, 0.0  ;;  %v1978_v35 = vld [vmem:[%s7207_s9] sm:$0xff]  ;;  %v1841_v4 = vld [vmem:[%s7208_s13 + $0x8] sm:$0xff] }
 0x20c   :  { %v5383_v14 = vpop.f32.mrf.mxu1  ;;  %5468 = vmatprep.subr.mxu0 %v1841_v4 }
 0x20d   :  { %v1163_v36 = vmax.f32 %v1133_v46, 0.0  ;;  %v1148_v6 = vadd.f32 %v5383_v14, %v4857_v37  ;;  %5469 = vmatpush3.msra.mxu0 %v1841_v4  ;;  %v1840_v46 = vld [vmem:[%s7208_s13] sm:$0xff]  ;;  %v2093_v14 = vld [vmem:[%s7209_s17 + $0x8] sm:$0xff] }
 0x20e   :  { %v1142_v38 = vpop.f32.mrf.mxu1  ;;  %5470 = vmatprep.subr.mxu0 %v1840_v46 }
 0x20f   :  { %v1143_v47 = vadd.f32 %v4857_v37, %v1142_v38  ;;  %5394 = vmatprep.mubr.msk.f32.mxu1 %vm744_vm1, %v1163_v36  ;;  %v1166_v26 = vmax.f32 %v1148_v6, 0.0  ;;  %5471 = vmatpush3.msra.mxu0 %v1840_v46  ;;  %v5413_v36 = vpop.f32.mrf.mxu0 }
 0x210   :  { %5395 = vmatmul.mubr.msk.f32.gmra.mxu1 %vm744_vm1, %v1164_v5  ;;  %5500 = vmatprep.subr.mxu0 %v2093_v14 }
 0x211   :  { %v1165_v7 = vmax.f32 %v1143_v47, 0.0  ;;  %v1384_v5 = vpop.f32.mrf.mxu0  ;;  %v4875_v47 = vld [vmem:[%s7210_s21] ss:$0 sm:$0xff] }
 0x213   :  { %v5386_v39 = vpop.f32.mrf.mxu1  ;;  %5397 = vmatprep.mubr.msk.f32.mxu1 %vm744_vm1, %v1165_v7  ;;  %v5416_v6 = vpop.f32.mrf.mxu0 }
 0x214   :  { %5398 = vmatmul.mubr.msk.f32.gmra.mxu1 %vm744_vm1, %v1166_v26  ;;  %v1158_v13 = vadd.f32 %v5386_v39, %v4857_v37 }
 0x215   :  { %v1152_v15 = vpop.f32.mrf.mxu1  ;;  %v1394_v38 = vpop.f32.mrf.mxu0 }
 0x216   :  { %v1153_v16 = vadd.f32 %v4857_v37, %v1152_v15  ;;  %v1168_v10 = vmax.f32 %v1158_v13, 0.0  ;;  %v1675_v37 = vld [vmem:[%s6176_s20 + $0x8] sm:$0xff]  ;;  %v1390_v13 = vadd.f32 %v5413_v36, %v4875_v47  ;;  %s7219_s20 = sld [smem:[#allocation21_spill]] }
 0x217   :  { %v5419_v7 = vpop.f32.mrf.mxu0 }
 0x218   :  { %v1167_v17 = vmax.f32 %v1153_v16, 0.0  ;;  %v1385_v16 = vadd.f32 %v4875_v47, %v1384_v5 }
 0x21a   :  { %5400 = vmatprep.mubr.msk.f32.mxu1 %vm744_vm1, %v1167_v17 }
 0x21b   :  { %5401 = vmatmul.mubr.msk.f32.gmra.mxu1 %vm744_vm1, %v1168_v10  ;;  %v1404_v10 = vpop.f32.mrf.mxu0 }
 0x21c   :  { %5439 = vmatprep.mubr.msk.f32.mxu1 %vm5991_vm3, %v5990_v18 }
 0x2bd   :  { %v5393_v21 = vpop.f32.mrf.mxu1 }
 0x2be   :  { %v6516_v27 = vadd.f32 %v5393_v21, %v4866_v20 }
 0x2bf   :  { %v1268_v22 = vpop.f32.mrf.mxu1 }
 0x2c0   :  { %v6520_v30 = vadd.f32 %v4866_v20, %v1268_v22 }
 0x2d0   :  { %v5396_v23 = vpop.f32.mrf.mxu1 }
 0x2d1   :  { %v6508_v45 = vadd.f32 %v5396_v23, %v4866_v20 }
 0x2d2   :  { %v1278_v3 = vpop.f32.mrf.mxu1 }
 0x2d3   :  { %v6512_v54 = vadd.f32 %v4866_v20, %v1278_v3 }
 0x2d4   :  { %v5399_v24 = vpop.f32.mrf.mxu1 }
 0x2d5   :  { %v6500_v25 = vadd.f32 %v5399_v24, %v4866_v20  ;;  %v1400_v24 = vadd.f32 %v5416_v6, %v4875_v47 }
 0x2d6   :  { %v1288_v11 = vpop.f32.mrf.mxu1 }
 0x2d7   :  { %v6504_v53 = vadd.f32 %v4866_v20, %v1288_v11 }
 0x2db   :  { %v5402_v40 = vpop.f32.mrf.mxu1 }
 0x2dc   :  { %v6494_v19 = vadd.f32 %v5402_v40, %v4866_v20 }
 0x2dd   :  { %v1298_v52 = vpop.f32.mrf.mxu1 }
 0x2de   :  { %v6496_v28 = vadd.f32 %v4866_v20, %v1298_v52  ;;  %5424 = vmatpush3.msra.mxu1 %v6494_v19  ;;  %v1395_v20 = vadd.f32 %v4875_v47, %v1394_v38 }
 0x2df   :  { %5425 = vmatprep.subr.mxu1 %v5990_v18 }
 0x2e0   :  { %5426 = vmatpush3.msra.mxu1 %v6496_v28 }
 0x2e1   :  { %5427 = vmatprep.subr.mxu1 %v5990_v18 }
 0x2e2   :  { %5428 = vmatpush3.msra.mxu1 %v6500_v25 }
 0x2e3   :  { %5429 = vmatprep.subr.mxu1 %v5990_v18 }
 0x2e4   :  { %5430 = vmatpush3.msra.mxu1 %v6504_v53 }
 0x2e5   :  { %5431 = vmatprep.subr.mxu1 %v5990_v18 }
 0x2e6   :  { %5432 = vmatpush3.msra.mxu1 %v6508_v45 }
 0x2e7   :  { %5433 = vmatprep.subr.mxu1 %v5990_v18 }
 0x2e8   :  { %5434 = vmatpush3.msra.mxu1 %v6512_v54 }
 0x2e9   :  { %5435 = vmatprep.subr.mxu1 %v5990_v18 }
 0x2ea   :  { %5436 = vmatpush3.msra.mxu1 %v6516_v27 }
 0x2eb   :  { %5437 = vmatprep.subr.mxu1 %v5990_v18 }
 0x2ec   :  { %5438 = vmatpush3.msra.mxu1 %v6520_v30 }
 0x2ed   :  { %5440 = vmatmul.mubr.msk.f32.vlgmr.msra.gmra.mxu1 %vm1424_vm4, %v1423_v31  ;;  %5442 = vmatprep.subr.mxu1 %v5990_v18 }
 0x2ee   :  { %5446 = vmatprep.mubr.msk.f32.mxu1 %vm5991_vm3, %v5990_v18  ;;  %5443 = vmatpush3.msra.mxu1 %v1500_v0 }
 0x2ef   :  { %5444 = vmatprep.subr.mxu1 %v5990_v18 }
 0x2f0   :  { %5445 = vmatpush3.msra.mxu1 %v1499_v33 }
 0x2f1   :  { %5449 = vmatprep.subr.mxu1 %v5990_v18 }
 0x3ad   :  { %v1494_v29 = vpop.f32.mrf.mxu1 }
 0x3ae   :  { %v1498_v32 = vmul.f32 0.03125, %v1494_v29 }
 0x3af   :  { %v5441_v63 = vpop.f32.mrf.mxu1 }
 0x3b0   :  { %5447 = vmatmul.mubr.msk.f32.vlgmr.msra.gmra.mxu1 %vm744_vm1, %v1498_v32  ;;  %v1410_v32 = vadd.f32 %v5419_v7, %v4875_v47 }
 0x3b1   :  { %5451 = vmatprep.mubr.msk.f32.mxu1 %vm5991_vm3, %v5990_v18  ;;  %5450 = vmatpush3.msk.msra.mxu1 %vm1594_vm5, %v1582_v8 }
 0x470   :  { %v1577_v58 = vpop.f32.mrf.mxu1 }
 0x471   :  { %v1578_v41 = vadd.f32 %v4885_v34, %v1577_v58 }
 0x472   :  { %v5448_v42 = vpop.f32.mrf.mxu1 }
 0x473   :  { %v1581_v43 = vmax.f32 %v1578_v41, 0.0 }
 0x475   :  { %5452 = vmatmul.mubr.msk.f32.vlgmr.msra.gmra.mxu1 %vm1590_vm6, %v1581_v43 }
 0x476   :  { %5456 = vmatprep.mubr.msk.f32.mxu1 %vm1682_vm7, %v1674_v49 }
 0x535   :  { %v1664_v48 = vpop.f32.mrf.mxu1 }
 0x536   :  { %v1665_v51 = vadd.f32 %v4887_v50, %v1664_v48 }
 0x537   :  { %v5453_v55 = vpop.f32.mrf.mxu1 }
 0x538   :  { %v4890_v56 = vmul.f32 -1.442695, %v1665_v51 }
 0x53a   :  { %5829 = vpow2.f32 %v4890_v56 }
 0x547   :  { %v5830_v57 = vpop.eup %5829 }
 0x548   :  { %v1671_v59 = vadd.f32 1.0, %v5830_v57 }
 0x54a   :  { %5831 = vrcp.f32 %v1671_v59 }
 0x557   :  { %v5832_v60 = vpop.eup %5831 }
 0x558   :  { %5454 = vmatprep.subr.msk.mxu1 %vm1707_vm8, %v5832_v60 }
 0x559   :  { %5455 = vmatpush3.msk.msra.mxu1 %vm1707_vm8, %v5832_v60 }
 0x55a   :  { %5457 = vmatmul.mubr.msk.f32.vlgmr.msra.gmra.mxu1 %vm1682_vm7, %v1675_v37  ;;  %5484 = vmatprep.subr.mxu1 %v1979_v61 }
 0x55b   :  { %5459 = vmatprep.mubr.msk.f32.mxu1 %vm1682_vm7, %v1676_v44  ;;  %5485 = vmatpush3.msra.mxu1 %v1979_v61  ;;  %v6636_v61 = vld [vmem:[%s7211_s25] ss:$0 sm:$0xff] }
 0x55c   :  { %5486 = vmatprep.subr.mxu1 %v1978_v35 }
 0x55d   :  { %5487 = vmatpush3.msra.mxu1 %v1978_v35 }
 0x55e   :  { %5460 = vmatmul.mubr.msk.f32.gmra.mxu1 %vm1682_vm7, %v1677_v62 }
 0x55f   :  { %5462 = vmatprep.mubr.msk.f32.mxu1 %vm1682_vm7, %v1678_v9 }
 0x562   :  { %5463 = vmatmul.mubr.msk.f32.gmra.mxu1 %vm1682_vm7, %v1679_v1  ;;  %v6640_v1 = vld [vmem:[%s7212_s29] ss:$0 sm:$0xff] }
 0x563   :  { %5465 = vmatprep.mubr.msk.f32.mxu1 %vm1682_vm7, %v1680_v12 }
 0x566   :  { %5466 = vmatmul.mubr.msk.f32.gmra.mxu1 %vm1682_vm7, %v1681_v2 }
 0x61a   :  { %v5458_v26 = vpop.f32.mrf.mxu1 }
 0x61b   :  { %v1817_v39 = vmul.f32 %v5458_v26, %v6516_v27  ;;  %v5422_v27 = vpop.f32.mrf.mxu0 }
 0x61c   :  { %v1777_v15 = vpop.f32.mrf.mxu1  ;;  %v1420_v50 = vadd.f32 %v5422_v27, %v4875_v47 }
 0x61d   :  { %v1816_v17 = vmul.f32 %v1777_v15, %v6520_v30  ;;  %v1825_v21 = vadd.f32 %v1817_v39, %v1390_v13  ;;  %v1414_v34 = vpop.f32.mrf.mxu0 }
 0x61e   :  { %v5461_v22 = vpop.f32.mrf.mxu1 }
 0x61f   :  { %v1824_v23 = vadd.f32 %v1816_v17, %v1385_v16  ;;  %v1819_v3 = vmul.f32 %v5461_v22, %v6508_v45  ;;  %v6568_v31 = vmax.f32 %v1825_v21, 0.0  ;;  %v2092_v45 = vld [vmem:[%s7209_s17] sm:$0xff] }
 0x620   :  { %v1787_v11 = vpop.f32.mrf.mxu1 }
 0x621   :  { %v6565_v40 = vmax.f32 %v1824_v23, 0.0  ;;  %v1818_v52 = vmul.f32 %v1787_v11, %v6512_v54  ;;  %v1827_v0 = vadd.f32 %v1819_v3, %v1400_v24  ;;  %v1405_v54 = vadd.f32 %v4875_v47, %v1404_v10  ;;  %v6656_v10 = vld [vmem:[%s7213_s3] ss:$0 sm:$0xff] }
 0x622   :  { %v5464_v33 = vpop.f32.mrf.mxu1 }
 0x623   :  { %v1826_v30 = vadd.f32 %v1818_v52, %v1395_v20  ;;  %v1821_v29 = vmul.f32 %v5464_v33, %v6500_v25  ;;  %5472 = vmatprep.mubr.msk.f32.mxu0 %vm744_vm1, %v6565_v40  ;;  %5488 = vmatprep.mubr.msk.f32.mxu1 %vm744_vm1, %v6565_v40  ;;  %v6583_v58 = vmax.f32 %v1827_v0, 0.0 }
 0x624   :  { %v1797_v63 = vpop.f32.mrf.mxu1  ;;  %5473 = vmatmul.mubr.msk.f32.vlgmr.msra.gmra.mxu0 %vm744_vm1, %v6568_v31  ;;  %5489 = vmatmul.mubr.msk.f32.vlgmr.msra.gmra.mxu1 %vm744_vm1, %v6568_v31 }
 0x625   :  { %v6580_v8 = vmax.f32 %v1826_v30, 0.0  ;;  %v1820_v25 = vmul.f32 %v1797_v63, %v6504_v53  ;;  %5501 = vmatpush3.msra.mxu0 %v2093_v14  ;;  %v1829_v41 = vadd.f32 %v1821_v29, %v1410_v32  ;;  %v1415_v53 = vadd.f32 %v4875_v47, %v1414_v34 }
 0x626   :  { %v5467_v42 = vpop.f32.mrf.mxu1  ;;  %5502 = vmatprep.subr.mxu0 %v2092_v45 }
 0x627   :  { %v1828_v43 = vadd.f32 %v1820_v25, %v1405_v54  ;;  %v1823_v49 = vmul.f32 %v5467_v42, %v6494_v19  ;;  %5475 = vmatprep.mubr.msk.f32.mxu0 %vm744_vm1, %v6580_v8  ;;  %5491 = vmatprep.mubr.msk.f32.mxu1 %vm744_vm1, %v6580_v8  ;;  %v6597_v19 = vmax.f32 %v1829_v41, 0.0  ;;  %v4964_v42 = vld [vmem:[%s7207_s9 + $0x18] sm:$0xff] }
 0x628   :  { %v1807_v48 = vpop.f32.mrf.mxu1  ;;  %5476 = vmatmul.mubr.msk.f32.gmra.mxu0 %vm744_vm1, %v6583_v58  ;;  %5492 = vmatmul.mubr.msk.f32.gmra.mxu1 %vm744_vm1, %v6583_v58 }
 0x629   :  { %v6594_v51 = vmax.f32 %v1828_v43, 0.0  ;;  %v1822_v55 = vmul.f32 %v1807_v48, %v6496_v28  ;;  %5503 = vmatpush3.msra.mxu0 %v2092_v45  ;;  %v1831_v56 = vadd.f32 %v1823_v49, %v1420_v50  ;;  %v4963_v50 = vld [vmem:[%s7207_s9 + $0x10] sm:$0xff] }
 0x62b   :  { %v1830_v57 = vadd.f32 %v1822_v55, %v1415_v53  ;;  %5478 = vmatprep.mubr.msk.f32.mxu0 %vm744_vm1, %v6594_v51  ;;  %5494 = vmatprep.mubr.msk.f32.mxu1 %vm744_vm1, %v6594_v51  ;;  %v6609_v28 = vmax.f32 %v1831_v56, 0.0 }
 0x62c   :  { %5479 = vmatmul.mubr.msk.f32.gmra.mxu0 %vm744_vm1, %v6597_v19  ;;  %5495 = vmatmul.mubr.msk.f32.gmra.mxu1 %vm744_vm1, %v6597_v19 }
 0x62d   :  { %v6607_v59 = vmax.f32 %v1830_v57, 0.0 }
 0x62f   :  { %5481 = vmatprep.mubr.msk.f32.mxu0 %vm744_vm1, %v6607_v59  ;;  %5497 = vmatprep.mubr.msk.f32.mxu1 %vm744_vm1, %v6607_v59 }
 0x630   :  { %5482 = vmatmul.mubr.msk.f32.gmra.mxu0 %vm744_vm1, %v6609_v28  ;;  %5498 = vmatmul.mubr.msk.f32.gmra.mxu1 %vm744_vm1, %v6609_v28 }
 0x631   :  { %5504 = vmatprep.mubr.msk.f32.mxu0 %vm744_vm1, %v6565_v40 }
 0x634   :  { %5505 = vmatmul.mubr.msk.f32.vlgmr.msra.gmra.mxu0 %vm744_vm1, %v6568_v31 }
 0x635   :  { %5507 = vmatprep.mubr.msk.f32.mxu0 %vm744_vm1, %v6580_v8 }
 0x638   :  { %5508 = vmatmul.mubr.msk.f32.gmra.mxu0 %vm744_vm1, %v6583_v58 }
 0x639   :  { %5510 = vmatprep.mubr.msk.f32.mxu0 %vm744_vm1, %v6594_v51 }
 0x63c   :  { %5511 = vmatmul.mubr.msk.f32.gmra.mxu0 %vm744_vm1, %v6597_v19 }
 0x63d   :  { %5513 = vmatprep.mubr.msk.f32.mxu0 %vm744_vm1, %v6607_v59 }
 0x640   :  { %5514 = vmatmul.mubr.msk.f32.gmra.mxu0 %vm744_vm1, %v6609_v28 }
 0x6e4   :  { %v5474_v60 = vpop.f32.mrf.mxu0  ;;  %v5490_v37 = vpop.f32.mrf.mxu1 }
 0x6e5   :  { %v2059_v38 = vadd.f32 %v5490_v37, %v6640_v1  ;;  %v1945_v22 = vadd.f32 %v5474_v60, %v6636_v61 }
 0x6e6   :  { %v1939_v44 = vpop.f32.mrf.mxu0  ;;  %v2053_v62 = vpop.f32.mrf.mxu1 }
 0x6e7   :  { %v1940_v9 = vadd.f32 %v6636_v61, %v1939_v44  ;;  %v2054_v39 = vadd.f32 %v6640_v1, %v2053_v62 }
 0x6e8   :  { %v5477_v12 = vpop.f32.mrf.mxu0  ;;  %v5493_v2 = vpop.f32.mrf.mxu1 }
 0x6e9   :  { %v2069_v35 = vadd.f32 %v5493_v2, %v6640_v1  ;;  %5524 = vmatprep.mubr.msk.f32.mxu1 %vm171_vm0, %v1940_v9  ;;  %v1955_v0 = vadd.f32 %v5477_v12, %v6636_v61 }
 0x6ea   :  { %v1949_v4 = vpop.f32.mrf.mxu0  ;;  %v2063_v46 = vpop.f32.mrf.mxu1 }
 0x6eb   :  { %v2064_v14 = vadd.f32 %v6640_v1, %v2063_v46  ;;  %5516 = vmatprep.subr.msk.mxu1 %vm171_vm0, %v2069_v35  ;;  %v1950_v24 = vadd.f32 %v6636_v61, %v1949_v4 }
 0x6ec   :  { %v5480_v36 = vpop.f32.mrf.mxu0  ;;  %v5496_v5 = vpop.f32.mrf.mxu1  ;;  %5517 = vmatpush3.xpose.msk.msra.mxu1 %vm171_vm0, %v2069_v35 }
 0x6ed   :  { %5518 = vmatprep.subr.msk.mxu1 %vm171_vm0, %v2064_v14  ;;  %v2079_v54 = vadd.f32 %v5496_v5, %v6640_v1  ;;  %v1965_v43 = vadd.f32 %v5480_v36, %v6636_v61 }
 0x6ee   :  { %v1959_v6 = vpop.f32.mrf.mxu0  ;;  %v2073_v47 = vpop.f32.mrf.mxu1 }
 0x6ef   :  { %v1960_v29 = vadd.f32 %v6636_v61, %v1959_v6  ;;  %v2074_v41 = vadd.f32 %v6640_v1, %v2073_v47 }
 0x6f0   :  { %v5483_v7 = vpop.f32.mrf.mxu0  ;;  %5519 = vmatpush3.xpose.msk.msra.mxu1 %vm171_vm0, %v2064_v14  ;;  %v5499_v13 = vpop.f32.mrf.mxu1 }
 0x6f1   :  { %5520 = vmatprep.subr.msk.mxu1 %vm171_vm0, %v2059_v38  ;;  %v2089_v17 = vadd.f32 %v5499_v13, %v6640_v1  ;;  %v1975_v48 = vadd.f32 %v5483_v7, %v6636_v61 }
 0x6f2   :  { %v1969_v26 = vpop.f32.mrf.mxu0  ;;  %v2083_v23 = vpop.f32.mrf.mxu1 }
 0x6f3   :  { %v2084_v52 = vadd.f32 %v6640_v1, %v2083_v23  ;;  %v1970_v49 = vadd.f32 %v6636_v61, %v1969_v26 }
 0x6f4   :  { %v5506_v15 = vpop.f32.mrf.mxu0  ;;  %5521 = vmatpush3.xpose.msk.msra.mxu1 %vm171_vm0, %v2059_v38 }
 0x6f5   :  { %5522 = vmatprep.subr.msk.mxu1 %vm171_vm0, %v2054_v39  ;;  %v2173_v33 = vadd.f32 %v5506_v15, %v6656_v10  ;;  %v6725_v15 = vld [vmem:[%s7212_s29 + $0x1] ss:$0 sm:$0xff] }
 0x6f6   :  { %v2167_v16 = vpop.f32.mrf.mxu0 }
 0x6f7   :  { %v2168_v32 = vadd.f32 %v6656_v10, %v2167_v16 }
 0x6f8   :  { %v5509_v21 = vpop.f32.mrf.mxu0  ;;  %5523 = vmatpush3.xpose.msk.msra.mxu1 %vm171_vm0, %v2054_v39 }
 0x6f9   :  { %v2183_v3 = vadd.f32 %v5509_v21, %v6656_v10  ;;  %5544 = vmatprep.subr.msk.mxu1 %vm171_vm0, %v2089_v17 }
 0x6fa   :  { %v2177_v11 = vpop.f32.mrf.mxu0 }
 0x6fb   :  { %v2178_v20 = vadd.f32 %v6656_v10, %v2177_v11  ;;  %5525 = vmatmul.mubr.msk.f32.vlgmr.msra.gmra.mxu1 %vm171_vm0, %v1945_v22  ;;  %5530 = vmatprep.subr.mxu0 %v2183_v3 }
 0x6fc   :  { %v5512_v27 = vpop.f32.mrf.mxu0  ;;  %5527 = vmatprep.mubr.msk.f32.mxu1 %vm171_vm0, %v1950_v24  ;;  %5531 = vmatpush3.msra.mxu0 %v2183_v3 }
 0x6fd   :  { %v6670_v30 = vadd.f32 %v5512_v27, %v6656_v10  ;;  %5545 = vmatpush3.xpose.msk.msra.mxu1 %vm171_vm0, %v2089_v17  ;;  %5532 = vmatprep.subr.mxu0 %v2178_v20 }
 0x6fe   :  { %5546 = vmatprep.subr.msk.mxu1 %vm171_vm0, %v2084_v52  ;;  %v2187_v45 = vpop.f32.mrf.mxu0  ;;  %5533 = vmatpush3.msra.mxu0 %v2178_v20 }
 0x6ff   :  { %v6677_v63 = vadd.f32 %v6656_v10, %v2187_v45  ;;  %5528 = vmatmul.mubr.msk.f32.gmra.mxu1 %vm171_vm0, %v1955_v0  ;;  %5534 = vmatprep.subr.mxu0 %v2173_v33 }
 0x700   :  { %v5515_v25 = vpop.f32.mrf.mxu0  ;;  %5535 = vmatpush3.msra.mxu0 %v2173_v33  ;;  %5552 = vmatprep.mubr.msk.f32.mxu1 %vm171_vm0, %v1960_v29 }
 0x701   :  { %v6683_v34 = vadd.f32 %v5515_v25, %v6656_v10  ;;  %5547 = vmatpush3.xpose.msk.msra.mxu1 %vm171_vm0, %v2084_v52  ;;  %5536 = vmatprep.subr.mxu0 %v2168_v32 }
 0x702   :  { %5548 = vmatprep.subr.msk.mxu1 %vm171_vm0, %v2079_v54  ;;  %5537 = vmatpush3.msra.mxu0 %v2168_v32 }
 0x703   :  { %5558 = vmatprep.subr.mxu0 %v6683_v34 }
 0x705   :  { %5549 = vmatpush3.xpose.msk.msra.mxu1 %vm171_vm0, %v2079_v54 }
 0x706   :  { %5550 = vmatprep.subr.msk.mxu1 %vm171_vm0, %v2074_v41 }
 0x709   :  { %5551 = vmatpush3.xpose.msk.msra.mxu1 %vm171_vm0, %v2074_v41 }
 0x70a   :  { %5588 = vmatprep.subr.mxu1 %v4964_v42 }
 0x70c   :  { %5553 = vmatmul.mubr.msk.f32.vlgmr.msra.gmra.mxu1 %vm171_vm0, %v1965_v43 }
 0x70d   :  { %5555 = vmatprep.mubr.msk.f32.mxu1 %vm171_vm0, %v1970_v49  ;;  %5589 = vmatpush3.msra.mxu1 %v4964_v42 }
 0x70e   :  { %5590 = vmatprep.subr.mxu1 %v4963_v50 }
 0x70f   :  { %5591 = vmatpush3.msra.mxu1 %v4963_v50 }
 0x710   :  { %5556 = vmatmul.mubr.msk.f32.gmra.mxu1 %vm171_vm0, %v1975_v48 }
 0x711   :  { %5592 = vmatprep.mubr.msk.f32.mxu1 %vm744_vm1, %v6565_v40 }
 0x714   :  { %5593 = vmatmul.mubr.msk.f32.vlgmr.msra.gmra.mxu1 %vm744_vm1, %v6568_v31 }
 0x715   :  { %5595 = vmatprep.mubr.msk.f32.mxu1 %vm744_vm1, %v6580_v8 }
 0x718   :  { %5596 = vmatmul.mubr.msk.f32.gmra.mxu1 %vm744_vm1, %v6583_v58 }
 0x719   :  { %5598 = vmatprep.mubr.msk.f32.mxu1 %vm744_vm1, %v6594_v51 }
 0x71c   :  { %5599 = vmatmul.mubr.msk.f32.gmra.mxu1 %vm744_vm1, %v6597_v19 }
 0x71d   :  { %5601 = vmatprep.mubr.msk.f32.mxu1 %vm744_vm1, %v6607_v59 }
 0x720   :  { %5602 = vmatmul.mubr.msk.f32.gmra.mxu1 %vm744_vm1, %v6609_v28 }
 0x7bb   :  { %v5526_v53 = vpop.f32.mrf.mxu1 }
 0x7bc   :  { %v2316_v60 = vmul.f32 0.35355338, %v5526_v53 }
 0x7bd   :  { %v2296_v55 = vpop.f32.mrf.mxu1 }
 0x7be   :  { %v2315_v56 = vmul.f32 0.35355338, %v2296_v55  ;;  %v2322_v9 = vsel %vm1031_vm2, %v2316_v60, -inf }
 0x7bf   :  { %v5529_v57 = vpop.f32.mrf.mxu1 }
 0x7c0   :  { %v2319_v37 = vsel %vm1031_vm2, %v2315_v56, -inf  ;;  %v2318_v62 = vmul.f32 0.35355338, %v5529_v57 }
 0x7c1   :  { %2320 = vmax.xlane.f32.xlu0 %v2319_v37  ;;  %v2306_v61 = vpop.f32.mrf.mxu1 }
 0x7c2   :  { %v2317_v44 = vmul.f32 0.35355338, %v2306_v61  ;;  %v2328_v12 = vsel %vm1031_vm2, %v2318_v62, -inf }
 0x7c4   :  { %v2325_v1 = vsel %vm1031_vm2, %v2317_v44, -inf }
 0x7c5   :  { %2323 = vmax.xlane.f32.xlu0 %v2322_v9  ;;  %2326 = vmax.xlane.f32.xlu1 %v2325_v1 }
 0x7c9   :  { %2329 = vmax.xlane.f32.xlu1 %v2328_v12 }
 0x7cc   :  { %v5554_v2 = vpop.f32.mrf.mxu1 }
 0x7cd   :  { %v2570_v35 = vmul.f32 0.35355338, %v5554_v2 }
 0x7ce   :  { %v2550_v4 = vpop.f32.mrf.mxu1 }
 0x7cf   :  { %v2569_v46 = vmul.f32 0.35355338, %v2550_v4  ;;  %v2576_v14 = vsel %vm1031_vm2, %v2570_v35, -inf }
 0x7d0   :  { %2577 = vmax.xlane.f32.xlu1 %v2576_v14  ;;  %v5557_v36 = vpop.f32.mrf.mxu1 }
 0x7d1   :  { %v2572_v5 = vmul.f32 0.35355338, %v5557_v36  ;;  %v2573_v6 = vsel %vm1031_vm2, %v2569_v46, -inf }
 0x7d2   :  { %2574 = vmax.xlane.f32.xlu0 %v2573_v6  ;;  %v2560_v38 = vpop.f32.mrf.mxu1 }
 0x7d3   :  { %v2571_v47 = vmul.f32 0.35355338, %v2560_v38  ;;  %v2582_v7 = vsel %vm1031_vm2, %v2572_v5, -inf }
 0x7d4   :  { %2583 = vmax.xlane.f32.xlu1 %v2582_v7  ;;  %v5594_v26 = vpop.f32.mrf.mxu1 }
 0x7d5   :  { %v2579_v39 = vsel %vm1031_vm2, %v2571_v47, -inf  ;;  %v2914_v23 = vadd.f32 %v5594_v26, %v6725_v15 }
 0x7d6   :  { %v2908_v13 = vpop.f32.mrf.mxu1  ;;  %2580 = vmax.xlane.f32.xlu0 %v2579_v39 }
 0x7d7   :  { %v2909_v3 = vadd.f32 %v6725_v15, %v2908_v13 }
 0x7d8   :  { %v5597_v16 = vpop.f32.mrf.mxu1 }
 0x7d9   :  { %v2924_v17 = vadd.f32 %v5597_v16, %v6725_v15 }
 0x7da   :  { %v2918_v21 = vpop.f32.mrf.mxu1 }
 0x7db   :  { %v2919_v22 = vadd.f32 %v6725_v15, %v2918_v21  ;;  %5620 = vmatprep.subr.msk.mxu1 %vm171_vm0, %v2924_v17 }
 0x7dc   :  { %5621 = vmatpush3.xpose.msk.msra.mxu1 %vm171_vm0, %v2924_v17 }
 0x7dd   :  { %5622 = vmatprep.subr.msk.mxu1 %vm171_vm0, %v2919_v22 }
 0x7e0   :  { %5623 = vmatpush3.xpose.msk.msra.mxu1 %vm171_vm0, %v2919_v22 }
 0x7e1   :  { %5624 = vmatprep.subr.msk.mxu1 %vm171_vm0, %v2914_v23 }
 0x7e4   :  { %5625 = vmatpush3.xpose.msk.msra.mxu1 %vm171_vm0, %v2914_v23 }
 0x7e5   :  { %5626 = vmatprep.subr.msk.mxu1 %vm171_vm0, %v2909_v3 }
 0x7e8   :  { %5627 = vmatpush3.xpose.msk.msra.mxu1 %vm171_vm0, %v2909_v3  ;;  %v2197_v3 = vpop.f32.mrf.mxu0 }
 0x84a   :  { %v2321_v24 = vpop.xlane.xlu0 %2320 }
 0x84b   :  { %v2331_v11 = vsub.f32 %v2315_v56, %v2321_v24 }
 0x84d   :  { %v2335_v20 = vmul.f32 1.442695, %v2331_v11 }
 0x84e   :  { %v2324_v52 = vpop.xlane.xlu0 %2323  ;;  %v2327_v27 = vpop.xlane.xlu1 %2326 }
 0x84f   :  { %5833 = vpow2.f32 %v2335_v20  ;;  %v2332_v0 = vsub.f32 %v2316_v60, %v2324_v52  ;;  %v2333_v33 = vsub.f32 %v2317_v44, %v2327_v27  ;;  %v2198_v27 = vadd.f32 %v6656_v10, %v2197_v3  ;;  %v4952_v10 = vld [vmem:[%s7208_s13 + $0x18] sm:$0xff] }
 0x851   :  { %v2337_v29 = vmul.f32 1.442695, %v2332_v0  ;;  %v2339_v45 = vmul.f32 1.442695, %v2333_v33 }
 0x852   :  { %v2330_v32 = vpop.xlane.xlu1 %2329 }
 0x853   :  { %5835 = vpow2.f32 %v2337_v29  ;;  %v2334_v54 = vsub.f32 %v2318_v62, %v2330_v32 }
 0x854   :  { %5837 = vpow2.f32 %v2339_v45 }
 0x855   :  { %v2341_v25 = vmul.f32 1.442695, %v2334_v54 }
 0x857   :  { %5839 = vpow2.f32 %v2341_v25 }
 0x859   :  { %v2578_v41 = vpop.xlane.xlu1 %2577 }
 0x85a   :  { %v2586_v42 = vsub.f32 %v2570_v35, %v2578_v41  ;;  %v5600_v41 = vpop.f32.mrf.mxu1 }
 0x85b   :  { %v2575_v43 = vpop.xlane.xlu0 %2574 }
 0x85c   :  { %v5834_v49 = vpop.eup %5833  ;;  %v2591_v50 = vmul.f32 1.442695, %v2586_v42  ;;  %v2585_v48 = vsub.f32 %v2569_v46, %v2575_v43  ;;  %v4951_v42 = vld [vmem:[%s7208_s13 + $0x10] sm:$0xff] }
 0x85d   :  { %v2584_v53 = vpop.xlane.xlu1 %2583  ;;  %v2343_v55 = vsel %vm1031_vm2, %v5834_v49, 0.0 }
 0x85e   :  { %5841 = vpow2.f32 %v2591_v50  ;;  %v2589_v56 = vmul.f32 1.442695, %v2585_v48  ;;  %v2588_v57 = vsub.f32 %v2572_v5, %v2584_v53  ;;  %2344 = vadd.xlane.f32.xlu0 %v2343_v55  ;;  %v4975_v53 = vld [vmem:[%s7209_s17 + $0x10] sm:$0xff] }
 0x85f   :  { %v2581_v60 = vpop.xlane.xlu0 %2580 }
 0x860   :  { %v5836_v37 = vpop.eup %5835  ;;  %5843 = vpow2.f32 %v2589_v56  ;;  %v2595_v61 = vmul.f32 1.442695, %v2588_v57  ;;  %v2587_v44 = vsub.f32 %v2571_v47, %v2581_v60  ;;  %v2934_v60 = vadd.f32 %v5600_v41, %v6725_v15 }
 0x861   :  { %v5838_v62 = vpop.eup %5837  ;;  %v2346_v9 = vsel %vm1031_vm2, %v5836_v37, 0.0 }
 0x862   :  { %5845 = vpow2.f32 %v2595_v61  ;;  %v2593_v1 = vmul.f32 1.442695, %v2587_v44  ;;  %2347 = vadd.xlane.f32.xlu1 %v2346_v9  ;;  %v2349_v12 = vsel %vm1031_vm2, %v5838_v62, 0.0 }
 0x863   :  { %2350 = vadd.xlane.f32.xlu0 %v2349_v12 }
 0x864   :  { %v5840_v2 = vpop.eup %5839  ;;  %5847 = vpow2.f32 %v2593_v1 }
 0x865   :  { %v2352_v35 = vsel %vm1031_vm2, %v5840_v2, 0.0 }
 0x866   :  { %2353 = vadd.xlane.f32.xlu1 %v2352_v35 }
 0x86b   :  { %v5842_v4 = vpop.eup %5841 }
 0x86c   :  { %v2600_v46 = vsel %vm1031_vm2, %v5842_v4, 0.0 }
 0x86d   :  { %v5844_v14 = vpop.eup %5843  ;;  %2601 = vadd.xlane.f32.xlu1 %v2600_v46 }
 0x86e   :  { %v2597_v36 = vsel %vm1031_vm2, %v5844_v14, 0.0 }
 0x86f   :  { %v5846_v5 = vpop.eup %5845  ;;  %2598 = vadd.xlane.f32.xlu0 %v2597_v36 }
 0x870   :  { %v2606_v6 = vsel %vm1031_vm2, %v5846_v5, 0.0 }
 0x871   :  { %v5848_v38 = vpop.eup %5847  ;;  %2607 = vadd.xlane.f32.xlu1 %v2606_v6 }
 0x872   :  { %v2603_v47 = vsel %vm1031_vm2, %v5848_v38, 0.0 }
 0x873   :  { %2604 = vadd.xlane.f32.xlu0 %v2603_v47 }
 0x8e7   :  { %v2345_v7 = vpop.xlane.xlu0 %2344 }
 0x8e8   :  { %5849 = vrcp.f32 %v2345_v7 }
 0x8eb   :  { %v2348_v26 = vpop.xlane.xlu1 %2347 }
 0x8ec   :  { %5851 = vrcp.f32 %v2348_v26  ;;  %v2351_v39 = vpop.xlane.xlu0 %2350 }
 0x8ed   :  { %5853 = vrcp.f32 %v2351_v39 }
 0x8ef   :  { %v2354_v13 = vpop.xlane.xlu1 %2353 }
 0x8f0   :  { %5855 = vrcp.f32 %v2354_v13 }
 0x8f5   :  { %v5850_v16 = vpop.eup %5849 }
 0x8f6   :  { %v2602_v17 = vpop.xlane.xlu1 %2601  ;;  %v2359_v21 = vmul.f32 %v5850_v16, %v5834_v49  ;;  %v4976_v49 = vld [vmem:[%s7209_s17 + $0x18] sm:$0xff] }
 0x8f7   :  { %5857 = vrcp.f32 %v2602_v17 }
 0x8f8   :  { %v2599_v22 = vpop.xlane.xlu0 %2598  ;;  %5538 = vmatprep.mubr.msk.f32.mxu0 %vm1031_vm2, %v2359_v21 }
 0x8f9   :  { %v5852_v23 = vpop.eup %5851  ;;  %5859 = vrcp.f32 %v2599_v22 }
 0x8fa   :  { %v5854_v24 = vpop.eup %5853  ;;  %v2360_v11 = vmul.f32 %v5852_v23, %v5836_v37  ;;  %v2608_v20 = vpop.xlane.xlu1 %2607 }
 0x8fb   :  { %v2361_v52 = vmul.f32 %v5854_v24, %v5838_v62  ;;  %5861 = vrcp.f32 %v2608_v20  ;;  %v6835_v24 = vld [vmem:[%s7213_s3 + $0x1] ss:$0 sm:$0xff] }
 0x8fc   :  { %v2605_v0 = vpop.xlane.xlu0 %2604  ;;  %5539 = vmatmul.mubr.msk.f32.vlgmr.msra.gmra.mxu0 %vm1031_vm2, %v2360_v11 }
 0x8fd   :  { %v5856_v33 = vpop.eup %5855  ;;  %5863 = vrcp.f32 %v2605_v0  ;;  %5559 = vmatpush3.msra.mxu0 %v6683_v34  ;;  %5541 = vmatprep.mubr.msk.f32.mxu0 %vm1031_vm2, %v2361_v52 }
 0x8fe   :  { %5560 = vmatprep.subr.mxu0 %v2198_v27  ;;  %v2362_v29 = vmul.f32 %v5856_v33, %v5840_v2 }
 0x8ff   :  { %5561 = vmatpush3.msra.mxu0 %v2198_v27 }
 0x900   :  { %5562 = vmatprep.subr.mxu0 %v6670_v30  ;;  %5542 = vmatmul.mubr.msk.f32.gmra.mxu0 %vm1031_vm2, %v2362_v29 }
 0x901   :  { %5563 = vmatpush3.msra.mxu0 %v6670_v30 }
 0x902   :  { %5564 = vmatprep.subr.mxu0 %v6677_v63 }
 0x903   :  { %5565 = vmatpush3.msra.mxu0 %v6677_v63  ;;  %v2928_v63 = vpop.f32.mrf.mxu1 }
 0x904   :  { %5572 = vmatprep.subr.mxu0 %v4952_v10  ;;  %v5858_v34 = vpop.eup %5857  ;;  %v2929_v37 = vadd.f32 %v6725_v15, %v2928_v63 }
 0x905   :  { %v2614_v54 = vmul.f32 %v5858_v34, %v5842_v4  ;;  %v5603_v48 = vpop.f32.mrf.mxu1  ;;  %v4954_v4 = vld [vmem:[%s7211_s25 + $0x1] ss:$0 sm:$0xff] }
 0x906   :  { %v5860_v45 = vpop.eup %5859  ;;  %v2944_v55 = vadd.f32 %v5603_v48, %v6725_v15 }
 0x907   :  { %v2613_v32 = vmul.f32 %v5860_v45, %v5844_v14  ;;  %v2938_v56 = vpop.f32.mrf.mxu1 }
 0x908   :  { %v5862_v25 = vpop.eup %5861  ;;  %v2939_v57 = vadd.f32 %v6725_v15, %v2938_v56 }
 0x909   :  { %5566 = vmatprep.mubr.msk.f32.mxu0 %vm1031_vm2, %v2613_v32  ;;  %v2616_v50 = vmul.f32 %v5862_v25, %v5846_v5 }
 0x90a   :  { %v5864_v43 = vpop.eup %5863  ;;  %5567 = vmatmul.mubr.msk.f32.vlgmr.msra.gmra.mxu0 %vm1031_vm2, %v2614_v54 }
 0x90b   :  { %v2615_v30 = vmul.f32 %v5864_v43, %v5848_v38  ;;  %5573 = vmatpush3.msra.mxu0 %v4952_v10 }
 0x90c   :  { %5574 = vmatprep.subr.mxu0 %v4951_v42 }
 0x90d   :  { %5569 = vmatprep.mubr.msk.f32.mxu0 %vm1031_vm2, %v2615_v30  ;;  %5575 = vmatpush3.msra.mxu0 %v4951_v42 }
 0x90e   :  { %5570 = vmatmul.mubr.msk.f32.gmra.mxu0 %vm1031_vm2, %v2616_v50  ;;  %5604 = vmatprep.subr.mxu0 %v4976_v49 }
 0x90f   :  { %5576 = vmatprep.mubr.msk.f32.mxu0 %vm744_vm1, %v6565_v40 }
 0x912   :  { %5577 = vmatmul.mubr.msk.f32.vlgmr.msra.gmra.mxu0 %vm744_vm1, %v6568_v31 }
 0x913   :  { %5605 = vmatpush3.msra.mxu0 %v4976_v49  ;;  %5579 = vmatprep.mubr.msk.f32.mxu0 %vm744_vm1, %v6580_v8 }
 0x914   :  { %5606 = vmatprep.subr.mxu0 %v4975_v53 }
 0x915   :  { %5607 = vmatpush3.msra.mxu0 %v4975_v53 }
 0x916   :  { %5648 = vmatprep.subr.msk.mxu0 %vm171_vm0, %v2944_v55  ;;  %5580 = vmatmul.mubr.msk.f32.gmra.mxu0 %vm744_vm1, %v6583_v58 }
 0x917   :  { %5582 = vmatprep.mubr.msk.f32.mxu0 %vm744_vm1, %v6594_v51 }
 0x91a   :  { %5583 = vmatmul.mubr.msk.f32.gmra.mxu0 %vm744_vm1, %v6597_v19 }
 0x91b   :  { %5585 = vmatprep.mubr.msk.f32.mxu0 %vm744_vm1, %v6607_v59 }
 0x91e   :  { %5586 = vmatmul.mubr.msk.f32.gmra.mxu0 %vm744_vm1, %v6609_v28 }
 0x91f   :  { %5608 = vmatprep.mubr.msk.f32.mxu0 %vm744_vm1, %v6565_v40 }
 0x922   :  { %5609 = vmatmul.mubr.msk.f32.vlgmr.msra.gmra.mxu0 %vm744_vm1, %v6568_v31 }
 0x923   :  { %5649 = vmatpush3.xpose.msk.msra.mxu0 %vm171_vm0, %v2944_v55  ;;  %5611 = vmatprep.mubr.msk.f32.mxu0 %vm744_vm1, %v6580_v8 }
 0x924   :  { %5650 = vmatprep.subr.msk.mxu0 %vm171_vm0, %v2939_v57 }
 0x926   :  { %5612 = vmatmul.mubr.msk.f32.gmra.mxu0 %vm744_vm1, %v6583_v58 }
 0x927   :  { %5651 = vmatpush3.xpose.msk.msra.mxu0 %vm171_vm0, %v2939_v57  ;;  %5614 = vmatprep.mubr.msk.f32.mxu0 %vm744_vm1, %v6594_v51 }
 0x928   :  { %5652 = vmatprep.subr.msk.mxu0 %vm171_vm0, %v2934_v60 }
 0x92a   :  { %5615 = vmatmul.mubr.msk.f32.gmra.mxu0 %vm744_vm1, %v6597_v19 }
 0x92b   :  { %5653 = vmatpush3.xpose.msk.msra.mxu0 %vm171_vm0, %v2934_v60  ;;  %5617 = vmatprep.mubr.msk.f32.mxu0 %vm744_vm1, %v6607_v59 }
 0x92c   :  { %5654 = vmatprep.subr.msk.mxu0 %vm171_vm0, %v2929_v37 }
 0x92e   :  { %5618 = vmatmul.mubr.msk.f32.gmra.mxu0 %vm744_vm1, %v6609_v28 }
 0x92f   :  { %5655 = vmatpush3.xpose.msk.msra.mxu0 %vm171_vm0, %v2929_v37 }
 0x9bc   :  { %v6809_v61 = vpop.f32.mrf.mxu0 }
 0x9be   :  { %v6811_v44 = vpop.f32.mrf.mxu0 }
 0x9c0   :  { %v6813_v15 = vpop.f32.mrf.mxu0 }
 0x9c2   :  { %v6815_v62 = vpop.f32.mrf.mxu0 }
 0x9ca   :  { %v6817_v9 = vpop.f32.mrf.mxu0 }
 0x9cc   :  { %v6819_v1 = vpop.f32.mrf.mxu0 }
 0x9ce   :  { %v6821_v12 = vpop.f32.mrf.mxu0 }
 0x9d0   :  { %v6823_v2 = vpop.f32.mrf.mxu0 }
 0x9d2   :  { %v5578_v35 = vpop.f32.mrf.mxu0 }
 0x9d3   :  { %v2798_v36 = vadd.f32 %v5578_v35, %v4954_v4 }
 0x9d4   :  { %v2792_v46 = vpop.f32.mrf.mxu0 }
 0x9d5   :  { %v2793_v14 = vadd.f32 %v4954_v4, %v2792_v46 }
 0x9d6   :  { %v5581_v5 = vpop.f32.mrf.mxu0 }
 0x9d7   :  { %5628 = vmatprep.mubr.msk.f32.mxu1 %vm171_vm0, %v2793_v14  ;;  %v2808_v47 = vadd.f32 %v5581_v5, %v4954_v4 }
 0x9d8   :  { %v2802_v6 = vpop.f32.mrf.mxu0  ;;  %5629 = vmatmul.mubr.msk.f32.vlgmr.msra.gmra.mxu1 %vm171_vm0, %v2798_v36 }
 0x9d9   :  { %v2803_v38 = vadd.f32 %v4954_v4, %v2802_v6 }
 0x9da   :  { %v5584_v7 = vpop.f32.mrf.mxu0 }
 0x9db   :  { %5631 = vmatprep.mubr.msk.f32.mxu1 %vm171_vm0, %v2803_v38  ;;  %v2818_v13 = vadd.f32 %v5584_v7, %v4954_v4 }
 0x9dc   :  { %v2812_v26 = vpop.f32.mrf.mxu0  ;;  %5632 = vmatmul.mubr.msk.f32.gmra.mxu1 %vm171_vm0, %v2808_v47 }
 0x9dd   :  { %v2813_v39 = vadd.f32 %v4954_v4, %v2812_v26 }
 0x9de   :  { %v5587_v16 = vpop.f32.mrf.mxu0 }
 0x9df   :  { %5656 = vmatprep.mubr.msk.f32.mxu0 %vm171_vm0, %v2813_v39  ;;  %v2828_v22 = vadd.f32 %v5587_v16, %v4954_v4 }
 0x9e0   :  { %v2822_v17 = vpop.f32.mrf.mxu0  ;;  %5657 = vmatmul.mubr.msk.f32.vlgmr.msra.gmra.mxu0 %vm171_vm0, %v2818_v13 }
 0x9e1   :  { %v2823_v21 = vadd.f32 %v4954_v4, %v2822_v17 }
 0x9e2   :  { %v5610_v23 = vpop.f32.mrf.mxu0 }
 0x9e3   :  { %5659 = vmatprep.mubr.msk.f32.mxu0 %vm171_vm0, %v2823_v21  ;;  %v3030_v33 = vadd.f32 %v5610_v23, %v6835_v24 }
 0x9e4   :  { %v3024_v3 = vpop.f32.mrf.mxu0  ;;  %5660 = vmatmul.mubr.msk.f32.gmra.mxu0 %vm171_vm0, %v2828_v22 }
 0x9e5   :  { %v3025_v34 = vadd.f32 %v6835_v24, %v3024_v3 }
 0x9e6   :  { %v5613_v11 = vpop.f32.mrf.mxu0 }
 0x9e7   :  { %v3040_v20 = vadd.f32 %v5613_v11, %v6835_v24 }
 0x9e8   :  { %v3034_v52 = vpop.f32.mrf.mxu0 }
 0x9e9   :  { %v3035_v27 = vadd.f32 %v6835_v24, %v3034_v52  ;;  %5634 = vmatprep.subr.mxu1 %v3040_v20 }
 0x9ea   :  { %v5616_v0 = vpop.f32.mrf.mxu0  ;;  %5635 = vmatpush3.msra.mxu1 %v3040_v20 }
 0x9eb   :  { %v6841_v29 = vadd.f32 %v5616_v0, %v6835_v24  ;;  %5636 = vmatprep.subr.mxu1 %v3035_v27 }
 0x9ec   :  { %v3044_v10 = vpop.f32.mrf.mxu0  ;;  %5637 = vmatpush3.msra.mxu1 %v3035_v27 }
 0x9ed   :  { %v6845_v45 = vadd.f32 %v6835_v24, %v3044_v10  ;;  %5638 = vmatprep.subr.mxu1 %v3030_v33 }
 0x9ee   :  { %v5619_v32 = vpop.f32.mrf.mxu0  ;;  %5639 = vmatpush3.msra.mxu1 %v3030_v33 }
 0x9ef   :  { %v6848_v54 = vadd.f32 %v5619_v32, %v6835_v24  ;;  %5640 = vmatprep.subr.mxu1 %v3025_v34 }
 0x9f0   :  { %5641 = vmatpush3.msra.mxu1 %v3025_v34  ;;  %v6853_v48 = vpop.f32.mrf.mxu0 }
 0x9f1   :  { %5662 = vmatprep.subr.mxu1 %v6848_v54 }
 0xa98   :  { %v5630_v25 = vpop.f32.mrf.mxu1 }
 0xa99   :  { %v3173_v41 = vmul.f32 0.35355338, %v5630_v25 }
 0xa9a   :  { %v3153_v42 = vpop.f32.mrf.mxu1 }
 0xa9b   :  { %v3172_v43 = vmul.f32 0.35355338, %v3153_v42  ;;  %v3179_v30 = vsel %vm1031_vm2, %v3173_v41, -inf }
 0xa9c   :  { %3180 = vmax.xlane.f32.xlu1 %v3179_v30  ;;  %v5633_v49 = vpop.f32.mrf.mxu1 }
 0xa9d   :  { %v3175_v50 = vmul.f32 0.35355338, %v5633_v49  ;;  %v3176_v63 = vsel %vm1031_vm2, %v3172_v43, -inf }
 0xa9e   :  { %3177 = vmax.xlane.f32.xlu0 %v3176_v63  ;;  %v3163_v53 = vpop.f32.mrf.mxu1 }
 0xa9f   :  { %v3174_v55 = vmul.f32 0.35355338, %v3163_v53  ;;  %v3185_v56 = vsel %vm1031_vm2, %v3175_v50, -inf }
 0xaa0   :  { %v5658_v57 = vpop.f32.mrf.mxu0  ;;  %3186 = vmax.xlane.f32.xlu1 %v3185_v56 }
 0xaa1   :  { %v3427_v60 = vmul.f32 0.35355338, %v5658_v57  ;;  %v3182_v37 = vsel %vm1031_vm2, %v3174_v55, -inf }
 0xaa2   :  { %v3407_v35 = vpop.f32.mrf.mxu0  ;;  %3183 = vmax.xlane.f32.xlu0 %v3182_v37 }
 0xaa3   :  { %v3426_v4 = vmul.f32 0.35355338, %v3407_v35  ;;  %v3433_v46 = vsel %vm1031_vm2, %v3427_v60, -inf }
 0xaa4   :  { %v5661_v14 = vpop.f32.mrf.mxu0  ;;  %3434 = vmax.xlane.f32.xlu1 %v3433_v46 }
 0xaa5   :  { %v3429_v36 = vmul.f32 0.35355338, %v5661_v14  ;;  %v3430_v5 = vsel %vm1031_vm2, %v3426_v4, -inf }
 0xaa6   :  { %v3417_v6 = vpop.f32.mrf.mxu0  ;;  %3431 = vmax.xlane.f32.xlu0 %v3430_v5 }
 0xaa7   :  { %v3428_v38 = vmul.f32 0.35355338, %v3417_v6  ;;  %v3439_v47 = vsel %vm1031_vm2, %v3429_v36, -inf }
 0xaa8   :  { %3440 = vmax.xlane.f32.xlu1 %v3439_v47  ;;  %v5011_v47 = vld [vmem:[%s7214_s8 + $0x8] sm:$0xff] }
 0xaa9   :  { %v3436_v7 = vsel %vm1031_vm2, %v3428_v38, -inf  ;;  %5676 = vmatprep.subr.mxu0 %v5011_v47 }
 0xaaa   :  { %3437 = vmax.xlane.f32.xlu0 %v3436_v7  ;;  %5677 = vmatpush3.msra.mxu0 %v5011_v47 }
 0xb25   :  { %v3181_v26 = vpop.xlane.xlu1 %3180 }
 0xb26   :  { %v3189_v39 = vsub.f32 %v3173_v41, %v3181_v26 }
 0xb27   :  { %v3178_v13 = vpop.xlane.xlu0 %3177 }
 0xb28   :  { %v3194_v16 = vmul.f32 1.442695, %v3189_v39  ;;  %v3188_v17 = vsub.f32 %v3172_v43, %v3178_v13 }
 0xb29   :  { %v3187_v21 = vpop.xlane.xlu1 %3186 }
 0xb2a   :  { %5865 = vpow2.f32 %v3194_v16  ;;  %v3192_v22 = vmul.f32 1.442695, %v3188_v17  ;;  %v3191_v23 = vsub.f32 %v3175_v50, %v3187_v21 }
 0xb2b   :  { %v3184_v3 = vpop.xlane.xlu0 %3183 }
 0xb2c   :  { %5867 = vpow2.f32 %v3192_v22  ;;  %v3198_v11 = vmul.f32 1.442695, %v3191_v23  ;;  %v3190_v20 = vsub.f32 %v3174_v55, %v3184_v3 }
 0xb2d   :  { %v3435_v52 = vpop.xlane.xlu1 %3434 }
 0xb2e   :  { %5869 = vpow2.f32 %v3198_v11  ;;  %v3196_v27 = vmul.f32 1.442695, %v3190_v20  ;;  %v3443_v0 = vsub.f32 %v3427_v60, %v3435_v52 }
 0xb2f   :  { %v3432_v33 = vpop.xlane.xlu0 %3431 }
 0xb30   :  { %5871 = vpow2.f32 %v3196_v27  ;;  %v3448_v10 = vmul.f32 1.442695, %v3443_v0  ;;  %v3442_v34 = vsub.f32 %v3426_v4, %v3432_v33  ;;  %v3055_v0 = vadd.f32 %v6835_v24, %v6853_v48  ;;  %v2714_v24 = vld [vmem:[%s7214_s8] sm:$0xff] }
 0xb31   :  { %v3441_v32 = vpop.xlane.xlu1 %3440 }
 0xb32   :  { %5873 = vpow2.f32 %v3448_v10  ;;  %v3446_v25 = vmul.f32 1.442695, %v3442_v34  ;;  %v3445_v41 = vsub.f32 %v3429_v36, %v3441_v32 }
 0xb33   :  { %v3438_v42 = vpop.xlane.xlu0 %3437 }
 0xb34   :  { %5875 = vpow2.f32 %v3446_v25  ;;  %v3452_v43 = vmul.f32 1.442695, %v3445_v41  ;;  %v3444_v30 = vsub.f32 %v3428_v38, %v3438_v42 }
 0xb36   :  { %5877 = vpow2.f32 %v3452_v43  ;;  %v3450_v49 = vmul.f32 1.442695, %v3444_v30 }
 0xb37   :  { %v5866_v50 = vpop.eup %5865 }
 0xb38   :  { %5879 = vpow2.f32 %v3450_v49  ;;  %v3203_v63 = vsel %vm1031_vm2, %v5866_v50, 0.0 }
 0xb39   :  { %v5868_v53 = vpop.eup %5867  ;;  %3204 = vadd.xlane.f32.xlu1 %v3203_v63  ;;  %v5028_v63 = vld [vmem:[%s7215_s14] ss:$0 sm:$0xff] }
 0xb3a   :  { %v3200_v55 = vsel %vm1031_vm2, %v5868_v53, 0.0 }
 0xb3b   :  { %v5870_v56 = vpop.eup %5869  ;;  %3201 = vadd.xlane.f32.xlu0 %v3200_v55 }
 0xb3c   :  { %v3209_v57 = vsel %vm1031_vm2, %v5870_v56, 0.0 }
 0xb3d   :  { %v5872_v60 = vpop.eup %5871  ;;  %3210 = vadd.xlane.f32.xlu1 %v3209_v57 }
 0xb3e   :  { %v3206_v37 = vsel %vm1031_vm2, %v5872_v60, 0.0 }
 0xb3f   :  { %v5874_v35 = vpop.eup %5873  ;;  %3207 = vadd.xlane.f32.xlu0 %v3206_v37 }
 0xb40   :  { %v3457_v4 = vsel %vm1031_vm2, %v5874_v35, 0.0 }
 0xb41   :  { %v5876_v46 = vpop.eup %5875  ;;  %3458 = vadd.xlane.f32.xlu1 %v3457_v4 }
 0xb42   :  { %v3454_v14 = vsel %vm1031_vm2, %v5876_v46, 0.0 }
 0xb43   :  { %v5878_v36 = vpop.eup %5877  ;;  %3455 = vadd.xlane.f32.xlu0 %v3454_v14 }
 0xb44   :  { %v3463_v5 = vsel %vm1031_vm2, %v5878_v36, 0.0 }
 0xb45   :  { %v5880_v6 = vpop.eup %5879  ;;  %3464 = vadd.xlane.f32.xlu1 %v3463_v5 }
 0xb46   :  { %v3460_v38 = vsel %vm1031_vm2, %v5880_v6, 0.0 }
 0xb47   :  { %3461 = vadd.xlane.f32.xlu0 %v3460_v38 }
 0xbc2   :  { %v3205_v7 = vpop.xlane.xlu1 %3204 }
 0xbc3   :  { %5881 = vrcp.f32 %v3205_v7 }
 0xbc4   :  { %v3202_v26 = vpop.xlane.xlu0 %3201 }
 0xbc5   :  { %5883 = vrcp.f32 %v3202_v26 }
 0xbc6   :  { %v3211_v39 = vpop.xlane.xlu1 %3210 }
 0xbc7   :  { %5885 = vrcp.f32 %v3211_v39 }
 0xbc8   :  { %v3208_v13 = vpop.xlane.xlu0 %3207 }
 0xbc9   :  { %5887 = vrcp.f32 %v3208_v13 }
 0xbca   :  { %v3459_v16 = vpop.xlane.xlu1 %3458 }
 0xbcb   :  { %5889 = vrcp.f32 %v3459_v16 }
 0xbcc   :  { %v3456_v17 = vpop.xlane.xlu0 %3455 }
 0xbcd   :  { %5891 = vrcp.f32 %v3456_v17 }
 0xbce   :  { %v3465_v21 = vpop.xlane.xlu1 %3464 }
 0xbcf   :  { %5893 = vrcp.f32 %v3465_v21 }
 0xbd0   :  { %v3462_v22 = vpop.xlane.xlu0 %3461  ;;  %v5882_v23 = vpop.eup %5881 }
 0xbd1   :  { %5895 = vrcp.f32 %v3462_v22  ;;  %v3217_v20 = vmul.f32 %v5882_v23, %v5866_v50 }
 0xbd2   :  { %v5884_v3 = vpop.eup %5883 }
 0xbd3   :  { %v3216_v11 = vmul.f32 %v5884_v3, %v5868_v53 }
 0xbd4   :  { %v5886_v52 = vpop.eup %5885 }
 0xbd5   :  { %5642 = vmatprep.mubr.msk.f32.mxu1 %vm1031_vm2, %v3216_v11  ;;  %v3219_v10 = vmul.f32 %v5886_v52, %v5870_v56 }
 0xbd6   :  { %v5888_v27 = vpop.eup %5887  ;;  %5643 = vmatmul.mubr.msk.f32.vlgmr.msra.gmra.mxu1 %vm1031_vm2, %v3217_v20 }
 0xbd7   :  { %5663 = vmatpush3.msra.mxu1 %v6848_v54  ;;  %v3218_v33 = vmul.f32 %v5888_v27, %v5872_v60 }
 0xbd8   :  { %5664 = vmatprep.subr.mxu1 %v3055_v0  ;;  %v5890_v34 = vpop.eup %5889 }
 0xbd9   :  { %5665 = vmatpush3.msra.mxu1 %v3055_v0  ;;  %5645 = vmatprep.mubr.msk.f32.mxu1 %vm1031_vm2, %v3218_v33  ;;  %v3471_v48 = vmul.f32 %v5890_v34, %v5874_v35 }
 0xbda   :  { %v5892_v32 = vpop.eup %5891  ;;  %5666 = vmatprep.subr.mxu1 %v6841_v29  ;;  %5646 = vmatmul.mubr.msk.f32.gmra.mxu1 %vm1031_vm2, %v3219_v10 }
 0xbdb   :  { %5667 = vmatpush3.msra.mxu1 %v6841_v29  ;;  %v3470_v25 = vmul.f32 %v5892_v32, %v5876_v46 }
 0xbdc   :  { %5668 = vmatprep.subr.mxu1 %v6845_v45  ;;  %v5894_v54 = vpop.eup %5893 }
 0xbdd   :  { %5669 = vmatpush3.msra.mxu1 %v6845_v45  ;;  %5670 = vmatprep.mubr.msk.f32.mxu1 %vm1031_vm2, %v3470_v25  ;;  %v3473_v43 = vmul.f32 %v5894_v54, %v5878_v36 }
 0xbde   :  { %v5896_v41 = vpop.eup %5895  ;;  %5671 = vmatmul.mubr.msk.f32.vlgmr.msra.gmra.mxu1 %vm1031_vm2, %v3471_v48  ;;  %5690 = vmatprep.subr.mxu1 %v2714_v24 }
 0xbdf   :  { %v3472_v42 = vmul.f32 %v5896_v41, %v5880_v6  ;;  %5691 = vmatpush3.msra.mxu1 %v2714_v24 }
 0xbe1   :  { %5673 = vmatprep.mubr.msk.f32.mxu1 %vm1031_vm2, %v3472_v42 }
 0xbe2   :  { %5674 = vmatmul.mubr.msk.f32.gmra.mxu1 %vm1031_vm2, %v3473_v43 }
 0xbe3   :  { %5692 = vmatprep.mubr.msk.f32.mxu1 %vm171_vm0, %v6811_v44 }
 0xbe6   :  { %5693 = vmatmul.mubr.msk.f32.vlgmr.msra.gmra.mxu1 %vm171_vm0, %v6809_v61 }
 0xbe7   :  { %5695 = vmatprep.mubr.msk.f32.mxu1 %vm171_vm0, %v6815_v62 }
 0xbea   :  { %5696 = vmatmul.mubr.msk.f32.gmra.mxu1 %vm171_vm0, %v6813_v15 }
 0xbeb   :  { %5698 = vmatprep.mubr.msk.f32.mxu1 %vm171_vm0, %v6819_v1 }
 0xbee   :  { %5699 = vmatmul.mubr.msk.f32.gmra.mxu1 %vm171_vm0, %v6817_v9 }
 0xbef   :  { %5701 = vmatprep.mubr.msk.f32.mxu1 %vm171_vm0, %v6823_v2 }
 0xbf2   :  { %5702 = vmatmul.mubr.msk.f32.gmra.mxu1 %vm171_vm0, %v6821_v12 }
 0xc96   :  { %v5644_v44 = vpop.f32.mrf.mxu1 }
 0xc98   :  { %v3298_v61 = vpop.f32.mrf.mxu1 }
 0xc99   :  { %5678 = vmatprep.mubr.msk.f32.mxu0 %vm171_vm0, %v3298_v61 }
 0xc9a   :  { %v5647_v62 = vpop.f32.mrf.mxu1  ;;  %5679 = vmatmul.mubr.msk.f32.vlgmr.msra.gmra.mxu0 %vm171_vm0, %v5644_v44 }
 0xc9c   :  { %v3308_v15 = vpop.f32.mrf.mxu1 }
 0xc9d   :  { %5681 = vmatprep.mubr.msk.f32.mxu0 %vm171_vm0, %v3308_v15 }
 0xc9e   :  { %v5672_v1 = vpop.f32.mrf.mxu1  ;;  %5682 = vmatmul.mubr.msk.f32.gmra.mxu0 %vm171_vm0, %v5647_v62 }
 0xca0   :  { %v3552_v9 = vpop.f32.mrf.mxu1 }
 0xca1   :  { %5684 = vmatprep.mubr.msk.f32.mxu0 %vm171_vm0, %v3552_v9 }
 0xca2   :  { %v5675_v2 = vpop.f32.mrf.mxu1  ;;  %5685 = vmatmul.mubr.msk.f32.gmra.mxu0 %vm171_vm0, %v5672_v1 }
 0xca4   :  { %v3562_v12 = vpop.f32.mrf.mxu1 }
 0xca5   :  { %5687 = vmatprep.mubr.msk.f32.mxu0 %vm171_vm0, %v3562_v12 }
 0xca6   :  { %5688 = vmatmul.mubr.msk.f32.gmra.mxu0 %vm171_vm0, %v5675_v2  ;;  %v5694_v29 = vpop.f32.mrf.mxu1 }
 0xca8   :  { %v3792_v45 = vpop.f32.mrf.mxu1 }
 0xcaa   :  { %v5697_v30 = vpop.f32.mrf.mxu1 }
 0xcac   :  { %v3802_v49 = vpop.f32.mrf.mxu1 }
 0xcae   :  { %v5700_v55 = vpop.f32.mrf.mxu1 }
 0xcb0   :  { %v3812_v14 = vpop.f32.mrf.mxu1 }
 0xcb2   :  { %v5703_v17 = vpop.f32.mrf.mxu1 }
 0xcb4   :  { %v3822_v0 = vpop.f32.mrf.mxu1 }
 0xd5a   :  { %v5680_v50 = vpop.f32.mrf.mxu0 }
 0xd5b   :  { %v3798_v53 = vadd.f32 %v5694_v29, %v5680_v50 }
 0xd5c   :  { %v3663_v56 = vpop.f32.mrf.mxu0 }
 0xd5d   :  { %v3839_v57 = vadd.f32 %v5028_v63, %v3798_v53  ;;  %v3793_v60 = vadd.f32 %v3792_v45, %v3663_v56 }
 0xd5e   :  { %v5683_v37 = vpop.f32.mrf.mxu0 }
 0xd5f   :  { %v3838_v35 = vadd.f32 %v5028_v63, %v3793_v60  ;;  %v3808_v4 = vadd.f32 %v5697_v30, %v5683_v37  ;;  %v3847_v46 = vadd.f32 %v3839_v57, %v6568_v31 }
 0xd60   :  { %v3673_v36 = vpop.f32.mrf.mxu0 }
 0xd61   :  { %v3841_v5 = vadd.f32 %v5028_v63, %v3808_v4  ;;  %v3803_v6 = vadd.f32 %v3802_v49, %v3673_v36  ;;  %v3859_v38 = vsel %vm744_vm1, %v3847_v46, 0.0  ;;  %v3846_v47 = vadd.f32 %v3838_v35, %v6565_v40 }
 0xd62   :  { %v5686_v7 = vpop.f32.mrf.mxu0  ;;  %3860 = vadd.xlane.f32.xlu1 %v3859_v38 }
 0xd63   :  { %v3840_v26 = vadd.f32 %v5028_v63, %v3803_v6  ;;  %v3818_v39 = vadd.f32 %v5700_v55, %v5686_v7  ;;  %v3856_v13 = vsel %vm744_vm1, %v3846_v47, 0.0  ;;  %v3849_v16 = vadd.f32 %v3841_v5, %v6583_v58 }
 0xd64   :  { %v3683_v21 = vpop.f32.mrf.mxu0  ;;  %3857 = vadd.xlane.f32.xlu0 %v3856_v13 }
 0xd65   :  { %v3843_v31 = vadd.f32 %v5028_v63, %v3818_v39  ;;  %v3813_v22 = vadd.f32 %v3812_v14, %v3683_v21  ;;  %v3865_v23 = vsel %vm744_vm1, %v3849_v16, 0.0  ;;  %v3848_v3 = vadd.f32 %v3840_v26, %v6580_v8  ;;  %v3989_v21 = vld [vmem:[%s7216_s19] sm:$0xff] }
 0xd66   :  { %3866 = vadd.xlane.f32.xlu1 %v3865_v23  ;;  %v5689_v11 = vpop.f32.mrf.mxu0 }
 0xd67   :  { %v3842_v40 = vadd.f32 %v5028_v63, %v3813_v22  ;;  %v3828_v20 = vadd.f32 %v5703_v17, %v5689_v11  ;;  %v3862_v52 = vsel %vm744_vm1, %v3848_v3, 0.0  ;;  %v3851_v27 = vadd.f32 %v3843_v31, %v6597_v19  ;;  %v3990_v17 = vld [vmem:[%s7216_s19 + $0x8] sm:$0xff]  ;;  %v4138_v31 = vld [vmem:[%s7217_s30 + $0x18] sm:$0xff]  ;;  %v4137_v22 = vld [vmem:[%s7217_s30 + $0x10] sm:$0xff] }
 0xd68   :  { %3863 = vadd.xlane.f32.xlu0 %v3862_v52  ;;  %v3693_v58 = vpop.f32.mrf.mxu0  ;;  %5704 = vmatprep.subr.mxu0 %v3990_v17 }
 0xd69   :  { %v3845_v33 = vadd.f32 %v5028_v63, %v3828_v20  ;;  %v3823_v10 = vadd.f32 %v3822_v0, %v3693_v58  ;;  %v3871_v34 = vsel %vm744_vm1, %v3851_v27, 0.0  ;;  %v3850_v32 = vadd.f32 %v3842_v40, %v6594_v51  ;;  %5705 = vmatpush3.msra.mxu0 %v3990_v17  ;;  %5720 = vmatprep.subr.mxu1 %v4138_v31  ;;  %v4135_v17 = vld [vmem:[%s7217_s30] sm:$0xff] }
 0xd6a   :  { %3872 = vadd.xlane.f32.xlu1 %v3871_v34  ;;  %5706 = vmatprep.subr.mxu0 %v3989_v21 }
 0xd6b   :  { %v3844_v25 = vadd.f32 %v5028_v63, %v3823_v10  ;;  %v3868_v8 = vsel %vm744_vm1, %v3850_v32, 0.0  ;;  %v3853_v24 = vadd.f32 %v3845_v33, %v6609_v28  ;;  %5707 = vmatpush3.msra.mxu0 %v3989_v21  ;;  %5721 = vmatpush3.msra.mxu1 %v4138_v31  ;;  %v5031_v21 = vld [vmem:[%s7220_s15] ss:$0 sm:$0xff] }
 0xd6c   :  { %3869 = vadd.xlane.f32.xlu0 %v3868_v8  ;;  %5722 = vmatprep.subr.mxu1 %v4137_v22 }
 0xd6d   :  { %v3877_v48 = vsel %vm744_vm1, %v3853_v24, 0.0  ;;  %v3852_v19 = vadd.f32 %v3844_v25, %v6607_v59  ;;  %5723 = vmatpush3.msra.mxu1 %v4137_v22 }
 0xd6e   :  { %3878 = vadd.xlane.f32.xlu1 %v3877_v48 }
 0xd6f   :  { %v3874_v54 = vsel %vm744_vm1, %v3852_v19, 0.0 }
 0xd70   :  { %3875 = vadd.xlane.f32.xlu0 %v3874_v54 }
 0xdeb   :  { %v3861_v41 = vpop.xlane.xlu1 %3860 }
 0xdec   :  { %v3882_v42 = vmul.f32 0.0625, %v3861_v41 }
 0xded   :  { %v3858_v43 = vpop.xlane.xlu0 %3857 }
 0xdee   :  { %v6927_v44 = vsub.f32 %v3847_v46, %v3882_v42  ;;  %v3881_v51 = vmul.f32 0.0625, %v3858_v43 }
 0xdef   :  { %v3867_v61 = vpop.xlane.xlu1 %3866 }
 0xdf0   :  { %v6929_v62 = vsub.f32 %v3846_v47, %v3881_v51  ;;  %v3884_v15 = vmul.f32 0.0625, %v3867_v61  ;;  %v3898_v28 = vmul.f32 %v6927_v44, %v6927_v44 }
 0xdf1   :  { %v3864_v1 = vpop.xlane.xlu0 %3863 }
 0xdf2   :  { %v6933_v9 = vsub.f32 %v3849_v16, %v3884_v15  ;;  %v3883_v59 = vmul.f32 0.0625, %v3864_v1  ;;  %v3908_v2 = vsel %vm744_vm1, %v3898_v28, 0.0  ;;  %v3897_v12 = vmul.f32 %v6929_v62, %v6929_v62  ;;  %v5029_v28 = vld [vmem:[%s7218_s12] ss:$0 sm:$0xff] }
 0xdf3   :  { %v3873_v29 = vpop.xlane.xlu1 %3872  ;;  %3909 = vadd.xlane.f32.xlu1 %v3908_v2 }
 0xdf4   :  { %v6938_v45 = vsub.f32 %v3848_v3, %v3883_v59  ;;  %v3886_v30 = vmul.f32 0.0625, %v3873_v29  ;;  %v3905_v49 = vsel %vm744_vm1, %v3897_v12, 0.0  ;;  %v3900_v50 = vmul.f32 %v6933_v9, %v6933_v9 }
 0xdf5   :  { %v3870_v63 = vpop.xlane.xlu0 %3869  ;;  %3906 = vadd.xlane.f32.xlu0 %v3905_v49 }
 0xdf6   :  { %v6943_v53 = vsub.f32 %v3851_v27, %v3886_v30  ;;  %v3885_v55 = vmul.f32 0.0625, %v3870_v63  ;;  %v3914_v56 = vsel %vm744_vm1, %v3900_v50, 0.0  ;;  %v3899_v57 = vmul.f32 %v6938_v45, %v6938_v45  ;;  %v5030_v30 = vld [vmem:[%s7219_s20] ss:$0 sm:$0xff] }
 0xdf7   :  { %3915 = vadd.xlane.f32.xlu1 %v3914_v56  ;;  %v3879_v60 = vpop.xlane.xlu1 %3878 }
 0xdf8   :  { %v6948_v37 = vsub.f32 %v3850_v32, %v3885_v55  ;;  %v3888_v35 = vmul.f32 0.0625, %v3879_v60  ;;  %v3911_v4 = vsel %vm744_vm1, %v3899_v57, 0.0  ;;  %v3902_v46 = vmul.f32 %v6943_v53, %v6943_v53 }
 0xdf9   :  { %3912 = vadd.xlane.f32.xlu0 %v3911_v4  ;;  %v3876_v14 = vpop.xlane.xlu0 %3875 }
 0xdfa   :  { %v6953_v36 = vsub.f32 %v3853_v24, %v3888_v35  ;;  %v3887_v5 = vmul.f32 0.0625, %v3876_v14  ;;  %v3920_v6 = vsel %vm744_vm1, %v3902_v46, 0.0  ;;  %v3901_v38 = vmul.f32 %v6948_v37, %v6948_v37 }
 0xdfb   :  { %3921 = vadd.xlane.f32.xlu1 %v3920_v6 }
 0xdfc   :  { %v6958_v47 = vsub.f32 %v3852_v19, %v3887_v5  ;;  %v3917_v7 = vsel %vm744_vm1, %v3901_v38, 0.0  ;;  %v3904_v26 = vmul.f32 %v6953_v36, %v6953_v36 }
 0xdfd   :  { %3918 = vadd.xlane.f32.xlu0 %v3917_v7 }
 0xdfe   :  { %v3926_v39 = vsel %vm744_vm1, %v3904_v26, 0.0  ;;  %v3903_v13 = vmul.f32 %v6958_v47, %v6958_v47 }
 0xdff   :  { %3927 = vadd.xlane.f32.xlu1 %v3926_v39 }
 0xe00   :  { %v3923_v16 = vsel %vm744_vm1, %v3903_v13, 0.0 }
 0xe01   :  { %3924 = vadd.xlane.f32.xlu0 %v3923_v16 }
 0xe7c   :  { %v3910_v23 = vpop.xlane.xlu1 %3909 }
 0xe7d   :  { %v3930_v3 = vmul.f32 0.0625, %v3910_v23 }
 0xe7e   :  { %v3907_v11 = vpop.xlane.xlu0 %3906 }
 0xe7f   :  { %v3938_v40 = vadd.f32 1e-05, %v3930_v3  ;;  %v3929_v20 = vmul.f32 0.0625, %v3907_v11 }
 0xe80   :  { %v3916_v52 = vpop.xlane.xlu1 %3915 }
 0xe81   :  { %5897 = vrsqrt.f32 %v3938_v40  ;;  %v3937_v27 = vadd.f32 1e-05, %v3929_v20  ;;  %v3932_v0 = vmul.f32 0.0625, %v3916_v52 }
 0xe82   :  { %v3913_v58 = vpop.xlane.xlu0 %3912 }
 0xe83   :  { %5899 = vrsqrt.f32 %v3937_v27  ;;  %v3940_v33 = vadd.f32 1e-05, %v3932_v0  ;;  %v3931_v10 = vmul.f32 0.0625, %v3913_v58 }
 0xe84   :  { %v3922_v34 = vpop.xlane.xlu1 %3921 }
 0xe85   :  { %5901 = vrsqrt.f32 %v3940_v33  ;;  %v3939_v32 = vadd.f32 1e-05, %v3931_v10  ;;  %v3934_v25 = vmul.f32 0.0625, %v3922_v34 }
 0xe86   :  { %v3919_v8 = vpop.xlane.xlu0 %3918 }
 0xe87   :  { %5903 = vrsqrt.f32 %v3939_v32  ;;  %v3942_v24 = vadd.f32 1e-05, %v3934_v25  ;;  %v3933_v48 = vmul.f32 0.0625, %v3919_v8 }
 0xe88   :  { %v3928_v19 = vpop.xlane.xlu1 %3927 }
 0xe89   :  { %5905 = vrsqrt.f32 %v3942_v24  ;;  %v3941_v54 = vadd.f32 1e-05, %v3933_v48  ;;  %v3936_v41 = vmul.f32 0.0625, %v3928_v19 }
 0xe8a   :  { %v3925_v42 = vpop.xlane.xlu0 %3924 }
 0xe8b   :  { %5907 = vrsqrt.f32 %v3941_v54  ;;  %v3944_v43 = vadd.f32 1e-05, %v3936_v41  ;;  %v3935_v51 = vmul.f32 0.0625, %v3925_v42 }
 0xe8d   :  { %5909 = vrsqrt.f32 %v3944_v43  ;;  %v3943_v61 = vadd.f32 1e-05, %v3935_v51  ;;  %v5040_v51 = vld [vmem:[%s7221_s16] ss:$0 sm:$0xff] }
 0xe8e   :  { %v5898_v15 = vpop.eup %5897 }
 0xe8f   :  { %v3954_v1 = vmul.f32 %v5898_v15, %v6927_v44  ;;  %5911 = vrsqrt.f32 %v3943_v61 }
 0xe90   :  { %v5900_v59 = vpop.eup %5899 }
 0xe91   :  { %v3953_v2 = vmul.f32 %v5900_v59, %v6929_v62  ;;  %v3968_v29 = vmul.f32 %v5029_v28, %v3954_v1 }
 0xe92   :  { %v5902_v12 = vpop.eup %5901 }
 0xe93   :  { %v3967_v49 = vmul.f32 %v5029_v28, %v3953_v2  ;;  %v3956_v50 = vmul.f32 %v5902_v12, %v6933_v9  ;;  %v6979_v60 = vadd.f32 %v5030_v30, %v3968_v29 }
 0xe94   :  { %v5904_v63 = vpop.eup %5903 }
 0xe95   :  { %v6976_v55 = vadd.f32 %v5030_v30, %v3967_v49  ;;  %v3955_v56 = vmul.f32 %v5904_v63, %v6938_v45  ;;  %v3970_v35 = vmul.f32 %v5029_v28, %v3956_v50 }
 0xe96   :  { %v5906_v57 = vpop.eup %5905 }
 0xe97   :  { %5708 = vmatprep.mubr.msk.f32.mxu0 %vm744_vm1, %v6976_v55  ;;  %v3969_v44 = vmul.f32 %v5029_v28, %v3955_v56  ;;  %v3958_v62 = vmul.f32 %v5906_v57, %v6943_v53  ;;  %v6989_v45 = vadd.f32 %v5030_v30, %v3970_v35 }
 0xe98   :  { %v5908_v4 = vpop.eup %5907  ;;  %5709 = vmatmul.mubr.msk.f32.vlgmr.msra.gmra.mxu0 %vm744_vm1, %v6979_v60 }
 0xe99   :  { %v6986_v9 = vadd.f32 %v5030_v30, %v3969_v44  ;;  %v3957_v46 = vmul.f32 %v5908_v4, %v6948_v37  ;;  %v3972_v5 = vmul.f32 %v5029_v28, %v3958_v62 }
 0xe9a   :  { %v5910_v14 = vpop.eup %5909 }
 0xe9b   :  { %5711 = vmatprep.mubr.msk.f32.mxu0 %vm744_vm1, %v6986_v9  ;;  %v3971_v6 = vmul.f32 %v5029_v28, %v3957_v46  ;;  %v3960_v38 = vmul.f32 %v5910_v14, %v6953_v36  ;;  %v6999_v26 = vadd.f32 %v5030_v30, %v3972_v5 }
 0xe9c   :  { %v5912_v53 = vpop.eup %5911  ;;  %5712 = vmatmul.mubr.msk.f32.gmra.mxu0 %vm744_vm1, %v6989_v45 }
 0xe9d   :  { %v6996_v7 = vadd.f32 %v5030_v30, %v3971_v6  ;;  %v3959_v37 = vmul.f32 %v5912_v53, %v6958_v47  ;;  %v3974_v39 = vmul.f32 %v5029_v28, %v3960_v38  ;;  %v4136_v47 = vld [vmem:[%s7217_s30 + $0x8] sm:$0xff] }
 0xe9e   :  { %5724 = vmatprep.subr.mxu1 %v4136_v47 }
 0xe9f   :  { %5714 = vmatprep.mubr.msk.f32.mxu0 %vm744_vm1, %v6996_v7  ;;  %v3973_v13 = vmul.f32 %v5029_v28, %v3959_v37  ;;  %v7007_v16 = vadd.f32 %v5030_v30, %v3974_v39  ;;  %5725 = vmatpush3.msra.mxu1 %v4136_v47 }
 0xea0   :  { %5715 = vmatmul.mubr.msk.f32.gmra.mxu0 %vm744_vm1, %v6999_v26  ;;  %5726 = vmatprep.subr.mxu1 %v4135_v17 }
 0xea1   :  { %v7005_v36 = vadd.f32 %v5030_v30, %v3973_v13  ;;  %5727 = vmatpush3.msra.mxu1 %v4135_v17 }
 0xea3   :  { %5717 = vmatprep.mubr.msk.f32.mxu0 %vm744_vm1, %v7005_v36 }
 0xea4   :  { %5718 = vmatmul.mubr.msk.f32.gmra.mxu0 %vm744_vm1, %v7007_v16 }
 0xea5   :  { %4509 = vmatprep.mubr.f32.mxu0 %v5990_v18 }
 0xf58   :  { %v5710_v31 = vpop.f32.mrf.mxu0 }
 0xf59   :  { %v4094_v22 = vadd.f32 %v5710_v31, %v5031_v21 }
 0xf5a   :  { %v4088_v23 = vpop.f32.mrf.mxu0 }
 0xf5b   :  { %v4089_v3 = vadd.f32 %v5031_v21, %v4088_v23  ;;  %v4128_v20 = vmax.f32 %v4094_v22, 0.0 }
 0xf5c   :  { %v5713_v11 = vpop.f32.mrf.mxu0 }
 0xf5d   :  { %v4127_v40 = vmax.f32 %v4089_v3, 0.0  ;;  %v4104_v52 = vadd.f32 %v5713_v11, %v5031_v21 }
 0xf5e   :  { %v4098_v27 = vpop.f32.mrf.mxu0 }
 0xf5f   :  { %v4099_v0 = vadd.f32 %v5031_v21, %v4098_v27  ;;  %5728 = vmatprep.mubr.msk.f32.mxu1 %vm1031_vm2, %v4127_v40  ;;  %v4130_v10 = vmax.f32 %v4104_v52, 0.0 }
 0xf60   :  { %v5716_v58 = vpop.f32.mrf.mxu0  ;;  %5729 = vmatmul.mubr.msk.f32.vlgmr.msra.gmra.mxu1 %vm1031_vm2, %v4128_v20 }
 0xf61   :  { %v4129_v33 = vmax.f32 %v4099_v0, 0.0  ;;  %v4114_v34 = vadd.f32 %v5716_v58, %v5031_v21 }
 0xf62   :  { %v4108_v32 = vpop.f32.mrf.mxu0 }
 0xf63   :  { %v4109_v25 = vadd.f32 %v5031_v21, %v4108_v32  ;;  %5731 = vmatprep.mubr.msk.f32.mxu1 %vm1031_vm2, %v4129_v33  ;;  %v4132_v48 = vmax.f32 %v4114_v34, 0.0 }
 0xf64   :  { %v5719_v8 = vpop.f32.mrf.mxu0  ;;  %5732 = vmatmul.mubr.msk.f32.gmra.mxu1 %vm1031_vm2, %v4130_v10 }
 0xf65   :  { %v4131_v24 = vmax.f32 %v4109_v25, 0.0  ;;  %v4124_v19 = vadd.f32 %v5719_v8, %v5031_v21 }
 0xf66   :  { %v4118_v54 = vpop.f32.mrf.mxu0 }
 0xf67   :  { %v4119_v41 = vadd.f32 %v5031_v21, %v4118_v54  ;;  %5734 = vmatprep.mubr.msk.f32.mxu1 %vm1031_vm2, %v4131_v24  ;;  %v4134_v43 = vmax.f32 %v4124_v19, 0.0 }
 0xf68   :  { %5735 = vmatmul.mubr.msk.f32.gmra.mxu1 %vm1031_vm2, %v4132_v48 }
 0xf69   :  { %v4133_v42 = vmax.f32 %v4119_v41, 0.0 }
 0xf6b   :  { %5737 = vmatprep.mubr.msk.f32.mxu1 %vm1031_vm2, %v4133_v42 }
 0xf6c   :  { %5738 = vmatmul.mubr.msk.f32.gmra.mxu1 %vm1031_vm2, %v4134_v43 }
 0xf6d   :  { %4654 = vmatprep.mubr.f32.mxu1 %v5990_v18 }
0x1020   :  { %v5730_v61 = vpop.f32.mrf.mxu1 }
0x1021   :  { %v4242_v15 = vadd.f32 %v5730_v61, %v5040_v51 }
0x1022   :  { %v4236_v28 = vpop.f32.mrf.mxu1 }
0x1023   :  { %v4237_v1 = vadd.f32 %v5040_v51, %v4236_v28  ;;  %v4276_v59 = vadd.f32 %v4242_v15, %v6979_v60 }
0x1024   :  { %v5733_v2 = vpop.f32.mrf.mxu1 }
0x1025   :  { %v4252_v12 = vadd.f32 %v5733_v2, %v5040_v51  ;;  %v4288_v29 = vsel %vm744_vm1, %v4276_v59, 0.0  ;;  %v4275_v30 = vadd.f32 %v4237_v1, %v6976_v55 }
0x1026   :  { %4289 = vadd.xlane.f32.xlu1 %v4288_v29  ;;  %v4246_v49 = vpop.f32.mrf.mxu1 }
0x1027   :  { %v4247_v50 = vadd.f32 %v5040_v51, %v4246_v49  ;;  %v4285_v63 = vsel %vm744_vm1, %v4275_v30, 0.0  ;;  %v4278_v56 = vadd.f32 %v4252_v12, %v6989_v45  ;;  %v4420_v49 = vld [vmem:[%s7222_s18 + $0x18] sm:$0xff] }
0x1028   :  { %4286 = vadd.xlane.f32.xlu0 %v4285_v63  ;;  %v5736_v57 = vpop.f32.mrf.mxu1  ;;  %v4418_v63 = vld [vmem:[%s7222_s18 + $0x8] sm:$0xff]  ;;  %4473 = vmatprep.subr.mxu0 %v4420_v49  ;;  %v4676_v49 = vld [vmem:[%s6186_s4 + $0x78] sm:$0xff] }
0x1029   :  { %v4262_v35 = vadd.f32 %v5736_v57, %v5040_v51  ;;  %v4294_v44 = vsel %vm744_vm1, %v4278_v56, 0.0  ;;  %v4277_v60 = vadd.f32 %v4247_v50, %v6986_v9  ;;  %v4419_v50 = vld [vmem:[%s7222_s18 + $0x10] sm:$0xff] }
0x102a   :  { %4295 = vadd.xlane.f32.xlu1 %v4294_v44  ;;  %v4256_v62 = vpop.f32.mrf.mxu1  ;;  %4474 = vmatpush1.msra.mxu0 %v4419_v50  ;;  %v4675_v50 = vld [vmem:[%s6186_s4 + $0x70] sm:$0xff] }
0x102b   :  { %v4257_v4 = vadd.f32 %v5040_v51, %v4256_v62  ;;  %v4291_v46 = vsel %vm744_vm1, %v4277_v60, 0.0  ;;  %v4280_v55 = vadd.f32 %v4262_v35, %v6999_v26  ;;  %4475 = vmatprep.subr.mxu0 %v4418_v63  ;;  %v4673_v63 = vld [vmem:[%s6186_s4 + $0x60] sm:$0xff] }
0x102c   :  { %4292 = vadd.xlane.f32.xlu0 %v4291_v46  ;;  %v5739_v14 = vpop.f32.mrf.mxu1 }
0x102d   :  { %v4272_v5 = vadd.f32 %v5739_v14, %v5040_v51  ;;  %v4300_v6 = vsel %vm744_vm1, %v4280_v55, 0.0  ;;  %v4279_v45 = vadd.f32 %v4257_v4, %v6996_v7 }
0x102e   :  { %4301 = vadd.xlane.f32.xlu1 %v4300_v6  ;;  %v4266_v38 = vpop.f32.mrf.mxu1 }
0x102f   :  { %v4267_v53 = vadd.f32 %v5040_v51, %v4266_v38  ;;  %v4297_v37 = vsel %vm744_vm1, %v4279_v45, 0.0  ;;  %v4282_v9 = vadd.f32 %v4272_v5, %v7007_v16 }
0x1030   :  { %4298 = vadd.xlane.f32.xlu0 %v4297_v37 }
0x1031   :  { %v4306_v39 = vsel %vm744_vm1, %v4282_v9, 0.0  ;;  %v4281_v13 = vadd.f32 %v4267_v53, %v7005_v36 }
0x1032   :  { %4307 = vadd.xlane.f32.xlu1 %v4306_v39 }
0x1033   :  { %v4303_v26 = vsel %vm744_vm1, %v4281_v13, 0.0 }
0x1034   :  { %4304 = vadd.xlane.f32.xlu0 %v4303_v26 }
0x10af   :  { %v4290_v47 = vpop.xlane.xlu1 %4289 }
0x10b0   :  { %v4310_v17 = vmul.f32 0.0625, %v4290_v47 }
0x10b1   :  { %v4287_v21 = vpop.xlane.xlu0 %4286 }
0x10b2   :  { %v7043_v7 = vsub.f32 %v4276_v59, %v4310_v17  ;;  %v4309_v31 = vmul.f32 0.0625, %v4287_v21 }
0x10b3   :  { %v4296_v22 = vpop.xlane.xlu1 %4295 }
0x10b4   :  { %v7045_v23 = vsub.f32 %v4275_v30, %v4309_v31  ;;  %v4312_v3 = vmul.f32 0.0625, %v4296_v22  ;;  %v4326_v16 = vmul.f32 %v7043_v7, %v7043_v7 }
0x10b5   :  { %v4293_v11 = vpop.xlane.xlu0 %4292 }
0x10b6   :  { %v7049_v40 = vsub.f32 %v4278_v56, %v4312_v3  ;;  %v4311_v36 = vmul.f32 0.0625, %v4293_v11  ;;  %v4336_v20 = vsel %vm744_vm1, %v4326_v16, 0.0  ;;  %v4325_v52 = vmul.f32 %v7045_v23, %v7045_v23  ;;  %v4417_v56 = vld [vmem:[%s7222_s18] sm:$0xff] }
0x10b7   :  { %v4302_v27 = vpop.xlane.xlu1 %4301  ;;  %4337 = vadd.xlane.f32.xlu1 %v4336_v20  ;;  %4476 = vmatpush1.msra.mxu0 %v4417_v56  ;;  %v4672_v56 = vld [vmem:[%s6186_s4 + $0x58] sm:$0xff] }
0x10b8   :  { %v7054_v0 = vsub.f32 %v4277_v60, %v4311_v36  ;;  %v4314_v58 = vmul.f32 0.0625, %v4302_v27  ;;  %v4333_v33 = vsel %vm744_vm1, %v4325_v52, 0.0  ;;  %v4328_v10 = vmul.f32 %v7049_v40, %v7049_v40  ;;  %4691 = vmatprep.subr.mxu0 %v5990_v18  ;;  %v5049_v36 = vld [vmem:[%s7223_s22] ss:$0 sm:$0xff] }
0x10b9   :  { %4334 = vadd.xlane.f32.xlu0 %v4333_v33  ;;  %v4299_v34 = vpop.xlane.xlu0 %4298 }
0x10ba   :  { %v7059_v32 = vsub.f32 %v4280_v55, %v4314_v58  ;;  %v4313_v25 = vmul.f32 0.0625, %v4299_v34  ;;  %v4342_v8 = vsel %vm744_vm1, %v4328_v10, 0.0  ;;  %v4327_v24 = vmul.f32 %v7054_v0, %v7054_v0  ;;  %v5050_v58 = vld [vmem:[%s7224_s23] ss:$0 sm:$0xff] }
0x10bb   :  { %4343 = vadd.xlane.f32.xlu1 %v4342_v8  ;;  %v4308_v48 = vpop.xlane.xlu1 %4307 }
0x10bc   :  { %v7064_v19 = vsub.f32 %v4279_v45, %v4313_v25  ;;  %v4316_v54 = vmul.f32 0.0625, %v4308_v48  ;;  %v4339_v41 = vsel %vm744_vm1, %v4327_v24, 0.0  ;;  %v4330_v42 = vmul.f32 %v7059_v32, %v7059_v32 }
0x10bd   :  { %4340 = vadd.xlane.f32.xlu0 %v4339_v41  ;;  %v4305_v43 = vpop.xlane.xlu0 %4304 }
0x10be   :  { %v7069_v51 = vsub.f32 %v4282_v9, %v4316_v54  ;;  %v4315_v61 = vmul.f32 0.0625, %v4305_v43  ;;  %v4348_v15 = vsel %vm744_vm1, %v4330_v42, 0.0  ;;  %v4329_v28 = vmul.f32 %v7064_v19, %v7064_v19 }
0x10bf   :  { %4349 = vadd.xlane.f32.xlu1 %v4348_v15 }
0x10c0   :  { %v7074_v1 = vsub.f32 %v4281_v13, %v4315_v61  ;;  %v4345_v59 = vsel %vm744_vm1, %v4329_v28, 0.0  ;;  %v4332_v2 = vmul.f32 %v7069_v51, %v7069_v51 }
0x10c1   :  { %4346 = vadd.xlane.f32.xlu0 %v4345_v59 }
0x10c2   :  { %v4354_v12 = vsel %vm744_vm1, %v4332_v2, 0.0  ;;  %v4331_v29 = vmul.f32 %v7074_v1, %v7074_v1 }
0x10c3   :  { %4355 = vadd.xlane.f32.xlu1 %v4354_v12 }
0x10c4   :  { %v4351_v30 = vsel %vm744_vm1, %v4331_v29, 0.0 }
0x10c5   :  { %4352 = vadd.xlane.f32.xlu0 %v4351_v30 }
0x1140   :  { %v4338_v57 = vpop.xlane.xlu1 %4337 }
0x1141   :  { %v4358_v35 = vmul.f32 0.0625, %v4338_v57  ;;  %v4671_v57 = vld [vmem:[%s6186_s4 + $0x50] sm:$0xff] }
0x1142   :  { %v4335_v44 = vpop.xlane.xlu0 %4334 }
0x1143   :  { %v4366_v60 = vadd.f32 1e-05, %v4358_v35  ;;  %v4357_v62 = vmul.f32 0.0625, %v4335_v44  ;;  %v4670_v35 = vld [vmem:[%s6186_s4 + $0x48] sm:$0xff]  ;;  %v4669_v44 = vld [vmem:[%s6186_s4 + $0x40] sm:$0xff] }
0x1144   :  { %v4344_v4 = vpop.xlane.xlu1 %4343 }
0x1145   :  { %5913 = vrsqrt.f32 %v4366_v60  ;;  %v4365_v46 = vadd.f32 1e-05, %v4357_v62  ;;  %v4360_v55 = vmul.f32 0.0625, %v4344_v4  ;;  %v4668_v60 = vld [vmem:[%s6186_s4 + $0x38] sm:$0xff]  ;;  %v4667_v62 = vld [vmem:[%s6186_s4 + $0x30] sm:$0xff]  ;;  %v4666_v4 = vld [vmem:[%s6186_s4 + $0x28] sm:$0xff] }
0x1146   :  { %v4341_v14 = vpop.xlane.xlu0 %4340 }
0x1147   :  { %5915 = vrsqrt.f32 %v4365_v46  ;;  %v4359_v5 = vmul.f32 0.0625, %v4341_v14  ;;  %v4368_v6 = vadd.f32 1e-05, %v4360_v55  ;;  %v4665_v46 = vld [vmem:[%s6186_s4 + $0x20] sm:$0xff]  ;;  %v4664_v55 = vld [vmem:[%s6186_s4 + $0x18] sm:$0xff]  ;;  %v4663_v14 = vld [vmem:[%s6186_s4 + $0x10] sm:$0xff] }
0x1148   :  { %v4350_v38 = vpop.xlane.xlu1 %4349 }
0x1149   :  { %v4367_v45 = vadd.f32 1e-05, %v4359_v5  ;;  %v4362_v9 = vmul.f32 0.0625, %v4350_v38  ;;  %v4662_v5 = vld [vmem:[%s6186_s4 + $0x8] sm:$0xff]  ;;  %v4679_v38 = vld [vmem:[%s6186_s4 + $0x90] sm:$0xff] }
0x114a   :  { %v4347_v53 = vpop.xlane.xlu0 %4346 }
0x114b   :  { %5917 = vrsqrt.f32 %v4367_v45  ;;  %v4361_v37 = vmul.f32 0.0625, %v4347_v53  ;;  %v4370_v26 = vadd.f32 1e-05, %v4362_v9  ;;  %v4680_v45 = vld [vmem:[%s6186_s4 + $0x98] sm:$0xff] }
0x114c   :  { %5919 = vrsqrt.f32 %v4368_v6  ;;  %v4356_v47 = vpop.xlane.xlu1 %4355  ;;  %v4661_v6 = vld [vmem:[%s6186_s4] sm:$0xff] }
0x114d   :  { %v4369_v39 = vadd.f32 1e-05, %v4361_v37  ;;  %v4364_v22 = vmul.f32 0.0625, %v4356_v47 }
0x114e   :  { %v4353_v13 = vpop.xlane.xlu0 %4352 }
0x114f   :  { %5921 = vrsqrt.f32 %v4369_v39  ;;  %v4363_v17 = vmul.f32 0.0625, %v4353_v13  ;;  %v4372_v27 = vadd.f32 1e-05, %v4364_v22 }
0x1150   :  { %5923 = vrsqrt.f32 %v4370_v26 }
0x1151   :  { %v4371_v16 = vadd.f32 1e-05, %v4363_v17 }
0x1152   :  { %v5914_v21 = vpop.eup %5913 }
0x1153   :  { %v4382_v11 = vmul.f32 %v5914_v21, %v7043_v7  ;;  %5925 = vrsqrt.f32 %v4371_v16 }
0x1154   :  { %v5916_v31 = vpop.eup %5915  ;;  %5927 = vrsqrt.f32 %v4372_v27  ;;  %v4571_v27 = vld [vmem:[%s6181_s27 + $0x68] sm:$0xff] }
0x1155   :  { %v4381_v3 = vmul.f32 %v5916_v31, %v7045_v23  ;;  %v4396_v10 = vmul.f32 %v5049_v36, %v4382_v11 }
0x1157   :  { %v4395_v20 = vmul.f32 %v5049_v36, %v4381_v3  ;;  %v4410_v23 = vadd.f32 %v5050_v58, %v4396_v10 }
0x1158   :  { %v5918_v52 = vpop.eup %5917 }
0x1159   :  { %v4409_v33 = vadd.f32 %v5050_v58, %v4395_v20  ;;  %v4383_v34 = vmul.f32 %v5918_v52, %v7054_v0  ;;  %v5920_v25 = vpop.eup %5919  ;;  %v4573_v20 = vld [vmem:[%s6181_s27 + $0x78] sm:$0xff]  ;;  %v4572_v52 = vld [vmem:[%s6181_s27 + $0x70] sm:$0xff] }
0x115a   :  { %v4384_v7 = vmul.f32 %v5920_v25, %v7049_v40 }
0x115b   :  { %5051 = vmatmul.mubr.msk.f32.vlgmr.msra.gmra.mxu0 %vm744_vm1, %v4409_v33  ;;  %v4397_v8 = vmul.f32 %v5049_v36, %v4383_v34  ;;  %v4570_v33 = vld [vmem:[%s6181_s27 + $0x60] sm:$0xff]  ;;  %v4569_v34 = vld [vmem:[%s6181_s27 + $0x58] sm:$0xff] }
0x115c   :  { %4515 = vmatprep.mubr.f32.mxu0 %v5990_v18  ;;  %v5922_v24 = vpop.eup %5921  ;;  %v4398_v54 = vmul.f32 %v5049_v36, %v4384_v7  ;;  %4692 = vmatpush1.msra.mxu0 %v4676_v49  ;;  %v4567_v7 = vld [vmem:[%s6181_s27 + $0x48] sm:$0xff] }
0x115d   :  { %v4411_v48 = vadd.f32 %v5050_v58, %v4397_v8  ;;  %v4385_v41 = vmul.f32 %v5922_v24, %v7064_v19  ;;  %v5924_v0 = vpop.eup %5923  ;;  %4693 = vmatprep.subr.mxu0 %v5990_v18 }
0x115e   :  { %v4412_v42 = vadd.f32 %v5050_v58, %v4398_v54  ;;  %v4386_v61 = vmul.f32 %v5924_v0, %v7059_v32  ;;  %4694 = vmatpush1.msra.mxu0 %v4675_v50 }
0x115f   :  { %5052 = vmatmul.mubr.msk.f32.gmra.mxu0 %vm744_vm1, %v4410_v23  ;;  %v4399_v43 = vmul.f32 %v5049_v36, %v4385_v41  ;;  %4695 = vmatprep.subr.mxu0 %v5990_v18  ;;  %v4568_v23 = vld [vmem:[%s6181_s27 + $0x50] sm:$0xff]  ;;  %v4565_v41 = vld [vmem:[%s6181_s27 + $0x38] sm:$0xff] }
0x1160   :  { %4521 = vmatprep.mubr.f32.mxu0 %v5990_v18  ;;  %v5926_v15 = vpop.eup %5925  ;;  %v4400_v28 = vmul.f32 %v5049_v36, %v4386_v61  ;;  %v4563_v61 = vld [vmem:[%s6181_s27 + $0x28] sm:$0xff] }
0x1161   :  { %v4413_v40 = vadd.f32 %v5050_v58, %v4399_v43  ;;  %v4387_v59 = vmul.f32 %v5926_v15, %v7074_v1  ;;  %v5928_v19 = vpop.eup %5927 }
0x1162   :  { %v4414_v2 = vadd.f32 %v5050_v58, %v4400_v28  ;;  %v4388_v32 = vmul.f32 %v5928_v19, %v7069_v51  ;;  %v4674_v51 = vld [vmem:[%s6186_s4 + $0x68] sm:$0xff] }
0x1163   :  { %5053 = vmatmul.mubr.msk.f32.gmra.mxu0 %vm744_vm1, %v4411_v48  ;;  %v4401_v12 = vmul.f32 %v5049_v36, %v4387_v59  ;;  %v4566_v48 = vld [vmem:[%s6181_s27 + $0x40] sm:$0xff]  ;;  %v4561_v59 = vld [vmem:[%s6181_s27 + $0x18] sm:$0xff] }
0x1164   :  { %4527 = vmatprep.mubr.f32.mxu0 %v5990_v18  ;;  %v4402_v30 = vmul.f32 %v5049_v36, %v4388_v32  ;;  %4696 = vmatpush1.msra.mxu0 %v4674_v51  ;;  %v4559_v32 = vld [vmem:[%s6181_s27 + $0x8] sm:$0xff] }
0x1165   :  { %v4415_v29 = vadd.f32 %v5050_v58, %v4401_v12  ;;  %4697 = vmatprep.subr.mxu0 %v5990_v18 }
0x1166   :  { %v4416_v1 = vadd.f32 %v5050_v58, %v4402_v30  ;;  %4698 = vmatpush1.msra.mxu0 %v4673_v63  ;;  %v4558_v30 = vld [vmem:[%s6181_s27] sm:$0xff] }
0x1167   :  { %5054 = vmatmul.mubr.msk.f32.gmra.mxu0 %vm744_vm1, %v4412_v42  ;;  %4699 = vmatprep.subr.mxu0 %v5990_v18  ;;  %v4564_v42 = vld [vmem:[%s6181_s27 + $0x30] sm:$0xff]  ;;  %v5929_v63 = vld [vmem:[%s6171_s24] sm:$0x3] }
0x1168   :  { %4533 = vmatprep.mubr.f32.mxu0 %v5990_v18  ;;  %4700 = vmatpush1.msra.mxu0 %v4672_v56  ;;  %v4678_v56 = vld [vmem:[%s6186_s4 + $0x88] sm:$0xff] }
0x1169   :  { %4701 = vmatprep.subr.mxu0 %v5990_v18 }
0x116a   :  { %4702 = vmatpush1.msra.mxu0 %v4671_v57  ;;  %v4677_v57 = vld [vmem:[%s6186_s4 + $0x80] sm:$0xff] }
0x116b   :  { %5055 = vmatmul.mubr.msk.f32.gmra.mxu0 %vm744_vm1, %v4413_v40  ;;  %4703 = vmatprep.subr.mxu0 %v5990_v18  ;;  %v4562_v40 = vld [vmem:[%s6181_s27 + $0x20] sm:$0xff] }
0x116c   :  { %4539 = vmatprep.mubr.f32.mxu0 %v5990_v18  ;;  %4704 = vmatpush1.msra.mxu0 %v4670_v35 }
0x116d   :  { %4705 = vmatprep.subr.mxu0 %v5990_v18 }
0x116e   :  { %4706 = vmatpush1.msra.mxu0 %v4669_v44 }
0x116f   :  { %5056 = vmatmul.mubr.msk.f32.gmra.mxu0 %vm744_vm1, %v4414_v2  ;;  %4707 = vmatprep.subr.mxu0 %v5990_v18  ;;  %v4560_v2 = vld [vmem:[%s6181_s27 + $0x10] sm:$0xff]  ;;  %s5992_s27 = smov [#allocation2]  }
0x1170   :  { %4545 = vmatprep.mubr.f32.mxu0 %v5990_v18  ;;  %4708 = vmatpush1.msra.mxu0 %v4668_v60  ;;  %v5060_v60 = vld [vmem:[%s7225_s26] ss:$0 sm:$0xff]  ;;  %s4769_s28 = sshll.u32 %s5992_s27, 4  ;;  %s4770_s28 = int_to_ptr.vmem [resolvable:$true] %s4769_s28 }
0x1171   :  { %4709 = vmatprep.subr.mxu0 %v5990_v18  ;;  %s5930_s24 = scalar_lea.vmem %s4770_s28, 32  ;;  %p5935_p1 = scmp.lt.s32.totalorder %s4770_s28, %s4770_s28 }
0x1172   :  { %4710 = vmatpush1.msra.mxu0 %v4667_v62  ;;  %p5931_p0 = scmp.ne.s32.totalorder %s4770_s28, %s5930_s24  ;;  %p5936_p2 = scmp.lt.s32.totalorder %s5930_s24, %s5930_s24 }
0x1173   :  { %5057 = vmatmul.mubr.msk.f32.gmra.mxu0 %vm744_vm1, %v4415_v29  ;;  %4711 = vmatprep.subr.mxu0 %v5990_v18 }
0x1174   :  { %4551 = vmatprep.mubr.f32.mxu0 %v5990_v18  ;;  %4712 = vmatpush1.msra.mxu0 %v4666_v4  ;;  %p5937_p3 = por %p5936_p2, %p5935_p1 }
0x1175   :  { %4713 = vmatprep.subr.mxu0 %v5990_v18 }
0x1176   :  { %4714 = vmatpush1.msra.mxu0 %v4665_v46  ;;  %p5938_p4 = pnand %p5937_p3, %p5931_p0 }
0x1177   :  { %5058 = vmatmul.mubr.msk.f32.gmra.mxu0 %vm744_vm1, %v4416_v1  ;;  %4715 = vmatprep.subr.mxu0 %v5990_v18 }
0x1178   :  { %4716 = vmatpush1.msra.mxu0 %v4664_v55 }
0x1179   :  { %4717 = vmatprep.subr.mxu0 %v5990_v18 }
0x117a   :  { %4718 = vmatpush1.msra.mxu0 %v4663_v14 }
0x117b   :  { %4719 = vmatprep.subr.mxu0 %v5990_v18 }
0x117c   :  { %4720 = vmatpush1.msra.mxu0 %v4662_v5 }
0x117d   :  { %4721 = vmatprep.subr.mxu0 %v5990_v18 }
0x117e   :  { %4722 = vmatpush1.msra.mxu0 %v4661_v6 }
0x117f   :  { %4747 = vmatprep.subr.mxu0 %v5990_v18 }
0x1180   :  { %4748 = vmatpush2.msra.mxu0 %v4680_v45 }
0x1181   :  { %4749 = vmatprep.subr.mxu0 %v5990_v18 }
0x1182   :  { %4750 = vmatpush2.msra.mxu0 %v4679_v38 }
0x1183   :  { %4751 = vmatprep.subr.mxu0 %v5990_v18 }
0x1184   :  { %4752 = vmatpush2.msra.mxu0 %v4678_v56 }
0x1185   :  { %4753 = vmatprep.subr.mxu0 %v5990_v18 }
0x1186   :  { %4754 = vmatpush2.msra.mxu0 %v4677_v57 }
0x121b   :  { %v4511_v53 = vpop.f32.mrf.mxu0 }
0x121c   :  { %v4574_v51 = vmul.f32 %v4558_v30, %v4511_v53 }
0x121d   :  { %v4513_v37 = vpop.f32.mrf.mxu0 }
0x121e   :  { %v4575_v50 = vmul.f32 %v4559_v32, %v4513_v37 }
0x121f   :  { %v4517_v9 = vpop.f32.mrf.mxu0 }
0x1220   :  { %v4576_v49 = vmul.f32 %v4560_v2, %v4517_v9 }
0x1221   :  { %v4519_v39 = vpop.f32.mrf.mxu0 }
0x1222   :  { %v4577_v1 = vmul.f32 %v4561_v59, %v4519_v39 }
0x1223   :  { %v4523_v13 = vpop.f32.mrf.mxu0 }
0x1224   :  { %v4578_v29 = vmul.f32 %v4562_v40, %v4523_v13 }
0x1225   :  { %v4525_v26 = vpop.f32.mrf.mxu0 }
0x1226   :  { %v4579_v12 = vmul.f32 %v4563_v61, %v4525_v26 }
0x1227   :  { %v4529_v47 = vpop.f32.mrf.mxu0 }
0x1228   :  { %v4580_v19 = vmul.f32 %v4564_v42, %v4529_v47 }
0x1229   :  { %v4531_v17 = vpop.f32.mrf.mxu0 }
0x122a   :  { %v4581_v28 = vmul.f32 %v4565_v41, %v4531_v17 }
0x122b   :  { %v4535_v21 = vpop.f32.mrf.mxu0 }
0x122c   :  { %v4582_v15 = vmul.f32 %v4566_v48, %v4535_v21 }
0x122d   :  { %v4537_v31 = vpop.f32.mrf.mxu0 }
0x122e   :  { %v4583_v43 = vmul.f32 %v4567_v7, %v4537_v31 }
0x122f   :  { %v4541_v22 = vpop.f32.mrf.mxu0 }
0x1230   :  { %v4584_v0 = vmul.f32 %v4568_v23, %v4541_v22 }
0x1231   :  { %v4543_v3 = vpop.f32.mrf.mxu0 }
0x1232   :  { %v4585_v54 = vmul.f32 %v4569_v34, %v4543_v3 }
0x1233   :  { %v4547_v16 = vpop.f32.mrf.mxu0 }
0x1234   :  { %v4586_v24 = vmul.f32 %v4570_v33, %v4547_v16 }
0x1235   :  { %v4549_v11 = vpop.f32.mrf.mxu0 }
0x1236   :  { %v4587_v8 = vmul.f32 %v4571_v27, %v4549_v11 }
0x1237   :  { %v4553_v36 = vpop.f32.mrf.mxu0 }
0x1238   :  { %v4588_v25 = vmul.f32 %v4572_v52, %v4553_v36 }
0x1239   :  { %v4555_v58 = vpop.f32.mrf.mxu0 }
0x123a   :  { %v4589_v10 = vmul.f32 %v4573_v20, %v4555_v58 }
0x123c   :  { %4606 = vmatprep.subr.mxu1 %v4589_v10 }
0x123d   :  { %4607 = vmatpush1.msra.mxu1 %v4588_v25 }
0x123e   :  { %4608 = vmatprep.subr.mxu1 %v4587_v8 }
0x123f   :  { %4609 = vmatpush1.msra.mxu1 %v4586_v24 }
0x1240   :  { %4610 = vmatprep.subr.mxu1 %v4585_v54 }
0x1241   :  { %4611 = vmatpush1.msra.mxu1 %v4584_v0 }
0x1242   :  { %4612 = vmatprep.subr.mxu1 %v4583_v43 }
0x1243   :  { %4613 = vmatpush1.msra.mxu1 %v4582_v15 }
0x1244   :  { %4614 = vmatprep.subr.mxu1 %v4581_v28 }
0x1245   :  { %4615 = vmatpush1.msra.mxu1 %v4580_v19 }
0x1246   :  { %4616 = vmatprep.subr.mxu1 %v4579_v12 }
0x1247   :  { %4617 = vmatpush1.msra.mxu1 %v4578_v29 }
0x1248   :  { %4618 = vmatprep.subr.mxu1 %v4577_v1 }
0x1249   :  { %4619 = vmatpush1.msra.mxu1 %v4576_v49 }
0x124a   :  { %4620 = vmatprep.subr.mxu1 %v4575_v50 }
0x124b   :  { %4621 = vmatpush1.msra.mxu1 %v4574_v51 }
0x124c   :  { %5059 = vmatmul.mubr.msk.f32.vlgmr.msra.gmra.mxu1 %vm1424_vm4, %v5929_v63 }
0x130c   :  { %v4656_v35 = vpop.f32.mrf.mxu1 }
0x130e   :  { %v4658_v44 = vpop.f32.mrf.mxu1 }
0x130f   :  { %5061 = vmatprep.mubr.msk.f32.mxu0 %vm1031_vm2, %v4658_v44 }
0x1310   :  { %4756 = vmatmul.mubr.f32.vlgmr.msra.gmra.mxu0 %v4656_v35 }
0x13d0   :  { %v4757_v62 = vpop.f32.mrf.mxu0 }
0x13d1   :  { %v4758_v4 = vadd.f32 %v5060_v60, %v4757_v62 }
0x13d2   :  { %v4759_v46 = vpop.f32.mrf.mxu0 }
0x13d3   :  { %4762 = vst.msk [vmem:[#allocation2] sm:$0x3] %vm4761_vm9, %v4758_v4 }
0x13d4   :  { %5941 = shalt.err (!%p5938_p4)
}
0x13d5   :  { %4772 = dma.vmem_to_hbm [thread:$0]  %s4770_s28, 32, %s6191_s6, [#allocation3]  }
0x13d6   :  { %5950 = dma.done.wait [#allocation3], 32  }
0x13d7   :  { %5951 = vsyncadd [#allocation3], 4294967264 }
0x13d8   :  { %4776 = vsyncpa [#allocation3], 1 }

</bundles_post_ra>
